<compile_context>
chip_gen: v5e
topology: v5e:2x2
jax: 0.10.0
libtpu: 0.0.40
codegen_flags: <defaults>
</compile_context>

<pallas_src>
import math
import functools

import numpy as np
import jax
import jax.numpy as jnp
from jax.experimental import pallas as pl
from jax.experimental.pallas import tpu as pltpu

# Safe scoped-VMEM limit on v5e/v6e/v7x; raise per generation if tiles are grown.
VMEM_LIMIT_BYTES = 32 * 1024 * 1024


# ------------------------------ in-kernel math ------------------------------ #

def _erf_f32(x):
    # Abramowitz & Stegun 7.1.26 rational approximation of erf (|abs err| < 1.5e-7 ~ f32 eps).
    # Lets the exact (erf-based) nn.GELU epilogue fuse into the matmul kernel using only
    # EUP-friendly primitives (exp + divide), independent of Mosaic erf support.
    p = 0.3275911
    a1, a2, a3, a4, a5 = 0.254829592, -0.284496736, 1.421413741, -1.453152027, 1.061405429
    ax = jnp.abs(x)
    t = 1.0 / (1.0 + p * ax)
    poly = ((((a5 * t + a4) * t + a3) * t + a2) * t + a1) * t
    e = 1.0 - poly * jnp.exp(-ax * ax)
    return jnp.where(x < 0.0, -e, e)


def _gelu_exact(x):
    return 0.5 * x * (1.0 + _erf_f32(x * (1.0 / math.sqrt(2.0))))


# ------------------------------ Pallas kernels ------------------------------ #

def _ln_linear_kernel(x_ref, g_ref, b_ref, w_ref, bias_ref, o_ref, *, eps, gelu):
    # Fused LayerNorm -> matmul -> bias (-> exact GELU).  LN in f32, matmul operands bf16.
    x = x_ref[...].astype(jnp.float32)
    mu = jnp.mean(x, axis=-1, keepdims=True)
    xc = x - mu
    var = jnp.mean(xc * xc, axis=-1, keepdims=True)      # biased variance (torch LayerNorm)
    xn = xc * jax.lax.rsqrt(var + eps) * g_ref[...] + b_ref[...]
    y = jnp.dot(xn.astype(w_ref.dtype), w_ref[...],
                preferred_element_type=jnp.float32) + bias_ref[...]
    if gelu:
        y = _gelu_exact(y)
    o_ref[...] = y.astype(o_ref.dtype)


def _linear_res_kernel(x_ref, w_ref, bias_ref, r_ref, o_ref):
    # Fused matmul -> bias -> residual add.
    y = jnp.dot(x_ref[...].astype(w_ref.dtype), w_ref[...],
                preferred_element_type=jnp.float32)
    o_ref[...] = (y + bias_ref[...] + r_ref[...].astype(jnp.float32)).astype(o_ref.dtype)


def _window_attn_kernel(*refs, num_heads, masked):
    # Block = one (batch, window-column) slab: all H//ws windows, all heads (lane-dense C).
    if masked:
        qkv_ref, rm_ref, cm_ref, o_ref = refs
    else:
        qkv_ref, o_ref = refs

    blk = qkv_ref[...]                               # (1, nw, ws, 1, ws, 3C)
    _, nw, ws, _, _, c3 = blk.shape
    c = c3 // 3
    m2 = ws * ws
    e = c // num_heads
    y = blk.reshape(nw, m2, c3).astype(jnp.float32)  # [Q|K|V] contiguous on the lane axis

    if masked:
        # row mask: only the last window-row of the image (= last window in this block)
        # col mask: every window when this grid step is the last window-column
        widx = jax.lax.broadcasted_iota(jnp.int32, (nw, m2, m2), 0)
        mask = jnp.where(widx == nw - 1, rm_ref[...][None, :, :], 0.0)
        last_col = pl.program_id(1) == pl.num_programs(1) - 1
        mask = mask + jnp.where(last_col, cm_ref[...], 0.0)[None, :, :]

    outs = []
    for h in range(num_heads):                       # static unroll over heads
        q = y[:, :, h * e:(h + 1) * e].astype(jnp.bfloat16)           # scale pre-folded in W1
        k = y[:, :, c + h * e:c + (h + 1) * e].astype(jnp.bfloat16)
        v = y[:, :, 2 * c + h * e:2 * c + (h + 1) * e].astype(jnp.bfloat16)
        s = jnp.einsum('wme,wne->wmn', q, k, preferred_element_type=jnp.float32)
        if masked:
            s = s + mask
        s = s - jnp.max(s, axis=-1, keepdims=True)
        pr = jnp.exp(s)
        pr = pr * pl.reciprocal(jnp.sum(pr, axis=-1, keepdims=True), approx=True)
        outs.append(jnp.einsum('wmn,wne->wme', pr.astype(jnp.bfloat16), v,
                               preferred_element_type=jnp.float32))
    out = jnp.concatenate(outs, axis=-1)             # (nw, m2, C): heads back on lane axis
    o_ref[...] = out.reshape(o_ref.shape).astype(o_ref.dtype)


# ------------------------------ kernel wrappers ------------------------------ #

def _row_tile(m, tm=512):
    tm = min(tm, m)
    # Keep >= 2 row blocks when possible so dual-TensorCore chips (v7x) shard the grid.
    if tm == m and m % 16 == 0:
        tm = m // 2
    return tm


def pallas_ln_linear(x, gamma, beta, w, bias, *, gelu=False, eps=1e-5, tm=512, tn=512):
    m, cin = x.shape
    cout = w.shape[1]
    tm = _row_tile(m, tm)
    tn = tn if (cout > tn and cout % tn == 0) else cout      # tile Cout only when it is large
    kern = functools.partial(_ln_linear_kernel, eps=eps, gelu=gelu)
    return pl.pallas_call(
        kern,
        out_shape=jax.ShapeDtypeStruct((m, cout), x.dtype),
        grid=(pl.cdiv(m, tm), cout // tn),
        in_specs=[
            pl.BlockSpec((tm, cin), lambda i, j: (i, 0)),
            pl.BlockSpec((1, cin), lambda i, j: (0, 0)),
            pl.BlockSpec((1, cin), lambda i, j: (0, 0)),
            pl.BlockSpec((cin, tn), lambda i, j: (0, j)),
            pl.BlockSpec((1, tn), lambda i, j: (0, j)),
        ],
        out_specs=pl.BlockSpec((tm, tn), lambda i, j: (i, j)),
        compiler_params=pltpu.CompilerParams(
            dimension_semantics=("parallel", "parallel"),
            vmem_limit_bytes=VMEM_LIMIT_BYTES),
    )(x, gamma.reshape(1, cin), beta.reshape(1, cin), w, bias.reshape(1, cout))


def pallas_linear_residual(x, w, bias, res, *, tm=512, tn=512):
    m, cin = x.shape
    cout = w.shape[1]
    tm = _row_tile(m, tm)
    tn = tn if (cout > tn and cout % tn == 0) else cout
    return pl.pallas_call(
        _linear_res_kernel,
        out_shape=jax.ShapeDtypeStruct((m, cout), res.dtype),
        grid=(pl.cdiv(m, tm), cout // tn),
        in_specs=[
            pl.BlockSpec((tm, cin), lambda i, j: (i, 0)),
            pl.BlockSpec((cin, tn), lambda i, j: (0, j)),
            pl.BlockSpec((1, tn), lambda i, j: (0, j)),
            pl.BlockSpec((tm, tn), lambda i, j: (i, j)),
        ],
        out_specs=pl.BlockSpec((tm, tn), lambda i, j: (i, j)),
        compiler_params=pltpu.CompilerParams(
            dimension_semantics=("parallel", "parallel"),
            vmem_limit_bytes=VMEM_LIMIT_BYTES),
    )(x, w, bias.reshape(1, cout), res)


def pallas_window_attention(qkv6, row_mask, col_mask, *, num_heads, masked):
    # qkv6: (B, H//ws, ws, W//ws, ws, 3C) -- a free reshape of the proj1 output.
    b, hw, ws, ww, _, c3 = qkv6.shape
    c = c3 // 3
    m2 = ws * ws
    kern = functools.partial(_window_attn_kernel, num_heads=num_heads, masked=masked)
    in_specs = [pl.BlockSpec((1, hw, ws, 1, ws, c3), lambda bi, j: (bi, 0, 0, j, 0, 0))]
    inputs = [qkv6]
    if masked:
        in_specs += [pl.BlockSpec((m2, m2), lambda bi, j: (0, 0)),
                     pl.BlockSpec((m2, m2), lambda bi, j: (0, 0))]
        inputs += [row_mask, col_mask]
    return pl.pallas_call(
        kern,
        out_shape=jax.ShapeDtypeStruct((b, hw, ws, ww, ws, c), qkv6.dtype),
        grid=(b, ww),
        in_specs=in_specs,
        out_specs=pl.BlockSpec((1, hw, ws, 1, ws, c), lambda bi, j: (bi, 0, 0, j, 0, 0)),
        compiler_params=pltpu.CompilerParams(
            dimension_semantics=("parallel", "parallel"),
            vmem_limit_bytes=VMEM_LIMIT_BYTES),
    )(*inputs)


# ------------------------------ glue / model ------------------------------ #

def build_shift_masks(ws):
    """row_mask / column_mask exactly as in ShiftedWindowMSA.forward."""
    m2 = ws * ws
    d = ws * (ws // 2)
    row_mask = np.zeros((m2, m2), np.float32)
    row_mask[-d:, 0:-d] = float("-inf")
    row_mask[0:-d, -d:] = float("-inf")
    # rearrange '(r w1) (c w2) -> (w1 r) (w2 c)', w1 = w2 = ws
    col_mask = row_mask.reshape(ws, ws, ws, ws).transpose(1, 0, 3, 2).reshape(m2, m2)
    return row_mask, col_mask


def prepare_block_params(p, C, num_heads, ws):
    """Torch-layout params -> kernel layout: proj1 columns permuted from (c,K)-interleaved
    to contiguous [Q|K|V], 1/sqrt(head_dim) folded into the Q columns, matmul weights bf16."""
    scale = 1.0 / math.sqrt(C / num_heads)
    perm = np.arange(3 * C).reshape(C, 3).T.reshape(-1)
    col_scale = np.concatenate([np.full(C, scale, np.float32), np.ones(2 * C, np.float32)])
    row_mask, col_mask = build_shift_masks(ws)
    return dict(
        ln_g=p["ln_g"], ln_b=p["ln_b"],
        w1_qkv=(p["w1"][:, perm] * col_scale).astype(jnp.bfloat16),
        b1_qkv=(p["b1"][perm] * col_scale).astype(jnp.float32),
        w2=p["w2"].astype(jnp.bfloat16), b2=p["b2"],
        mlp_w1=p["mlp_w1"].astype(jnp.bfloat16), mlp_b1=p["mlp_b1"],
        mlp_w2=p["mlp_w2"].astype(jnp.bfloat16), mlp_b2=p["mlp_b2"],
        row_mask=jnp.asarray(row_mask), col_mask=jnp.asarray(col_mask),
    )


def swin_encoder_block(x, kp, num_heads, ws, masked):
    B, N, C = x.shape
    H = W = int(math.sqrt(N))
    hw, ww = H // ws, W // ws
    x2d = x.reshape(B * N, C)

    # --- (S)W-MSA: LN -> proj1 (QKV) fused ---
    y = pallas_ln_linear(x2d, kp["ln_g"], kp["ln_b"], kp["w1_qkv"], kp["b1_qkv"])
    y = y.reshape(B, H, W, 3 * C)
    if masked:
        # TODO(synk): cyclic shift kept as XLA jnp.roll (wrap-around windows are not
        #             expressible in a BlockSpec index_map).
        y = jnp.roll(y, ((-ws) // 2, (-ws) // 2), axis=(1, 2))
    qkv6 = y.reshape(B, hw, ws, ww, ws, 3 * C)                     # free reshape, no transpose
    att6 = pallas_window_attention(qkv6, kp["row_mask"], kp["col_mask"],
                                   num_heads=num_heads, masked=masked)
    att = att6.reshape(B, H, W, C)                                 # free reshape
    if masked:
        att = jnp.roll(att, (ws // 2, ws // 2), axis=(1, 2))
    res1 = pallas_linear_residual(att.reshape(B * N, C), kp["w2"], kp["b2"], x2d)

    # --- MLP: LN -> Linear -> exact GELU fused, then Linear + residual fused ---
    # Note: the reference SwinEncoderBlock has a single nn.LayerNorm used for both norms,
    # so sharing ln_g / ln_b here is intentional.
    h = pallas_ln_linear(res1, kp["ln_g"], kp["ln_b"], kp["mlp_w1"], kp["mlp_b1"], gelu=True)
    out = pallas_linear_residual(h, kp["mlp_w2"], kp["mlp_b2"], res1)
    return out.reshape(B, N, C)


def alternating_encoder_block(x, params, num_heads, ws):
    C = x.shape[-1]
    x = swin_encoder_block(x, prepare_block_params(params["wsa"], C, num_heads, ws),
                           num_heads, ws, masked=False)
    x = swin_encoder_block(x, prepare_block_params(params["swsa"], C, num_heads, ws),
                           num_heads, ws, masked=True)
    return x


# ---------------------------- parameter init ------------------------------- #

def init_block_params(key, C):
    ks = jax.random.split(key, 4)

    def lin(k, fin, fout):
        bound = 1.0 / math.sqrt(fin)           # torch nn.Linear default init range
        kw, kb = jax.random.split(k)
        w = jax.random.uniform(kw, (fin, fout), jnp.float32, -bound, bound)
        b = jax.random.uniform(kb, (fout,), jnp.float32, -bound, bound)
        return w, b

    w1, b1 = lin(ks[0], C, 3 * C)      # ShiftedWindowMSA.proj1
    w2, b2 = lin(ks[1], C, C)          # ShiftedWindowMSA.proj2
    mw1, mb1 = lin(ks[2], C, 4 * C)    # MLP1[0]
    mw2, mb2 = lin(ks[3], 4 * C, C)    # MLP1[2]
    return dict(
        ln_g=jnp.ones((C,), jnp.float32), ln_b=jnp.zeros((C,), jnp.float32),
        w1=w1, b1=b1, w2=w2, b2=b2,
        mlp_w1=mw1, mlp_b1=mb1, mlp_w2=mw2, mlp_b2=mb2,
    )


# --------------------------------- main ------------------------------------ #

if __name__ == "__main__":
    B, H, W, C = 2, 8, 8, 32          # N = H*W = 64 tokens
    NUM_HEADS, WS = 4, 4              # window_size divides H, W

    key = jax.random.PRNGKey(0)
    kx, kp1, kp2 = jax.random.split(key, 3)
    x = jax.random.normal(kx, (B, H * W, C), jnp.float32)
    params = {
        "wsa": init_block_params(kp1, C),
        "swsa": init_block_params(kp2, C),
    }

    fn = jax.jit(alternating_encoder_block, static_argnums=(2, 3))
    out = jax.block_until_ready(fn(x, params, NUM_HEADS, WS))
    assert out.shape == (B, H * W, C) and out.dtype == jnp.float32
    assert bool(jnp.all(jnp.isfinite(out)))
    print("KERNEL_OK")
</pallas_src>

<mosaic_0001>
module attributes {stable_mosaic.version = 11 : i64} {
  func.func @_ln_linear_kernel(%arg0: i32, %arg1: i32, %arg2: memref<64x32xf32, #tpu.memory_space<vmem>>, %arg3: memref<1x32xf32, #tpu.memory_space<vmem>>, %arg4: memref<1x32xf32, #tpu.memory_space<vmem>>, %arg5: memref<32x96xbf16, #tpu.memory_space<vmem>>, %arg6: memref<1x96xf32, #tpu.memory_space<vmem>>, %arg7: memref<64x96xf32, #tpu.memory_space<vmem>>) attributes {dimension_semantics = [#tpu.dimension_semantics<parallel>, #tpu.dimension_semantics<parallel>], iteration_bounds = array<i64: 2, 1>, scalar_prefetch = 0 : i64, scratch_operands = 0 : i64, tpu.core_type = #tpu.core_type<tc>, window_params = [{transform_indices = @transform_0, window_bounds = array<i64: 64, 32>}, {pipeline_mode = #tpu.pipeline_mode<synchronous>, transform_indices = @transform_1, window_bounds = array<i64: 1, 32>}, {pipeline_mode = #tpu.pipeline_mode<synchronous>, transform_indices = @transform_2, window_bounds = array<i64: 1, 32>}, {transform_indices = @transform_3, window_bounds = array<i64: 32, 96>}, {transform_indices = @transform_4, window_bounds = array<i64: 1, 96>}, {transform_indices = @transform_5, window_bounds = array<i64: 64, 96>}]} {
    %c0 = arith.constant 0 : index
    %c0_0 = arith.constant 0 : index
    %0 = vector.load %arg2[%c0, %c0_0] : memref<64x32xf32, #tpu.memory_space<vmem>>, vector<64x32xf32>
    %cst = arith.constant dense<0.000000e+00> : vector<64xf32>
    %1 = vector.multi_reduction <add>, %0, %cst [1] : vector<64x32xf32> to vector<64xf32>
    %2 = vector.shape_cast %1 : vector<64xf32> to vector<64x1xf32>
    %cst_1 = arith.constant 3.200000e+01 : f32
    %3 = vector.broadcast %cst_1 : f32 to vector<64x1xf32>
    %4 = arith.divf %2, %3 : vector<64x1xf32>
    %5 = vector.broadcast %4 : vector<64x1xf32> to vector<64x32xf32>
    %6 = arith.subf %0, %5 : vector<64x32xf32>
    %7 = arith.mulf %6, %6 : vector<64x32xf32>
    %cst_2 = arith.constant dense<0.000000e+00> : vector<64xf32>
    %8 = vector.multi_reduction <add>, %7, %cst_2 [1] : vector<64x32xf32> to vector<64xf32>
    %9 = vector.shape_cast %8 : vector<64xf32> to vector<64x1xf32>
    %cst_3 = arith.constant 3.200000e+01 : f32
    %10 = vector.broadcast %cst_3 : f32 to vector<64x1xf32>
    %11 = arith.divf %9, %10 : vector<64x1xf32>
    %cst_4 = arith.constant 9.99999974E-6 : f32
    %12 = vector.broadcast %cst_4 : f32 to vector<64x1xf32>
    %13 = arith.addf %11, %12 : vector<64x1xf32>
    %14 = math.rsqrt %13 : vector<64x1xf32>
    %15 = vector.broadcast %14 : vector<64x1xf32> to vector<64x32xf32>
    %16 = arith.mulf %6, %15 : vector<64x32xf32>
    %c0_5 = arith.constant 0 : index
    %c0_6 = arith.constant 0 : index
    %17 = vector.load %arg3[%c0_5, %c0_6] : memref<1x32xf32, #tpu.memory_space<vmem>>, vector<1x32xf32>
    %18 = vector.broadcast %17 : vector<1x32xf32> to vector<64x32xf32>
    %19 = arith.mulf %16, %18 : vector<64x32xf32>
    %c0_7 = arith.constant 0 : index
    %c0_8 = arith.constant 0 : index
    %20 = vector.load %arg4[%c0_7, %c0_8] : memref<1x32xf32, #tpu.memory_space<vmem>>, vector<1x32xf32>
    %21 = vector.broadcast %20 : vector<1x32xf32> to vector<64x32xf32>
    %22 = arith.addf %19, %21 : vector<64x32xf32>
    %23 = arith.truncf %22 : vector<64x32xf32> to vector<64x32xbf16>
    %c0_9 = arith.constant 0 : index
    %c0_10 = arith.constant 0 : index
    %24 = vector.load %arg5[%c0_9, %c0_10] : memref<32x96xbf16, #tpu.memory_space<vmem>>, vector<32x96xbf16>
    %cst_11 = arith.constant dense<0.000000e+00> : vector<64x96xf32>
    %25 = tpu.matmul %23, %24, %cst_11 {dimension_numbers = #tpu.dot_dimension_numbers<[1], [0], [0], [1], [0, 0, 1, 1], [], []>} : vector<64x32xbf16>, vector<32x96xbf16>, vector<64x96xf32> -> vector<64x96xf32>
    %c0_12 = arith.constant 0 : index
    %c0_13 = arith.constant 0 : index
    %26 = vector.load %arg6[%c0_12, %c0_13] : memref<1x96xf32, #tpu.memory_space<vmem>>, vector<1x96xf32>
    %27 = vector.broadcast %26 : vector<1x96xf32> to vector<64x96xf32>
    %28 = arith.addf %25, %27 : vector<64x96xf32>
    %c0_14 = arith.constant 0 : index
    %c0_15 = arith.constant 0 : index
    %29 = vector.load %arg7[%c0_14, %c0_15] : memref<64x96xf32, #tpu.memory_space<vmem>>, vector<64x96xf32>
    tpu.vector_store %arg7[%c0_14, %c0_15], %28 {strides = array<i32>} : memref<64x96xf32, #tpu.memory_space<vmem>>, vector<64x96xf32>,
    return
  }
  func.func @transform_0(%arg0: i32, %arg1: i32) -> (i32, i32) {
    %c0_i32 = arith.constant 0 : i32
    %c0_i32_0 = arith.constant 0 : i32
    return %arg0, %c0_i32 : i32, i32
  }
  func.func @transform_1(%arg0: i32, %arg1: i32) -> (i32, i32) {
    %c0_i32 = arith.constant 0 : i32
    %c0_i32_0 = arith.constant 0 : i32
    %c0_i32_1 = arith.constant 0 : i32
    return %c0_i32, %c0_i32_0 : i32, i32
  }
  func.func @transform_2(%arg0: i32, %arg1: i32) -> (i32, i32) {
    %c0_i32 = arith.constant 0 : i32
    %c0_i32_0 = arith.constant 0 : i32
    %c0_i32_1 = arith.constant 0 : i32
    return %c0_i32, %c0_i32_0 : i32, i32
  }
  func.func @transform_3(%arg0: i32, %arg1: i32) -> (i32, i32) {
    %c0_i32 = arith.constant 0 : i32
    %c0_i32_0 = arith.constant 0 : i32
    return %c0_i32, %arg1 : i32, i32
  }
  func.func @transform_4(%arg0: i32, %arg1: i32) -> (i32, i32) {
    %c0_i32 = arith.constant 0 : i32
    %c0_i32_0 = arith.constant 0 : i32
    return %c0_i32, %arg1 : i32, i32
  }
  func.func @transform_5(%arg0: i32, %arg1: i32) -> (i32, i32) {
    %c0_i32 = arith.constant 0 : i32
    return %arg0, %arg1 : i32, i32
  }
}

module attributes {stable_mosaic.version = 11 : i64} {
  func.func @_window_attn_kernel(%arg0: i32, %arg1: i32, %arg2: memref<1x2x4x1x4x96xf32, #tpu.memory_space<vmem>>, %arg3: memref<1x2x4x1x4x32xf32, #tpu.memory_space<vmem>>) attributes {dimension_semantics = [#tpu.dimension_semantics<parallel>, #tpu.dimension_semantics<parallel>], iteration_bounds = array<i64: 2, 2>, scalar_prefetch = 0 : i64, scratch_operands = 0 : i64, tpu.core_type = #tpu.core_type<tc>, window_params = [{transform_indices = @transform_0, window_bounds = array<i64: 1, 2, 4, 1, 4, 96>}, {transform_indices = @transform_1, window_bounds = array<i64: 1, 2, 4, 1, 4, 32>}]} {
    %c0 = arith.constant 0 : index
    %c0_0 = arith.constant 0 : index
    %c0_1 = arith.constant 0 : index
    %c0_2 = arith.constant 0 : index
    %c0_3 = arith.constant 0 : index
    %c0_4 = arith.constant 0 : index
    %0 = vector.load %arg2[%c0, %c0_0, %c0_1, %c0_2, %c0_3, %c0_4] : memref<1x2x4x1x4x96xf32, #tpu.memory_space<vmem>>, vector<1x2x4x1x4x96xf32>
    %1 = vector.shape_cast %0 : vector<1x2x4x1x4x96xf32> to vector<2x16x96xf32>
    %2 = vector.extract_strided_slice %1 {offsets = [0, 0, 0], sizes = [2, 16, 8], strides = [1, 1, 1]} : vector<2x16x96xf32> to vector<2x16x8xf32>
    %3 = arith.truncf %2 : vector<2x16x8xf32> to vector<2x16x8xbf16>
    %4 = vector.extract_strided_slice %1 {offsets = [0, 0, 32], sizes = [2, 16, 8], strides = [1, 1, 1]} : vector<2x16x96xf32> to vector<2x16x8xf32>
    %5 = arith.truncf %4 : vector<2x16x8xf32> to vector<2x16x8xbf16>
    %6 = vector.extract_strided_slice %1 {offsets = [0, 0, 64], sizes = [2, 16, 8], strides = [1, 1, 1]} : vector<2x16x96xf32> to vector<2x16x8xf32>
    %7 = arith.truncf %6 : vector<2x16x8xf32> to vector<2x16x8xbf16>
    "tpu.trace_start"() <{level = 10 : i32, message = "wme,wne->wmn"}> : () -> ()
    %cst = arith.constant dense<0.000000e+00> : vector<2x16x16xf32>
    %8 = tpu.matmul %3, %5, %cst {dimension_numbers = #tpu.dot_dimension_numbers<[2], [2], [1], [1], [0, 0, 0, 1, 1, 1], [0], [0]>} : vector<2x16x8xbf16>, vector<2x16x8xbf16>, vector<2x16x16xf32> -> vector<2x16x16xf32>
    "tpu.trace_stop"() : () -> ()
    %cst_5 = arith.constant dense<0xFF800000> : vector<2x16xf32>
    %9 = vector.multi_reduction <maximumf>, %8, %cst_5 [2] : vector<2x16x16xf32> to vector<2x16xf32>
    %10 = vector.shape_cast %9 : vector<2x16xf32> to vector<2x16x1xf32>
    %11 = vector.broadcast %10 : vector<2x16x1xf32> to vector<2x16x16xf32>
    %12 = arith.subf %8, %11 : vector<2x16x16xf32>
    %13 = math.exp %12 : vector<2x16x16xf32>
    %cst_6 = arith.constant dense<0.000000e+00> : vector<2x16xf32>
    %14 = vector.multi_reduction <add>, %13, %cst_6 [2] : vector<2x16x16xf32> to vector<2x16xf32>
    %15 = vector.shape_cast %14 : vector<2x16xf32> to vector<2x16x1xf32>
    %16 = tpu.reciprocal %15 {approx = true} : vector<2x16x1xf32> -> vector<2x16x1xf32>
    %17 = vector.broadcast %16 : vector<2x16x1xf32> to vector<2x16x16xf32>
    %18 = arith.mulf %13, %17 : vector<2x16x16xf32>
    %19 = arith.truncf %18 : vector<2x16x16xf32> to vector<2x16x16xbf16>
    "tpu.trace_start"() <{level = 10 : i32, message = "wmn,wne->wme"}> : () -> ()
    %cst_7 = arith.constant dense<0.000000e+00> : vector<2x16x8xf32>
    %20 = tpu.matmul %19, %7, %cst_7 {dimension_numbers = #tpu.dot_dimension_numbers<[2], [1], [1], [2], [0, 0, 0, 1, 1, 2], [0], [0]>} : vector<2x16x16xbf16>, vector<2x16x8xbf16>, vector<2x16x8xf32> -> vector<2x16x8xf32>
    "tpu.trace_stop"() : () -> ()
    %21 = vector.extract_strided_slice %1 {offsets = [0, 0, 8], sizes = [2, 16, 8], strides = [1, 1, 1]} : vector<2x16x96xf32> to vector<2x16x8xf32>
    %22 = arith.truncf %21 : vector<2x16x8xf32> to vector<2x16x8xbf16>
    %23 = vector.extract_strided_slice %1 {offsets = [0, 0, 40], sizes = [2, 16, 8], strides = [1, 1, 1]} : vector<2x16x96xf32> to vector<2x16x8xf32>
    %24 = arith.truncf %23 : vector<2x16x8xf32> to vector<2x16x8xbf16>
    %25 = vector.extract_strided_slice %1 {offsets = [0, 0, 72], sizes = [2, 16, 8], strides = [1, 1, 1]} : vector<2x16x96xf32> to vector<2x16x8xf32>
    %26 = arith.truncf %25 : vector<2x16x8xf32> to vector<2x16x8xbf16>
    "tpu.trace_start"() <{level = 10 : i32, message = "wme,wne->wmn"}> : () -> ()
    %cst_8 = arith.constant dense<0.000000e+00> : vector<2x16x16xf32>
    %27 = tpu.matmul %22, %24, %cst_8 {dimension_numbers = #tpu.dot_dimension_numbers<[2], [2], [1], [1], [0, 0, 0, 1, 1, 1], [0], [0]>} : vector<2x16x8xbf16>, vector<2x16x8xbf16>, vector<2x16x16xf32> -> vector<2x16x16xf32>
    "tpu.trace_stop"() : () -> ()
    %cst_9 = arith.constant dense<0xFF800000> : vector<2x16xf32>
    %28 = vector.multi_reduction <maximumf>, %27, %cst_9 [2] : vector<2x16x16xf32> to vector<2x16xf32>
    %29 = vector.shape_cast %28 : vector<2x16xf32> to vector<2x16x1xf32>
    %30 = vector.broadcast %29 : vector<2x16x1xf32> to vector<2x16x16xf32>
    %31 = arith.subf %27, %30 : vector<2x16x16xf32>
    %32 = math.exp %31 : vector<2x16x16xf32>
    %cst_10 = arith.constant dense<0.000000e+00> : vector<2x16xf32>
    %33 = vector.multi_reduction <add>, %32, %cst_10 [2] : vector<2x16x16xf32> to vector<2x16xf32>
    %34 = vector.shape_cast %33 : vector<2x16xf32> to vector<2x16x1xf32>
    %35 = tpu.reciprocal %34 {approx = true} : vector<2x16x1xf32> -> vector<2x16x1xf32>
    %36 = vector.broadcast %35 : vector<2x16x1xf32> to vector<2x16x16xf32>
    %37 = arith.mulf %32, %36 : vector<2x16x16xf32>
    %38 = arith.truncf %37 : vector<2x16x16xf32> to vector<2x16x16xbf16>
    "tpu.trace_start"() <{level = 10 : i32, message = "wmn,wne->wme"}> : () -> ()
    %cst_11 = arith.constant dense<0.000000e+00> : vector<2x16x8xf32>
    %39 = tpu.matmul %38, %26, %cst_11 {dimension_numbers = #tpu.dot_dimension_numbers<[2], [1], [1], [2], [0, 0, 0, 1, 1, 2], [0], [0]>} : vector<2x16x16xbf16>, vector<2x16x8xbf16>, vector<2x16x8xf32> -> vector<2x16x8xf32>
    "tpu.trace_stop"() : () -> ()
    %40 = vector.extract_strided_slice %1 {offsets = [0, 0, 16], sizes = [2, 16, 8], strides = [1, 1, 1]} : vector<2x16x96xf32> to vector<2x16x8xf32>
    %41 = arith.truncf %40 : vector<2x16x8xf32> to vector<2x16x8xbf16>
    %42 = vector.extract_strided_slice %1 {offsets = [0, 0, 48], sizes = [2, 16, 8], strides = [1, 1, 1]} : vector<2x16x96xf32> to vector<2x16x8xf32>
    %43 = arith.truncf %42 : vector<2x16x8xf32> to vector<2x16x8xbf16>
    %44 = vector.extract_strided_slice %1 {offsets = [0, 0, 80], sizes = [2, 16, 8], strides = [1, 1, 1]} : vector<2x16x96xf32> to vector<2x16x8xf32>
    %45 = arith.truncf %44 : vector<2x16x8xf32> to vector<2x16x8xbf16>
    "tpu.trace_start"() <{level = 10 : i32, message = "wme,wne->wmn"}> : () -> ()
    %cst_12 = arith.constant dense<0.000000e+00> : vector<2x16x16xf32>
    %46 = tpu.matmul %41, %43, %cst_12 {dimension_numbers = #tpu.dot_dimension_numbers<[2], [2], [1], [1], [0, 0, 0, 1, 1, 1], [0], [0]>} : vector<2x16x8xbf16>, vector<2x16x8xbf16>, vector<2x16x16xf32> -> vector<2x16x16xf32>
    "tpu.trace_stop"() : () -> ()
    %cst_13 = arith.constant dense<0xFF800000> : vector<2x16xf32>
    %47 = vector.multi_reduction <maximumf>, %46, %cst_13 [2] : vector<2x16x16xf32> to vector<2x16xf32>
    %48 = vector.shape_cast %47 : vector<2x16xf32> to vector<2x16x1xf32>
    %49 = vector.broadcast %48 : vector<2x16x1xf32> to vector<2x16x16xf32>
    %50 = arith.subf %46, %49 : vector<2x16x16xf32>
    %51 = math.exp %50 : vector<2x16x16xf32>
    %cst_14 = arith.constant dense<0.000000e+00> : vector<2x16xf32>
    %52 = vector.multi_reduction <add>, %51, %cst_14 [2] : vector<2x16x16xf32> to vector<2x16xf32>
    %53 = vector.shape_cast %52 : vector<2x16xf32> to vector<2x16x1xf32>
    %54 = tpu.reciprocal %53 {approx = true} : vector<2x16x1xf32> -> vector<2x16x1xf32>
    %55 = vector.broadcast %54 : vector<2x16x1xf32> to vector<2x16x16xf32>
    %56 = arith.mulf %51, %55 : vector<2x16x16xf32>
    %57 = arith.truncf %56 : vector<2x16x16xf32> to vector<2x16x16xbf16>
    "tpu.trace_start"() <{level = 10 : i32, message = "wmn,wne->wme"}> : () -> ()
    %cst_15 = arith.constant dense<0.000000e+00> : vector<2x16x8xf32>
    %58 = tpu.matmul %57, %45, %cst_15 {dimension_numbers = #tpu.dot_dimension_numbers<[2], [1], [1], [2], [0, 0, 0, 1, 1, 2], [0], [0]>} : vector<2x16x16xbf16>, vector<2x16x8xbf16>, vector<2x16x8xf32> -> vector<2x16x8xf32>
    "tpu.trace_stop"() : () -> ()
    %59 = vector.extract_strided_slice %1 {offsets = [0, 0, 24], sizes = [2, 16, 8], strides = [1, 1, 1]} : vector<2x16x96xf32> to vector<2x16x8xf32>
    %60 = arith.truncf %59 : vector<2x16x8xf32> to vector<2x16x8xbf16>
    %61 = vector.extract_strided_slice %1 {offsets = [0, 0, 56], sizes = [2, 16, 8], strides = [1, 1, 1]} : vector<2x16x96xf32> to vector<2x16x8xf32>
    %62 = arith.truncf %61 : vector<2x16x8xf32> to vector<2x16x8xbf16>
    %63 = vector.extract_strided_slice %1 {offsets = [0, 0, 88], sizes = [2, 16, 8], strides = [1, 1, 1]} : vector<2x16x96xf32> to vector<2x16x8xf32>
    %64 = arith.truncf %63 : vector<2x16x8xf32> to vector<2x16x8xbf16>
    "tpu.trace_start"() <{level = 10 : i32, message = "wme,wne->wmn"}> : () -> ()
    %cst_16 = arith.constant dense<0.000000e+00> : vector<2x16x16xf32>
    %65 = tpu.matmul %60, %62, %cst_16 {dimension_numbers = #tpu.dot_dimension_numbers<[2], [2], [1], [1], [0, 0, 0, 1, 1, 1], [0], [0]>} : vector<2x16x8xbf16>, vector<2x16x8xbf16>, vector<2x16x16xf32> -> vector<2x16x16xf32>
    "tpu.trace_stop"() : () -> ()
    %cst_17 = arith.constant dense<0xFF800000> : vector<2x16xf32>
    %66 = vector.multi_reduction <maximumf>, %65, %cst_17 [2] : vector<2x16x16xf32> to vector<2x16xf32>
    %67 = vector.shape_cast %66 : vector<2x16xf32> to vector<2x16x1xf32>
    %68 = vector.broadcast %67 : vector<2x16x1xf32> to vector<2x16x16xf32>
    %69 = arith.subf %65, %68 : vector<2x16x16xf32>
    %70 = math.exp %69 : vector<2x16x16xf32>
    %cst_18 = arith.constant dense<0.000000e+00> : vector<2x16xf32>
    %71 = vector.multi_reduction <add>, %70, %cst_18 [2] : vector<2x16x16xf32> to vector<2x16xf32>
    %72 = vector.shape_cast %71 : vector<2x16xf32> to vector<2x16x1xf32>
    %73 = tpu.reciprocal %72 {approx = true} : vector<2x16x1xf32> -> vector<2x16x1xf32>
    %74 = vector.broadcast %73 : vector<2x16x1xf32> to vector<2x16x16xf32>
    %75 = arith.mulf %70, %74 : vector<2x16x16xf32>
    %76 = arith.truncf %75 : vector<2x16x16xf32> to vector<2x16x16xbf16>
    "tpu.trace_start"() <{level = 10 : i32, message = "wmn,wne->wme"}> : () -> ()
    %cst_19 = arith.constant dense<0.000000e+00> : vector<2x16x8xf32>
    %77 = tpu.matmul %76, %64, %cst_19 {dimension_numbers = #tpu.dot_dimension_numbers<[2], [1], [1], [2], [0, 0, 0, 1, 1, 2], [0], [0]>} : vector<2x16x16xbf16>, vector<2x16x8xbf16>, vector<2x16x8xf32> -> vector<2x16x8xf32>
    "tpu.trace_stop"() : () -> ()
    %78 = tpu.concatenate %20, %39, %58, %77 in 2 : vector<2x16x8xf32>, vector<2x16x8xf32>, vector<2x16x8xf32>, vector<2x16x8xf32> -> vector<2x16x32xf32>
    %79 = vector.shape_cast %78 : vector<2x16x32xf32> to vector<1x2x4x1x4x32xf32>
    %c0_20 = arith.constant 0 : index
    %c0_21 = arith.constant 0 : index
    %c0_22 = arith.constant 0 : index
    %c0_23 = arith.constant 0 : index
    %c0_24 = arith.constant 0 : index
    %c0_25 = arith.constant 0 : index
    %80 = vector.load %arg3[%c0_20, %c0_21, %c0_22, %c0_23, %c0_24, %c0_25] : memref<1x2x4x1x4x32xf32, #tpu.memory_space<vmem>>, vector<1x2x4x1x4x32xf32>
    tpu.vector_store %arg3[%c0_20, %c0_21, %c0_22, %c0_23, %c0_24, %c0_25], %79 {strides = array<i32>} : memref<1x2x4x1x4x32xf32, #tpu.memory_space<vmem>>, vector<1x2x4x1x4x32xf32>,
    return
  }
  func.func @transform_0(%arg0: i32, %arg1: i32) -> (i32, i32, i32, i32, i32, i32) {
    %c0_i32 = arith.constant 0 : i32
    %c0_i32_0 = arith.constant 0 : i32
    %c0_i32_1 = arith.constant 0 : i32
    %c0_i32_2 = arith.constant 0 : i32
    %c0_i32_3 = arith.constant 0 : i32
    return %arg0, %c0_i32, %c0_i32_0, %arg1, %c0_i32_1, %c0_i32_2 : i32, i32, i32, i32, i32, i32
  }
  func.func @transform_1(%arg0: i32, %arg1: i32) -> (i32, i32, i32, i32, i32, i32) {
    %c0_i32 = arith.constant 0 : i32
    %c0_i32_0 = arith.constant 0 : i32
    %c0_i32_1 = arith.constant 0 : i32
    %c0_i32_2 = arith.constant 0 : i32
    %c0_i32_3 = arith.constant 0 : i32
    return %arg0, %c0_i32, %c0_i32_0, %arg1, %c0_i32_1, %c0_i32_2 : i32, i32, i32, i32, i32, i32
  }
}

module attributes {stable_mosaic.version = 11 : i64} {
  func.func @_linear_res_kernel(%arg0: i32, %arg1: i32, %arg2: memref<64x32xf32, #tpu.memory_space<vmem>>, %arg3: memref<32x32xbf16, #tpu.memory_space<vmem>>, %arg4: memref<1x32xf32, #tpu.memory_space<vmem>>, %arg5: memref<64x32xf32, #tpu.memory_space<vmem>>, %arg6: memref<64x32xf32, #tpu.memory_space<vmem>>) attributes {dimension_semantics = [#tpu.dimension_semantics<parallel>, #tpu.dimension_semantics<parallel>], iteration_bounds = array<i64: 2, 1>, scalar_prefetch = 0 : i64, scratch_operands = 0 : i64, tpu.core_type = #tpu.core_type<tc>, window_params = [{transform_indices = @transform_0, window_bounds = array<i64: 64, 32>}, {transform_indices = @transform_1, window_bounds = array<i64: 32, 32>}, {transform_indices = @transform_2, window_bounds = array<i64: 1, 32>}, {transform_indices = @transform_3, window_bounds = array<i64: 64, 32>}, {transform_indices = @transform_4, window_bounds = array<i64: 64, 32>}]} {
    %c0 = arith.constant 0 : index
    %c0_0 = arith.constant 0 : index
    %0 = vector.load %arg2[%c0, %c0_0] : memref<64x32xf32, #tpu.memory_space<vmem>>, vector<64x32xf32>
    %1 = arith.truncf %0 : vector<64x32xf32> to vector<64x32xbf16>
    %c0_1 = arith.constant 0 : index
    %c0_2 = arith.constant 0 : index
    %2 = vector.load %arg3[%c0_1, %c0_2] : memref<32x32xbf16, #tpu.memory_space<vmem>>, vector<32x32xbf16>
    %cst = arith.constant dense<0.000000e+00> : vector<64x32xf32>
    %3 = tpu.matmul %1, %2, %cst {dimension_numbers = #tpu.dot_dimension_numbers<[1], [0], [0], [1], [0, 0, 1, 1], [], []>} : vector<64x32xbf16>, vector<32x32xbf16>, vector<64x32xf32> -> vector<64x32xf32>
    %c0_3 = arith.constant 0 : index
    %c0_4 = arith.constant 0 : index
    %4 = vector.load %arg4[%c0_3, %c0_4] : memref<1x32xf32, #tpu.memory_space<vmem>>, vector<1x32xf32>
    %5 = vector.broadcast %4 : vector<1x32xf32> to vector<64x32xf32>
    %6 = arith.addf %3, %5 : vector<64x32xf32>
    %c0_5 = arith.constant 0 : index
    %c0_6 = arith.constant 0 : index
    %7 = vector.load %arg5[%c0_5, %c0_6] : memref<64x32xf32, #tpu.memory_space<vmem>>, vector<64x32xf32>
    %8 = arith.addf %6, %7 : vector<64x32xf32>
    %c0_7 = arith.constant 0 : index
    %c0_8 = arith.constant 0 : index
    %9 = vector.load %arg6[%c0_7, %c0_8] : memref<64x32xf32, #tpu.memory_space<vmem>>, vector<64x32xf32>
    tpu.vector_store %arg6[%c0_7, %c0_8], %8 {strides = array<i32>} : memref<64x32xf32, #tpu.memory_space<vmem>>, vector<64x32xf32>,
    return
  }
  func.func @transform_0(%arg0: i32, %arg1: i32) -> (i32, i32) {
    %c0_i32 = arith.constant 0 : i32
    %c0_i32_0 = arith.constant 0 : i32
    return %arg0, %c0_i32 : i32, i32
  }
  func.func @transform_1(%arg0: i32, %arg1: i32) -> (i32, i32) {
    %c0_i32 = arith.constant 0 : i32
    %c0_i32_0 = arith.constant 0 : i32
    return %c0_i32, %arg1 : i32, i32
  }
  func.func @transform_2(%arg0: i32, %arg1: i32) -> (i32, i32) {
    %c0_i32 = arith.constant 0 : i32
    %c0_i32_0 = arith.constant 0 : i32
    return %c0_i32, %arg1 : i32, i32
  }
  func.func @transform_3(%arg0: i32, %arg1: i32) -> (i32, i32) {
    %c0_i32 = arith.constant 0 : i32
    return %arg0, %arg1 : i32, i32
  }
  func.func @transform_4(%arg0: i32, %arg1: i32) -> (i32, i32) {
    %c0_i32 = arith.constant 0 : i32
    return %arg0, %arg1 : i32, i32
  }
}

module attributes {stable_mosaic.version = 11 : i64} {
  func.func @_ln_linear_kernel(%arg0: i32, %arg1: i32, %arg2: memref<64x32xf32, #tpu.memory_space<vmem>>, %arg3: memref<1x32xf32, #tpu.memory_space<vmem>>, %arg4: memref<1x32xf32, #tpu.memory_space<vmem>>, %arg5: memref<32x128xbf16, #tpu.memory_space<vmem>>, %arg6: memref<1x128xf32, #tpu.memory_space<vmem>>, %arg7: memref<64x128xf32, #tpu.memory_space<vmem>>) attributes {dimension_semantics = [#tpu.dimension_semantics<parallel>, #tpu.dimension_semantics<parallel>], iteration_bounds = array<i64: 2, 1>, scalar_prefetch = 0 : i64, scratch_operands = 0 : i64, tpu.core_type = #tpu.core_type<tc>, window_params = [{transform_indices = @transform_0, window_bounds = array<i64: 64, 32>}, {pipeline_mode = #tpu.pipeline_mode<synchronous>, transform_indices = @transform_1, window_bounds = array<i64: 1, 32>}, {pipeline_mode = #tpu.pipeline_mode<synchronous>, transform_indices = @transform_2, window_bounds = array<i64: 1, 32>}, {transform_indices = @transform_3, window_bounds = array<i64: 32, 128>}, {transform_indices = @transform_4, window_bounds = array<i64: 1, 128>}, {transform_indices = @transform_5, window_bounds = array<i64: 64, 128>}]} {
    %c0 = arith.constant 0 : index
    %c0_0 = arith.constant 0 : index
    %0 = vector.load %arg2[%c0, %c0_0] : memref<64x32xf32, #tpu.memory_space<vmem>>, vector<64x32xf32>
    %cst = arith.constant dense<0.000000e+00> : vector<64xf32>
    %1 = vector.multi_reduction <add>, %0, %cst [1] : vector<64x32xf32> to vector<64xf32>
    %2 = vector.shape_cast %1 : vector<64xf32> to vector<64x1xf32>
    %cst_1 = arith.constant 3.200000e+01 : f32
    %3 = vector.broadcast %cst_1 : f32 to vector<64x1xf32>
    %4 = arith.divf %2, %3 : vector<64x1xf32>
    %5 = vector.broadcast %4 : vector<64x1xf32> to vector<64x32xf32>
    %6 = arith.subf %0, %5 : vector<64x32xf32>
    %7 = arith.mulf %6, %6 : vector<64x32xf32>
    %cst_2 = arith.constant dense<0.000000e+00> : vector<64xf32>
    %8 = vector.multi_reduction <add>, %7, %cst_2 [1] : vector<64x32xf32> to vector<64xf32>
    %9 = vector.shape_cast %8 : vector<64xf32> to vector<64x1xf32>
    %cst_3 = arith.constant 3.200000e+01 : f32
    %10 = vector.broadcast %cst_3 : f32 to vector<64x1xf32>
    %11 = arith.divf %9, %10 : vector<64x1xf32>
    %cst_4 = arith.constant 9.99999974E-6 : f32
    %12 = vector.broadcast %cst_4 : f32 to vector<64x1xf32>
    %13 = arith.addf %11, %12 : vector<64x1xf32>
    %14 = math.rsqrt %13 : vector<64x1xf32>
    %15 = vector.broadcast %14 : vector<64x1xf32> to vector<64x32xf32>
    %16 = arith.mulf %6, %15 : vector<64x32xf32>
    %c0_5 = arith.constant 0 : index
    %c0_6 = arith.constant 0 : index
    %17 = vector.load %arg3[%c0_5, %c0_6] : memref<1x32xf32, #tpu.memory_space<vmem>>, vector<1x32xf32>
    %18 = vector.broadcast %17 : vector<1x32xf32> to vector<64x32xf32>
    %19 = arith.mulf %16, %18 : vector<64x32xf32>
    %c0_7 = arith.constant 0 : index
    %c0_8 = arith.constant 0 : index
    %20 = vector.load %arg4[%c0_7, %c0_8] : memref<1x32xf32, #tpu.memory_space<vmem>>, vector<1x32xf32>
    %21 = vector.broadcast %20 : vector<1x32xf32> to vector<64x32xf32>
    %22 = arith.addf %19, %21 : vector<64x32xf32>
    %23 = arith.truncf %22 : vector<64x32xf32> to vector<64x32xbf16>
    %c0_9 = arith.constant 0 : index
    %c0_10 = arith.constant 0 : index
    %24 = vector.load %arg5[%c0_9, %c0_10] : memref<32x128xbf16, #tpu.memory_space<vmem>>, vector<32x128xbf16>
    %cst_11 = arith.constant dense<0.000000e+00> : vector<64x128xf32>
    %25 = tpu.matmul %23, %24, %cst_11 {dimension_numbers = #tpu.dot_dimension_numbers<[1], [0], [0], [1], [0, 0, 1, 1], [], []>} : vector<64x32xbf16>, vector<32x128xbf16>, vector<64x128xf32> -> vector<64x128xf32>
    %c0_12 = arith.constant 0 : index
    %c0_13 = arith.constant 0 : index
    %26 = vector.load %arg6[%c0_12, %c0_13] : memref<1x128xf32, #tpu.memory_space<vmem>>, vector<1x128xf32>
    %27 = vector.broadcast %26 : vector<1x128xf32> to vector<64x128xf32>
    %28 = arith.addf %25, %27 : vector<64x128xf32>
    %cst_14 = arith.constant 5.000000e-01 : f32
    %29 = vector.broadcast %cst_14 : f32 to vector<64x128xf32>
    %30 = arith.mulf %29, %28 : vector<64x128xf32>
    %cst_15 = arith.constant 0.707106769 : f32
    %31 = vector.broadcast %cst_15 : f32 to vector<64x128xf32>
    %32 = arith.mulf %28, %31 : vector<64x128xf32>
    %33 = math.absf %32 : vector<64x128xf32>
    %cst_16 = arith.constant 0.327591091 : f32
    %34 = vector.broadcast %cst_16 : f32 to vector<64x128xf32>
    %35 = arith.mulf %34, %33 : vector<64x128xf32>
    %cst_17 = arith.constant 1.000000e+00 : f32
    %36 = vector.broadcast %cst_17 : f32 to vector<64x128xf32>
    %37 = arith.addf %36, %35 : vector<64x128xf32>
    %cst_18 = arith.constant 1.000000e+00 : f32
    %38 = vector.broadcast %cst_18 : f32 to vector<64x128xf32>
    %39 = arith.divf %38, %37 : vector<64x128xf32>
    %cst_19 = arith.constant 1.06140542 : f32
    %40 = vector.broadcast %cst_19 : f32 to vector<64x128xf32>
    %41 = arith.mulf %40, %39 : vector<64x128xf32>
    %cst_20 = arith.constant -1.45315206 : f32
    %42 = vector.broadcast %cst_20 : f32 to vector<64x128xf32>
    %43 = arith.addf %41, %42 : vector<64x128xf32>
    %44 = arith.mulf %43, %39 : vector<64x128xf32>
    %cst_21 = arith.constant 1.42141378 : f32
    %45 = vector.broadcast %cst_21 : f32 to vector<64x128xf32>
    %46 = arith.addf %44, %45 : vector<64x128xf32>
    %47 = arith.mulf %46, %39 : vector<64x128xf32>
    %cst_22 = arith.constant -0.284496725 : f32
    %48 = vector.broadcast %cst_22 : f32 to vector<64x128xf32>
    %49 = arith.addf %47, %48 : vector<64x128xf32>
    %50 = arith.mulf %49, %39 : vector<64x128xf32>
    %cst_23 = arith.constant 0.254829586 : f32
    %51 = vector.broadcast %cst_23 : f32 to vector<64x128xf32>
    %52 = arith.addf %50, %51 : vector<64x128xf32>
    %53 = arith.mulf %52, %39 : vector<64x128xf32>
    %cst_24 = arith.constant 0.000000e+00 : f32
    %54 = vector.broadcast %cst_24 : f32 to vector<64x128xf32>
    %55 = arith.subf %54, %33 : vector<64x128xf32>
    %56 = arith.mulf %55, %33 : vector<64x128xf32>
    %57 = math.exp %56 : vector<64x128xf32>
    %58 = arith.mulf %53, %57 : vector<64x128xf32>
    %cst_25 = arith.constant 1.000000e+00 : f32
    %59 = vector.broadcast %cst_25 : f32 to vector<64x128xf32>
    %60 = arith.subf %59, %58 : vector<64x128xf32>
    %cst_26 = arith.constant 0.000000e+00 : f32
    %61 = vector.broadcast %cst_26 : f32 to vector<64x128xf32>
    %62 = arith.cmpf olt, %32, %61 : vector<64x128xf32>
    %cst_27 = arith.constant 0.000000e+00 : f32
    %63 = vector.broadcast %cst_27 : f32 to vector<64x128xf32>
    %64 = arith.subf %63, %60 : vector<64x128xf32>
    %65 = arith.select %62, %64, %60 : vector<64x128xi1>, vector<64x128xf32>
    %cst_28 = arith.constant 1.000000e+00 : f32
    %66 = vector.broadcast %cst_28 : f32 to vector<64x128xf32>
    %67 = arith.addf %66, %65 : vector<64x128xf32>
    %68 = arith.mulf %30, %67 : vector<64x128xf32>
    %c0_29 = arith.constant 0 : index
    %c0_30 = arith.constant 0 : index
    %69 = vector.load %arg7[%c0_29, %c0_30] : memref<64x128xf32, #tpu.memory_space<vmem>>, vector<64x128xf32>
    tpu.vector_store %arg7[%c0_29, %c0_30], %68 {strides = array<i32>} : memref<64x128xf32, #tpu.memory_space<vmem>>, vector<64x128xf32>,
    return
  }
  func.func @transform_0(%arg0: i32, %arg1: i32) -> (i32, i32) {
    %c0_i32 = arith.constant 0 : i32
    %c0_i32_0 = arith.constant 0 : i32
    return %arg0, %c0_i32 : i32, i32
  }
  func.func @transform_1(%arg0: i32, %arg1: i32) -> (i32, i32) {
    %c0_i32 = arith.constant 0 : i32
    %c0_i32_0 = arith.constant 0 : i32
    %c0_i32_1 = arith.constant 0 : i32
    return %c0_i32, %c0_i32_0 : i32, i32
  }
  func.func @transform_2(%arg0: i32, %arg1: i32) -> (i32, i32) {
    %c0_i32 = arith.constant 0 : i32
    %c0_i32_0 = arith.constant 0 : i32
    %c0_i32_1 = arith.constant 0 : i32
    return %c0_i32, %c0_i32_0 : i32, i32
  }
  func.func @transform_3(%arg0: i32, %arg1: i32) -> (i32, i32) {
    %c0_i32 = arith.constant 0 : i32
    %c0_i32_0 = arith.constant 0 : i32
    return %c0_i32, %arg1 : i32, i32
  }
  func.func @transform_4(%arg0: i32, %arg1: i32) -> (i32, i32) {
    %c0_i32 = arith.constant 0 : i32
    %c0_i32_0 = arith.constant 0 : i32
    return %c0_i32, %arg1 : i32, i32
  }
  func.func @transform_5(%arg0: i32, %arg1: i32) -> (i32, i32) {
    %c0_i32 = arith.constant 0 : i32
    return %arg0, %arg1 : i32, i32
  }
}

module attributes {stable_mosaic.version = 11 : i64} {
  func.func @_linear_res_kernel(%arg0: i32, %arg1: i32, %arg2: memref<64x128xf32, #tpu.memory_space<vmem>>, %arg3: memref<128x32xbf16, #tpu.memory_space<vmem>>, %arg4: memref<1x32xf32, #tpu.memory_space<vmem>>, %arg5: memref<64x32xf32, #tpu.memory_space<vmem>>, %arg6: memref<64x32xf32, #tpu.memory_space<vmem>>) attributes {dimension_semantics = [#tpu.dimension_semantics<parallel>, #tpu.dimension_semantics<parallel>], iteration_bounds = array<i64: 2, 1>, scalar_prefetch = 0 : i64, scratch_operands = 0 : i64, tpu.core_type = #tpu.core_type<tc>, window_params = [{transform_indices = @transform_0, window_bounds = array<i64: 64, 128>}, {transform_indices = @transform_1, window_bounds = array<i64: 128, 32>}, {transform_indices = @transform_2, window_bounds = array<i64: 1, 32>}, {transform_indices = @transform_3, window_bounds = array<i64: 64, 32>}, {transform_indices = @transform_4, window_bounds = array<i64: 64, 32>}]} {
    %c0 = arith.constant 0 : index
    %c0_0 = arith.constant 0 : index
    %0 = vector.load %arg2[%c0, %c0_0] : memref<64x128xf32, #tpu.memory_space<vmem>>, vector<64x128xf32>
    %1 = arith.truncf %0 : vector<64x128xf32> to vector<64x128xbf16>
    %c0_1 = arith.constant 0 : index
    %c0_2 = arith.constant 0 : index
    %2 = vector.load %arg3[%c0_1, %c0_2] : memref<128x32xbf16, #tpu.memory_space<vmem>>, vector<128x32xbf16>
    %cst = arith.constant dense<0.000000e+00> : vector<64x32xf32>
    %3 = tpu.matmul %1, %2, %cst {dimension_numbers = #tpu.dot_dimension_numbers<[1], [0], [0], [1], [0, 0, 1, 1], [], []>} : vector<64x128xbf16>, vector<128x32xbf16>, vector<64x32xf32> -> vector<64x32xf32>
    %c0_3 = arith.constant 0 : index
    %c0_4 = arith.constant 0 : index
    %4 = vector.load %arg4[%c0_3, %c0_4] : memref<1x32xf32, #tpu.memory_space<vmem>>, vector<1x32xf32>
    %5 = vector.broadcast %4 : vector<1x32xf32> to vector<64x32xf32>
    %6 = arith.addf %3, %5 : vector<64x32xf32>
    %c0_5 = arith.constant 0 : index
    %c0_6 = arith.constant 0 : index
    %7 = vector.load %arg5[%c0_5, %c0_6] : memref<64x32xf32, #tpu.memory_space<vmem>>, vector<64x32xf32>
    %8 = arith.addf %6, %7 : vector<64x32xf32>
    %c0_7 = arith.constant 0 : index
    %c0_8 = arith.constant 0 : index
    %9 = vector.load %arg6[%c0_7, %c0_8] : memref<64x32xf32, #tpu.memory_space<vmem>>, vector<64x32xf32>
    tpu.vector_store %arg6[%c0_7, %c0_8], %8 {strides = array<i32>} : memref<64x32xf32, #tpu.memory_space<vmem>>, vector<64x32xf32>,
    return
  }
  func.func @transform_0(%arg0: i32, %arg1: i32) -> (i32, i32) {
    %c0_i32 = arith.constant 0 : i32
    %c0_i32_0 = arith.constant 0 : i32
    return %arg0, %c0_i32 : i32, i32
  }
  func.func @transform_1(%arg0: i32, %arg1: i32) -> (i32, i32) {
    %c0_i32 = arith.constant 0 : i32
    %c0_i32_0 = arith.constant 0 : i32
    return %c0_i32, %arg1 : i32, i32
  }
  func.func @transform_2(%arg0: i32, %arg1: i32) -> (i32, i32) {
    %c0_i32 = arith.constant 0 : i32
    %c0_i32_0 = arith.constant 0 : i32
    return %c0_i32, %arg1 : i32, i32
  }
  func.func @transform_3(%arg0: i32, %arg1: i32) -> (i32, i32) {
    %c0_i32 = arith.constant 0 : i32
    return %arg0, %arg1 : i32, i32
  }
  func.func @transform_4(%arg0: i32, %arg1: i32) -> (i32, i32) {
    %c0_i32 = arith.constant 0 : i32
    return %arg0, %arg1 : i32, i32
  }
}

module attributes {stable_mosaic.version = 11 : i64} {
  func.func @_window_attn_kernel(%arg0: i32, %arg1: i32, %arg2: memref<1x2x4x1x4x96xf32, #tpu.memory_space<vmem>>, %arg3: memref<16x16xf32, #tpu.memory_space<vmem>>, %arg4: memref<16x16xf32, #tpu.memory_space<vmem>>, %arg5: memref<1x2x4x1x4x32xf32, #tpu.memory_space<vmem>>) attributes {dimension_semantics = [#tpu.dimension_semantics<parallel>, #tpu.dimension_semantics<parallel>], iteration_bounds = array<i64: 2, 2>, scalar_prefetch = 0 : i64, scratch_operands = 0 : i64, tpu.core_type = #tpu.core_type<tc>, window_params = [{transform_indices = @transform_0, window_bounds = array<i64: 1, 2, 4, 1, 4, 96>}, {pipeline_mode = #tpu.pipeline_mode<synchronous>, transform_indices = @transform_1, window_bounds = array<i64: 16, 16>}, {pipeline_mode = #tpu.pipeline_mode<synchronous>, transform_indices = @transform_2, window_bounds = array<i64: 16, 16>}, {transform_indices = @transform_3, window_bounds = array<i64: 1, 2, 4, 1, 4, 32>}]} {
    %c0 = arith.constant 0 : index
    %c0_0 = arith.constant 0 : index
    %c0_1 = arith.constant 0 : index
    %c0_2 = arith.constant 0 : index
    %c0_3 = arith.constant 0 : index
    %c0_4 = arith.constant 0 : index
    %0 = vector.load %arg2[%c0, %c0_0, %c0_1, %c0_2, %c0_3, %c0_4] : memref<1x2x4x1x4x96xf32, #tpu.memory_space<vmem>>, vector<1x2x4x1x4x96xf32>
    %1 = vector.shape_cast %0 : vector<1x2x4x1x4x96xf32> to vector<2x16x96xf32>
    %2 = tpu.iota {dimensions = array<i32: 0>} : vector<2x16x16xi32>
    %c1_i32 = arith.constant 1 : i32
    %3 = vector.broadcast %c1_i32 : i32 to vector<2x16x16xi32>
    %4 = arith.cmpi eq, %2, %3 : vector<2x16x16xi32>
    %c0_5 = arith.constant 0 : index
    %c0_6 = arith.constant 0 : index
    %5 = vector.load %arg3[%c0_5, %c0_6] : memref<16x16xf32, #tpu.memory_space<vmem>>, vector<16x16xf32>
    %6 = vector.shape_cast %5 : vector<16x16xf32> to vector<1x16x16xf32>
    %cst = arith.constant 0.000000e+00 : f32
    %7 = vector.shape_cast %6 : vector<1x16x16xf32> to vector<1x16x16xf32>
    %8 = vector.broadcast %7 : vector<1x16x16xf32> to vector<2x16x16xf32>
    %9 = vector.broadcast %cst : f32 to vector<2x16x16xf32>
    %10 = arith.select %4, %8, %9 : vector<2x16x16xi1>, vector<2x16x16xf32>
    %c1_i32_7 = arith.constant 1 : i32
    %11 = arith.cmpi eq, %arg1, %c1_i32_7 : i32
    %c0_8 = arith.constant 0 : index
    %c0_9 = arith.constant 0 : index
    %12 = vector.load %arg4[%c0_8, %c0_9] : memref<16x16xf32, #tpu.memory_space<vmem>>, vector<16x16xf32>
    %cst_10 = arith.constant 0.000000e+00 : f32
    %13 = vector.broadcast %cst_10 : f32 to vector<16x16xf32>
    %14 = arith.select %11, %12, %13 : vector<16x16xf32>
    %15 = vector.shape_cast %14 : vector<16x16xf32> to vector<1x16x16xf32>
    %16 = vector.broadcast %15 : vector<1x16x16xf32> to vector<2x16x16xf32>
    %17 = arith.addf %10, %16 : vector<2x16x16xf32>
    %18 = vector.extract_strided_slice %1 {offsets = [0, 0, 0], sizes = [2, 16, 8], strides = [1, 1, 1]} : vector<2x16x96xf32> to vector<2x16x8xf32>
    %19 = arith.truncf %18 : vector<2x16x8xf32> to vector<2x16x8xbf16>
    %20 = vector.extract_strided_slice %1 {offsets = [0, 0, 32], sizes = [2, 16, 8], strides = [1, 1, 1]} : vector<2x16x96xf32> to vector<2x16x8xf32>
    %21 = arith.truncf %20 : vector<2x16x8xf32> to vector<2x16x8xbf16>
    %22 = vector.extract_strided_slice %1 {offsets = [0, 0, 64], sizes = [2, 16, 8], strides = [1, 1, 1]} : vector<2x16x96xf32> to vector<2x16x8xf32>
    %23 = arith.truncf %22 : vector<2x16x8xf32> to vector<2x16x8xbf16>
    "tpu.trace_start"() <{level = 10 : i32, message = "wme,wne->wmn"}> : () -> ()
    %cst_11 = arith.constant dense<0.000000e+00> : vector<2x16x16xf32>
    %24 = tpu.matmul %19, %21, %cst_11 {dimension_numbers = #tpu.dot_dimension_numbers<[2], [2], [1], [1], [0, 0, 0, 1, 1, 1], [0], [0]>} : vector<2x16x8xbf16>, vector<2x16x8xbf16>, vector<2x16x16xf32> -> vector<2x16x16xf32>
    "tpu.trace_stop"() : () -> ()
    %25 = arith.addf %24, %17 : vector<2x16x16xf32>
    %cst_12 = arith.constant dense<0xFF800000> : vector<2x16xf32>
    %26 = vector.multi_reduction <maximumf>, %25, %cst_12 [2] : vector<2x16x16xf32> to vector<2x16xf32>
    %27 = vector.shape_cast %26 : vector<2x16xf32> to vector<2x16x1xf32>
    %28 = vector.broadcast %27 : vector<2x16x1xf32> to vector<2x16x16xf32>
    %29 = arith.subf %25, %28 : vector<2x16x16xf32>
    %30 = math.exp %29 : vector<2x16x16xf32>
    %cst_13 = arith.constant dense<0.000000e+00> : vector<2x16xf32>
    %31 = vector.multi_reduction <add>, %30, %cst_13 [2] : vector<2x16x16xf32> to vector<2x16xf32>
    %32 = vector.shape_cast %31 : vector<2x16xf32> to vector<2x16x1xf32>
    %33 = tpu.reciprocal %32 {approx = true} : vector<2x16x1xf32> -> vector<2x16x1xf32>
    %34 = vector.broadcast %33 : vector<2x16x1xf32> to vector<2x16x16xf32>
    %35 = arith.mulf %30, %34 : vector<2x16x16xf32>
    %36 = arith.truncf %35 : vector<2x16x16xf32> to vector<2x16x16xbf16>
    "tpu.trace_start"() <{level = 10 : i32, message = "wmn,wne->wme"}> : () -> ()
    %cst_14 = arith.constant dense<0.000000e+00> : vector<2x16x8xf32>
    %37 = tpu.matmul %36, %23, %cst_14 {dimension_numbers = #tpu.dot_dimension_numbers<[2], [1], [1], [2], [0, 0, 0, 1, 1, 2], [0], [0]>} : vector<2x16x16xbf16>, vector<2x16x8xbf16>, vector<2x16x8xf32> -> vector<2x16x8xf32>
    "tpu.trace_stop"() : () -> ()
    %38 = vector.extract_strided_slice %1 {offsets = [0, 0, 8], sizes = [2, 16, 8], strides = [1, 1, 1]} : vector<2x16x96xf32> to vector<2x16x8xf32>
    %39 = arith.truncf %38 : vector<2x16x8xf32> to vector<2x16x8xbf16>
    %40 = vector.extract_strided_slice %1 {offsets = [0, 0, 40], sizes = [2, 16, 8], strides = [1, 1, 1]} : vector<2x16x96xf32> to vector<2x16x8xf32>
    %41 = arith.truncf %40 : vector<2x16x8xf32> to vector<2x16x8xbf16>
    %42 = vector.extract_strided_slice %1 {offsets = [0, 0, 72], sizes = [2, 16, 8], strides = [1, 1, 1]} : vector<2x16x96xf32> to vector<2x16x8xf32>
    %43 = arith.truncf %42 : vector<2x16x8xf32> to vector<2x16x8xbf16>
    "tpu.trace_start"() <{level = 10 : i32, message = "wme,wne->wmn"}> : () -> ()
    %cst_15 = arith.constant dense<0.000000e+00> : vector<2x16x16xf32>
    %44 = tpu.matmul %39, %41, %cst_15 {dimension_numbers = #tpu.dot_dimension_numbers<[2], [2], [1], [1], [0, 0, 0, 1, 1, 1], [0], [0]>} : vector<2x16x8xbf16>, vector<2x16x8xbf16>, vector<2x16x16xf32> -> vector<2x16x16xf32>
    "tpu.trace_stop"() : () -> ()
    %45 = arith.addf %44, %17 : vector<2x16x16xf32>
    %cst_16 = arith.constant dense<0xFF800000> : vector<2x16xf32>
    %46 = vector.multi_reduction <maximumf>, %45, %cst_16 [2] : vector<2x16x16xf32> to vector<2x16xf32>
    %47 = vector.shape_cast %46 : vector<2x16xf32> to vector<2x16x1xf32>
    %48 = vector.broadcast %47 : vector<2x16x1xf32> to vector<2x16x16xf32>
    %49 = arith.subf %45, %48 : vector<2x16x16xf32>
    %50 = math.exp %49 : vector<2x16x16xf32>
    %cst_17 = arith.constant dense<0.000000e+00> : vector<2x16xf32>
    %51 = vector.multi_reduction <add>, %50, %cst_17 [2] : vector<2x16x16xf32> to vector<2x16xf32>
    %52 = vector.shape_cast %51 : vector<2x16xf32> to vector<2x16x1xf32>
    %53 = tpu.reciprocal %52 {approx = true} : vector<2x16x1xf32> -> vector<2x16x1xf32>
    %54 = vector.broadcast %53 : vector<2x16x1xf32> to vector<2x16x16xf32>
    %55 = arith.mulf %50, %54 : vector<2x16x16xf32>
    %56 = arith.truncf %55 : vector<2x16x16xf32> to vector<2x16x16xbf16>
    "tpu.trace_start"() <{level = 10 : i32, message = "wmn,wne->wme"}> : () -> ()
    %cst_18 = arith.constant dense<0.000000e+00> : vector<2x16x8xf32>
    %57 = tpu.matmul %56, %43, %cst_18 {dimension_numbers = #tpu.dot_dimension_numbers<[2], [1], [1], [2], [0, 0, 0, 1, 1, 2], [0], [0]>} : vector<2x16x16xbf16>, vector<2x16x8xbf16>, vector<2x16x8xf32> -> vector<2x16x8xf32>
    "tpu.trace_stop"() : () -> ()
    %58 = vector.extract_strided_slice %1 {offsets = [0, 0, 16], sizes = [2, 16, 8], strides = [1, 1, 1]} : vector<2x16x96xf32> to vector<2x16x8xf32>
    %59 = arith.truncf %58 : vector<2x16x8xf32> to vector<2x16x8xbf16>
    %60 = vector.extract_strided_slice %1 {offsets = [0, 0, 48], sizes = [2, 16, 8], strides = [1, 1, 1]} : vector<2x16x96xf32> to vector<2x16x8xf32>
    %61 = arith.truncf %60 : vector<2x16x8xf32> to vector<2x16x8xbf16>
    %62 = vector.extract_strided_slice %1 {offsets = [0, 0, 80], sizes = [2, 16, 8], strides = [1, 1, 1]} : vector<2x16x96xf32> to vector<2x16x8xf32>
    %63 = arith.truncf %62 : vector<2x16x8xf32> to vector<2x16x8xbf16>
    "tpu.trace_start"() <{level = 10 : i32, message = "wme,wne->wmn"}> : () -> ()
    %cst_19 = arith.constant dense<0.000000e+00> : vector<2x16x16xf32>
    %64 = tpu.matmul %59, %61, %cst_19 {dimension_numbers = #tpu.dot_dimension_numbers<[2], [2], [1], [1], [0, 0, 0, 1, 1, 1], [0], [0]>} : vector<2x16x8xbf16>, vector<2x16x8xbf16>, vector<2x16x16xf32> -> vector<2x16x16xf32>
    "tpu.trace_stop"() : () -> ()
    %65 = arith.addf %64, %17 : vector<2x16x16xf32>
    %cst_20 = arith.constant dense<0xFF800000> : vector<2x16xf32>
    %66 = vector.multi_reduction <maximumf>, %65, %cst_20 [2] : vector<2x16x16xf32> to vector<2x16xf32>
    %67 = vector.shape_cast %66 : vector<2x16xf32> to vector<2x16x1xf32>
    %68 = vector.broadcast %67 : vector<2x16x1xf32> to vector<2x16x16xf32>
    %69 = arith.subf %65, %68 : vector<2x16x16xf32>
    %70 = math.exp %69 : vector<2x16x16xf32>
    %cst_21 = arith.constant dense<0.000000e+00> : vector<2x16xf32>
    %71 = vector.multi_reduction <add>, %70, %cst_21 [2] : vector<2x16x16xf32> to vector<2x16xf32>
    %72 = vector.shape_cast %71 : vector<2x16xf32> to vector<2x16x1xf32>
    %73 = tpu.reciprocal %72 {approx = true} : vector<2x16x1xf32> -> vector<2x16x1xf32>
    %74 = vector.broadcast %73 : vector<2x16x1xf32> to vector<2x16x16xf32>
    %75 = arith.mulf %70, %74 : vector<2x16x16xf32>
    %76 = arith.truncf %75 : vector<2x16x16xf32> to vector<2x16x16xbf16>
    "tpu.trace_start"() <{level = 10 : i32, message = "wmn,wne->wme"}> : () -> ()
    %cst_22 = arith.constant dense<0.000000e+00> : vector<2x16x8xf32>
    %77 = tpu.matmul %76, %63, %cst_22 {dimension_numbers = #tpu.dot_dimension_numbers<[2], [1], [1], [2], [0, 0, 0, 1, 1, 2], [0], [0]>} : vector<2x16x16xbf16>, vector<2x16x8xbf16>, vector<2x16x8xf32> -> vector<2x16x8xf32>
    "tpu.trace_stop"() : () -> ()
    %78 = vector.extract_strided_slice %1 {offsets = [0, 0, 24], sizes = [2, 16, 8], strides = [1, 1, 1]} : vector<2x16x96xf32> to vector<2x16x8xf32>
    %79 = arith.truncf %78 : vector<2x16x8xf32> to vector<2x16x8xbf16>
    %80 = vector.extract_strided_slice %1 {offsets = [0, 0, 56], sizes = [2, 16, 8], strides = [1, 1, 1]} : vector<2x16x96xf32> to vector<2x16x8xf32>
    %81 = arith.truncf %80 : vector<2x16x8xf32> to vector<2x16x8xbf16>
    %82 = vector.extract_strided_slice %1 {offsets = [0, 0, 88], sizes = [2, 16, 8], strides = [1, 1, 1]} : vector<2x16x96xf32> to vector<2x16x8xf32>
    %83 = arith.truncf %82 : vector<2x16x8xf32> to vector<2x16x8xbf16>
    "tpu.trace_start"() <{level = 10 : i32, message = "wme,wne->wmn"}> : () -> ()
    %cst_23 = arith.constant dense<0.000000e+00> : vector<2x16x16xf32>
    %84 = tpu.matmul %79, %81, %cst_23 {dimension_numbers = #tpu.dot_dimension_numbers<[2], [2], [1], [1], [0, 0, 0, 1, 1, 1], [0], [0]>} : vector<2x16x8xbf16>, vector<2x16x8xbf16>, vector<2x16x16xf32> -> vector<2x16x16xf32>
    "tpu.trace_stop"() : () -> ()
    %85 = arith.addf %84, %17 : vector<2x16x16xf32>
    %cst_24 = arith.constant dense<0xFF800000> : vector<2x16xf32>
    %86 = vector.multi_reduction <maximumf>, %85, %cst_24 [2] : vector<2x16x16xf32> to vector<2x16xf32>
    %87 = vector.shape_cast %86 : vector<2x16xf32> to vector<2x16x1xf32>
    %88 = vector.broadcast %87 : vector<2x16x1xf32> to vector<2x16x16xf32>
    %89 = arith.subf %85, %88 : vector<2x16x16xf32>
    %90 = math.exp %89 : vector<2x16x16xf32>
    %cst_25 = arith.constant dense<0.000000e+00> : vector<2x16xf32>
    %91 = vector.multi_reduction <add>, %90, %cst_25 [2] : vector<2x16x16xf32> to vector<2x16xf32>
    %92 = vector.shape_cast %91 : vector<2x16xf32> to vector<2x16x1xf32>
    %93 = tpu.reciprocal %92 {approx = true} : vector<2x16x1xf32> -> vector<2x16x1xf32>
    %94 = vector.broadcast %93 : vector<2x16x1xf32> to vector<2x16x16xf32>
    %95 = arith.mulf %90, %94 : vector<2x16x16xf32>
    %96 = arith.truncf %95 : vector<2x16x16xf32> to vector<2x16x16xbf16>
    "tpu.trace_start"() <{level = 10 : i32, message = "wmn,wne->wme"}> : () -> ()
    %cst_26 = arith.constant dense<0.000000e+00> : vector<2x16x8xf32>
    %97 = tpu.matmul %96, %83, %cst_26 {dimension_numbers = #tpu.dot_dimension_numbers<[2], [1], [1], [2], [0, 0, 0, 1, 1, 2], [0], [0]>} : vector<2x16x16xbf16>, vector<2x16x8xbf16>, vector<2x16x8xf32> -> vector<2x16x8xf32>
    "tpu.trace_stop"() : () -> ()
    %98 = tpu.concatenate %37, %57, %77, %97 in 2 : vector<2x16x8xf32>, vector<2x16x8xf32>, vector<2x16x8xf32>, vector<2x16x8xf32> -> vector<2x16x32xf32>
    %99 = vector.shape_cast %98 : vector<2x16x32xf32> to vector<1x2x4x1x4x32xf32>
    %c0_27 = arith.constant 0 : index
    %c0_28 = arith.constant 0 : index
    %c0_29 = arith.constant 0 : index
    %c0_30 = arith.constant 0 : index
    %c0_31 = arith.constant 0 : index
    %c0_32 = arith.constant 0 : index
    %100 = vector.load %arg5[%c0_27, %c0_28, %c0_29, %c0_30, %c0_31, %c0_32] : memref<1x2x4x1x4x32xf32, #tpu.memory_space<vmem>>, vector<1x2x4x1x4x32xf32>
    tpu.vector_store %arg5[%c0_27, %c0_28, %c0_29, %c0_30, %c0_31, %c0_32], %99 {strides = array<i32>} : memref<1x2x4x1x4x32xf32, #tpu.memory_space<vmem>>, vector<1x2x4x1x4x32xf32>,
    return
  }
  func.func @transform_0(%arg0: i32, %arg1: i32) -> (i32, i32, i32, i32, i32, i32) {
    %c0_i32 = arith.constant 0 : i32
    %c0_i32_0 = arith.constant 0 : i32
    %c0_i32_1 = arith.constant 0 : i32
    %c0_i32_2 = arith.constant 0 : i32
    %c0_i32_3 = arith.constant 0 : i32
    return %arg0, %c0_i32, %c0_i32_0, %arg1, %c0_i32_1, %c0_i32_2 : i32, i32, i32, i32, i32, i32
  }
  func.func @transform_1(%arg0: i32, %arg1: i32) -> (i32, i32) {
    %c0_i32 = arith.constant 0 : i32
    %c0_i32_0 = arith.constant 0 : i32
    %c0_i32_1 = arith.constant 0 : i32
    return %c0_i32, %c0_i32_0 : i32, i32
  }
  func.func @transform_2(%arg0: i32, %arg1: i32) -> (i32, i32) {
    %c0_i32 = arith.constant 0 : i32
    %c0_i32_0 = arith.constant 0 : i32
    %c0_i32_1 = arith.constant 0 : i32
    return %c0_i32, %c0_i32_0 : i32, i32
  }
  func.func @transform_3(%arg0: i32, %arg1: i32) -> (i32, i32, i32, i32, i32, i32) {
    %c0_i32 = arith.constant 0 : i32
    %c0_i32_0 = arith.constant 0 : i32
    %c0_i32_1 = arith.constant 0 : i32
    %c0_i32_2 = arith.constant 0 : i32
    %c0_i32_3 = arith.constant 0 : i32
    return %arg0, %c0_i32, %c0_i32_0, %arg1, %c0_i32_1, %c0_i32_2 : i32, i32, i32, i32, i32, i32
  }
}

</mosaic_0001>

<bundles_post_ra>
// kernel: alternating_encoder_block.12
= control target key start
LH: loop header
LB: loop body
LE: loop exit
PB: predicated region body
PF: predicated region fallthrough
CT: control target
= control target key end

     0   :  { %s610_s15 = smov 0   ;;  %s612_s16 = smov 0   ;;  %s692_s0 = inlined_call_operand.vmem [shape: f32[128,32], index: 0, kind: input, shape index: {}]   ;;  %s693_s1 = inlined_call_operand.vmem [shape: bf16[32,32], index: 1, kind: input, shape index: {}]   ;;  %s694_s2 = inlined_call_operand.vmem [shape: f32[1,32], index: 2, kind: input, shape index: {}]   ;;  %s695_s3 = inlined_call_operand.vmem [shape: f32[128,32], index: 3, kind: input, shape index: {}]   ;;  %s696_s4 = inlined_call_operand.vmem [shape: f32[128,32], index: 4, kind: output, shape index: {}]  }
   0x1   :  { %s614_s17 = smov 0  }
   0x2 LB: > { %s26_s18 = sadd.s32 1, %s579_s16  ;;  %p507_p0 = scmp.ge.s32.totalorder %s583_s17, 1  ;;  %s583_s17 = sphi %s614_s17, %s14_s17   ;;  %s579_s16 = sphi %s612_s16, %s698_s16   ;;  %s575_s15 = sphi %s610_s15, %s697_s15  }
   0x3   : > { %p28_p1 = scmp.ge.s32.totalorder %s26_s18, 2  ;;  %p210_p2 = scmp.lt.s32.totalorder %s583_s17, 3 }
   0x5   : > { %s700_s18 = smov (%p28_p1, %s26_s18), 0  ;;  %p211_p3 = pnand %p507_p0, %p210_p2 }
   0x6   : > { %s508_s21 = sshll.u32 (!%p211_p3), %s575_s15, 3 }
   0x7   : > { %214 = sbr.rel (%p211_p3) target bundleno = 167 (0xa7), region = 36  ;;  %p255_p4 = scmp.lt.s32.totalorder (!%p211_p3), %s508_s21, 15 }
   0xc   : > { %v529_v0 = vld [vmem:[%s693_s1 + $0x8] sm:$0xff]  ;;  %v528_v1 = vld [vmem:[%s693_s1] sm:$0xff]  ;;  %s702_s21 = smov (!%p255_p4, %s508_s21), 15  ;;  %vm318_vm0 = vcmask 261120  }
   0xd   : > { %337 = vmatpush.bf16.msra.mxu0 %v529_v0  ;;  %530 = vmatpush.bf16.msra.mxu1 %v529_v0  ;;  %s634_s24 = sshll.u32 %s702_s21, 3  ;;  %v560_v14 = vld [vmem:[%s694_s2] ss:$0 sm:$0xff] }
   0xe   : > { %531 = vmatpush.bf16.msra.mxu2 %v529_v0  ;;  %532 = vmatpush.bf16.msra.mxu3 %v529_v0  ;;  %s258_s27 = scalar_lea.vmem %s692_s0, %s634_s24  ;;  %s648_s30 = scalar_lea.vmem %s695_s3, %s634_s24 }
   0xf   : > { %v286_v2 = vld [vmem:[%s258_s27] sm:$0xff]  ;;  %v287_v3 = vld [vmem:[%s258_s27 + $0x8] sm:$0xff]  ;;  %v288_v4 = vld [vmem:[%s258_s27 + $0x10] sm:$0xff]  ;;  %s659_s9 = scalar_lea.vmem %s696_s4, %s634_s24 }
  0x10   : > { %v294_v5 = vpack.c.bf16 %v287_v3, %v286_v2  ;;  %v289_v6 = vld [vmem:[%s258_s27 + $0x18] sm:$0xff]  ;;  %v290_v7 = vld [vmem:[%s258_s27 + $0x20] sm:$0xff]  ;;  %v291_v8 = vld [vmem:[%s258_s27 + $0x28] sm:$0xff] }
  0x11   : > { %338 = vmatpush.bf16.msra.mxu0 %v528_v1  ;;  %533 = vmatpush.bf16.msra.mxu1 %v528_v1  ;;  %v295_v9 = vpack.c.bf16 %v289_v6, %v288_v4  ;;  %v296_v10 = vpack.c.bf16 %v291_v8, %v290_v7  ;;  %v292_v11 = vld [vmem:[%s258_s27 + $0x30] sm:$0xff]  ;;  %v293_v12 = vld [vmem:[%s258_s27 + $0x38] sm:$0xff]  ;;  %v360_v16 = vld [vmem:[%s648_s30] sm:$0xff] }
  0x12   : > { %534 = vmatpush.bf16.msra.mxu2 %v528_v1  ;;  %535 = vmatpush.bf16.msra.mxu3 %v528_v1  ;;  %v297_v13 = vpack.c.bf16 %v293_v12, %v292_v11  ;;  %v362_v19 = vld [vmem:[%s648_s30 + $0x10] sm:$0xff]  ;;  %v364_v24 = vld [vmem:[%s648_s30 + $0x20] sm:$0xff]  ;;  %v361_v29 = vld [vmem:[%s648_s30 + $0x8] sm:$0xff] }
  0x13   : > { %v366_v27 = vld [vmem:[%s648_s30 + $0x30] sm:$0xff]  ;;  %v363_v33 = vld [vmem:[%s648_s30 + $0x18] sm:$0xff]  ;;  %v365_v40 = vld [vmem:[%s648_s30 + $0x28] sm:$0xff] }
  0x14   : > { %522 = vmatmul.msk.bf16.vlgmr.msra.gmra.mxu0 %vm318_vm0, %v294_v5  ;;  %523 = vmatmul.msk.bf16.vlgmr.msra.gmra.mxu1 %vm318_vm0, %v295_v9  ;;  %v367_v43 = vld [vmem:[%s648_s30 + $0x38] sm:$0xff] }
  0x15   : > { %524 = vmatmul.msk.bf16.vlgmr.msra.gmra.mxu2 %vm318_vm0, %v296_v10  ;;  %525 = vmatmul.msk.bf16.vlgmr.msra.gmra.mxu3 %vm318_vm0, %v297_v13 }
  0x91   : > { %v340_v15 = vpop.f32.mrf.mxu0  ;;  %v345_v18 = vpop.f32.mrf.mxu1 }
  0x92   : > { %v341_v17 = vadd.f32 %v560_v14, %v340_v15  ;;  %v346_v20 = vadd.f32 %v560_v14, %v345_v18 }
  0x94   : > { %v368_v21 = vadd.f32 %v360_v16, %v341_v17  ;;  %v370_v22 = vadd.f32 %v362_v19, %v346_v20 }
  0x96   : > { %376 = vst.msk [vmem:[%s659_s9] sm:$0xff] %vm318_vm0, %v368_v21 }
  0x97   : > { %378 = vst.msk [vmem:[%s659_s9 + $0x10] sm:$0xff] %vm318_vm0, %v370_v22 }
  0x98   : > { %v350_v23 = vpop.f32.mrf.mxu2  ;;  %v355_v26 = vpop.f32.mrf.mxu3 }
  0x99   : > { %v351_v25 = vadd.f32 %v560_v14, %v350_v23  ;;  %v342_v28 = vpop.f32.mrf.mxu0  ;;  %v356_v30 = vadd.f32 %v560_v14, %v355_v26  ;;  %v347_v32 = vpop.f32.mrf.mxu1 }
  0x9a   : > { %v343_v31 = vadd.f32 %v560_v14, %v342_v28  ;;  %v348_v35 = vadd.f32 %v560_v14, %v347_v32 }
  0x9b   : > { %v372_v34 = vadd.f32 %v364_v24, %v351_v25  ;;  %v374_v36 = vadd.f32 %v366_v27, %v356_v30 }
  0x9c   : > { %v369_v37 = vadd.f32 %v361_v29, %v343_v31  ;;  %v371_v38 = vadd.f32 %v363_v33, %v348_v35 }
  0x9d   : > { %380 = vst.msk [vmem:[%s659_s9 + $0x20] sm:$0xff] %vm318_vm0, %v372_v34 }
  0x9e   : > { %382 = vst.msk [vmem:[%s659_s9 + $0x30] sm:$0xff] %vm318_vm0, %v374_v36 }
  0x9f   : > { %377 = vst.msk [vmem:[%s659_s9 + $0x8] sm:$0xff] %vm318_vm0, %v369_v37 }
  0xa0   : > { %379 = vst.msk [vmem:[%s659_s9 + $0x18] sm:$0xff] %vm318_vm0, %v371_v38  ;;  %v352_v39 = vpop.f32.mrf.mxu2  ;;  %v357_v42 = vpop.f32.mrf.mxu3 }
  0xa1   : > { %v353_v41 = vadd.f32 %v560_v14, %v352_v39  ;;  %v358_v44 = vadd.f32 %v560_v14, %v357_v42 }
  0xa3   : > { %v373_v45 = vadd.f32 %v365_v40, %v353_v41  ;;  %v375_v46 = vadd.f32 %v367_v43, %v358_v44 }
  0xa5   : > { %381 = vst.msk [vmem:[%s659_s9 + $0x28] sm:$0xff] %vm318_vm0, %v373_v45 }
  0xa6   : > { %383 = vst.msk [vmem:[%s659_s9 + $0x38] sm:$0xff] %vm318_vm0, %v375_v46 }
  0xa7 PF: > { %s14_s17 = sadd.s32 1, %s583_s17   ;;  %s697_s15 = smov %s579_s16 }
  0xa8   : > { %p11_p5 = scmp.ge.s32.totalorder %s14_s17, 4   ;;  %s698_s16 = smov %s700_s18 }
  0xaa   :  { %13 = sbr.rel (!%p11_p5) target bundleno = 2 (0x2), region = 75 }

// kernel: alternating_encoder_block.10
= control target key start
LH: loop header
LB: loop body
LE: loop exit
PB: predicated region body
PF: predicated region fallthrough
CT: control target
= control target key end

     0   :  { %s806_s18 = smov 0   ;;  %s808_s19 = smov 0   ;;  %s1007_s0 = inlined_call_operand.vmem [shape: f32[128,32], index: 0, kind: input, shape index: {}]   ;;  %s1008_s1 = inlined_call_operand.vmem [shape: f32[1,32], index: 1, kind: input, shape index: {}]   ;;  %s1009_s2 = inlined_call_operand.vmem [shape: f32[1,32], index: 2, kind: input, shape index: {}]   ;;  %s1010_s3 = inlined_call_operand.vmem [shape: bf16[32,96], index: 3, kind: input, shape index: {}]   ;;  %s1011_s4 = inlined_call_operand.vmem [shape: f32[1,96], index: 4, kind: input, shape index: {}]   ;;  %s1012_s5 = inlined_call_operand.vmem [shape: f32[128,96], index: 5, kind: output, shape index: {}]  }
   0x1   :  { %s810_s20 = smov 0  }
   0x2 LB: > { %s27_s21 = sadd.s32 1, %s769_s19  ;;  %p678_p0 = scmp.ge.s32.totalorder %s773_s20, 1  ;;  %s773_s20 = sphi %s810_s20, %s15_s20   ;;  %s769_s19 = sphi %s808_s19, %s1020_s19   ;;  %s765_s18 = sphi %s806_s18, %s1019_s18  }
   0x3   : > { %p29_p1 = scmp.ge.s32.totalorder %s27_s21, 2  ;;  %p219_p2 = scmp.lt.s32.totalorder %s773_s20, 3 }
   0x5   : > { %s1022_s21 = smov (%p29_p1, %s27_s21), 0  ;;  %p220_p3 = pnand %p678_p0, %p219_p2 }
   0x6   : > { %s679_s22 = sshll.u32 (!%p220_p3), %s765_s18, 3 }
   0x7   : > { %223 = sbr.rel (%p220_p3) target bundleno = 448 (0x1c0), region = 40  ;;  %p258_p4 = scmp.lt.s32.totalorder (!%p220_p3), %s679_s22, 15 }
   0xc   : > { %s1024_s22 = smov (!%p258_p4, %s679_s22), 15  ;;  %vm288_vm0 = vcmask 261120   ;;  %v775_v16 = vmov 32.0  }
   0xd   : > { %s680_s23 = sshll.u32 %s1024_s22, 3  ;;  %733 = vrcp.f32 %v775_v16 }
   0xe   : > { %s261_s26 = scalar_lea.vmem %s1007_s0, %s680_s23  ;;  %s277_s14 = scalar_lea.vmem %s1012_s5, %s680_s23 }
   0xf   : > { %v286_v0 = vld [vmem:[%s261_s26 + $0x30] sm:$0xff]  ;;  %v284_v1 = vld [vmem:[%s261_s26 + $0x20] sm:$0xff]  ;;  %v287_v6 = vld [vmem:[%s261_s26 + $0x38] sm:$0xff] }
  0x10   : > { %v280_v2 = vld [vmem:[%s261_s26] sm:$0xff]  ;;  %v307_v3 = vsel %vm288_vm0, %v286_v0, 0.0  ;;  %v301_v4 = vsel %vm288_vm0, %v284_v1, 0.0  ;;  %v285_v7 = vld [vmem:[%s261_s26 + $0x28] sm:$0xff]  ;;  %v310_v9 = vsel %vm288_vm0, %v287_v6, 0.0  ;;  %v282_v12 = vld [vmem:[%s261_s26 + $0x10] sm:$0xff] }
  0x11   : > { %v289_v5 = vsel %vm288_vm0, %v280_v2, 0.0  ;;  %308 = vadd.xlane.f32.xlu1 %v307_v3  ;;  %302 = vadd.xlane.f32.xlu0 %v301_v4  ;;  %v281_v8 = vld [vmem:[%s261_s26 + $0x8] sm:$0xff]  ;;  %v304_v10 = vsel %vm288_vm0, %v285_v7, 0.0  ;;  %v283_v13 = vld [vmem:[%s261_s26 + $0x18] sm:$0xff]  ;;  %v295_v14 = vsel %vm288_vm0, %v282_v12, 0.0 }
  0x12   : > { %290 = vadd.xlane.f32.xlu2 %v289_v5  ;;  %v292_v11 = vsel %vm288_vm0, %v281_v8, 0.0  ;;  %v298_v15 = vsel %vm288_vm0, %v283_v13, 0.0  ;;  %v698_v3 = vld [vmem:[%s1010_s3 + $0x8] sm:$0xff] }
  0x13   : > { %v734_v17 = vpop.eup %733  ;;  %700 = vmatpush.bf16.msra.mxu2 %v698_v3  ;;  %701 = vmatpush.bf16.msra.mxu3 %v698_v3 }
  0x14   : > { %v314_v18 = vmul.f32 32.0, %v734_v17  ;;  %vm318_vm1 = vweird.f32 %v734_v17  ;;  %538 = vmatpush.bf16.msra.mxu0 %v698_v3  ;;  %699 = vmatpush.bf16.msra.mxu1 %v698_v3 }
  0x16   : > { %v315_v19 = vsub.f32 1.0, %v314_v18 }
  0x18   : > { %v316_v20 = vmul.f32 %v734_v17, %v315_v19 }
  0x19   : > { %311 = vadd.xlane.f32.xlu1 %v310_v9  ;;  %305 = vadd.xlane.f32.xlu0 %v304_v10 }
  0x1a   : > { %293 = vadd.xlane.f32.xlu2 %v292_v11  ;;  %v317_v21 = vadd.f32 %v734_v17, %v316_v20 }
  0x1c   : > { %v840_v22 = vsel %vm318_vm1, %v734_v17, %v317_v21 }
  0x21   : > { %296 = vadd.xlane.f32.xlu0 %v295_v14  ;;  %299 = vadd.xlane.f32.xlu1 %v298_v15 }
  0x84   : > { %v309_v23 = vpop.xlane.xlu1 %308  ;;  %v303_v24 = vpop.xlane.xlu0 %302 }
  0x85   : > { %v326_v25 = vmul.f32 %v840_v22, %v309_v23  ;;  %v324_v26 = vmul.f32 %v840_v22, %v303_v24  ;;  %v291_v27 = vpop.xlane.xlu2 %290 }
  0x86   : > { %v320_v36 = vmul.f32 %v840_v22, %v291_v27 }
  0x87   : > { %v844_v28 = vsub.f32 %v286_v0, %v326_v25  ;;  %v846_v29 = vsub.f32 %v284_v1, %v324_v26 }
  0x88   : > { %v864_v44 = vsub.f32 %v280_v2, %v320_v36 }
  0x89   : > { %v342_v30 = vmul.f32 %v844_v28, %v844_v28  ;;  %v340_v31 = vmul.f32 %v846_v29, %v846_v29 }
  0x8a   : > { %v336_v55 = vmul.f32 %v864_v44, %v864_v44 }
  0x8b   : > { %v362_v32 = vsel %vm288_vm0, %v342_v30, 0.0  ;;  %v356_v33 = vsel %vm288_vm0, %v340_v31, 0.0 }
  0x8c   : > { %v312_v34 = vpop.xlane.xlu1 %311  ;;  %v306_v35 = vpop.xlane.xlu0 %305  ;;  %363 = vadd.xlane.f32.xlu1 %v362_v32  ;;  %357 = vadd.xlane.f32.xlu2 %v356_v33  ;;  %v344_v59 = vsel %vm288_vm0, %v336_v55, 0.0 }
  0x8d   : > { %v327_v37 = vmul.f32 %v840_v22, %v312_v34  ;;  %v325_v38 = vmul.f32 %v840_v22, %v306_v35  ;;  %v294_v39 = vpop.xlane.xlu2 %293 }
  0x8e   : > { %v321_v40 = vmul.f32 %v840_v22, %v294_v39 }
  0x8f   : > { %v858_v41 = vsub.f32 %v287_v6, %v327_v37  ;;  %v860_v42 = vsub.f32 %v285_v7, %v325_v38  ;;  %v697_v6 = vld [vmem:[%s1010_s3] sm:$0xff] }
  0x90   : > { %v862_v43 = vsub.f32 %v281_v8, %v321_v40  ;;  %703 = vmatpush.bf16.msra.mxu2 %v697_v6  ;;  %704 = vmatpush.bf16.msra.mxu3 %v697_v6 }
  0x91   : > { %v341_v45 = vmul.f32 %v860_v42, %v860_v42  ;;  %v343_v46 = vmul.f32 %v858_v41, %v858_v41  ;;  %539 = vmatpush.bf16.msra.mxu0 %v697_v6  ;;  %702 = vmatpush.bf16.msra.mxu1 %v697_v6 }
  0x92   : > { %v337_v47 = vmul.f32 %v862_v43, %v862_v43 }
  0x93   : > { %v359_v48 = vsel %vm288_vm0, %v341_v45, 0.0  ;;  %v365_v49 = vsel %vm288_vm0, %v343_v46, 0.0 }
  0x94   : > { %360 = vadd.xlane.f32.xlu0 %v359_v48  ;;  %v297_v50 = vpop.xlane.xlu0 %296  ;;  %366 = vadd.xlane.f32.xlu2 %v365_v49  ;;  %v347_v51 = vsel %vm288_vm0, %v337_v47, 0.0  ;;  %v300_v52 = vpop.xlane.xlu1 %299 }
  0x95   : > { %v322_v53 = vmul.f32 %v840_v22, %v297_v50  ;;  %348 = vadd.xlane.f32.xlu1 %v347_v51  ;;  %v323_v54 = vmul.f32 %v840_v22, %v300_v52 }
  0x97   : > { %v879_v56 = vsub.f32 %v282_v12, %v322_v53  ;;  %v881_v57 = vsub.f32 %v283_v13, %v323_v54 }
  0x99   : > { %v338_v58 = vmul.f32 %v879_v56, %v879_v56  ;;  %v339_v61 = vmul.f32 %v881_v57, %v881_v57 }
  0x9b   : > { %v350_v60 = vsel %vm288_vm0, %v338_v58, 0.0  ;;  %v353_v62 = vsel %vm288_vm0, %v339_v61, 0.0 }
  0x9c   : > { %351 = vadd.xlane.f32.xlu2 %v350_v60  ;;  %345 = vadd.xlane.f32.xlu0 %v344_v59 }
  0xa4   : > { %354 = vadd.xlane.f32.xlu0 %v353_v62 }
  0xff   : > { %v364_v63 = vpop.xlane.xlu1 %363  ;;  %v358_v0 = vpop.xlane.xlu2 %357 }
 0x100   : > { %v374_v1 = vmul.f32 %v364_v63, %v840_v22  ;;  %v372_v2 = vmul.f32 %v358_v0, %v840_v22  ;;  %v937_v63 = vld [vmem:[%s1008_s1] ss:$0 sm:$0xff] }
 0x102   : > { %v382_v4 = vadd.f32 1e-05, %v374_v1  ;;  %v380_v5 = vadd.f32 1e-05, %v372_v2 }
 0x104   : > { %735 = vrsqrt.f32 %v382_v4  ;;  %vm450_vm2 = vweird.f32 %v382_v4  ;;  %vm430_vm5 = vweird.f32 %v380_v5 }
 0x105   : > { %737 = vrsqrt.f32 %v380_v5 }
 0x107   : > { %v361_v7 = vpop.xlane.xlu0 %360  ;;  %v367_v8 = vpop.xlane.xlu2 %366 }
 0x108   : > { %v373_v9 = vmul.f32 %v361_v7, %v840_v22  ;;  %v349_v10 = vpop.xlane.xlu1 %348  ;;  %v375_v11 = vmul.f32 %v367_v8, %v840_v22 }
 0x109   : > { %v369_v12 = vmul.f32 %v349_v10, %v840_v22 }
 0x10a   : > { %v736_v13 = vpop.eup %735  ;;  %v381_v14 = vadd.f32 1e-05, %v373_v9  ;;  %v901_v15 = vadd.f32 1e-05, %v375_v11  ;;  %v731_v11 = vld [vmem:[%s1009_s2] ss:$0 sm:$0xff] }
 0x10b   : > { %v738_v16 = vpop.eup %737  ;;  %v445_v17 = vmul.f32 %v736_v13, %v382_v4  ;;  %v377_v18 = vadd.f32 1e-05, %v369_v12  ;;  %vm451_vm4 = vweird.f32 %v736_v13 }
 0x10c   : > { %v425_v19 = vmul.f32 %v738_v16, %v380_v5  ;;  %739 = vrsqrt.f32 %v381_v14  ;;  %vm431_vm3 = vweird.f32 %v738_v16  ;;  %vm440_vm7 = vweird.f32 %v381_v14  ;;  %vm924_vm8 = vmor %vm450_vm2, %vm451_vm4 }
 0x10d   : > { %v446_v20 = vmul.f32 %v736_v13, %v445_v17  ;;  %741 = vrsqrt.f32 %v377_v18  ;;  %vm914_vm6 = vmor %vm430_vm5, %vm431_vm3  ;;  %vm400_vm9 = vweird.f32 %v377_v18  ;;  %vm460_vm12 = vweird.f32 %v901_v15 }
 0x10e   : > { %v426_v21 = vmul.f32 %v738_v16, %v425_v19  ;;  %743 = vrsqrt.f32 %v901_v15 }
 0x10f   : > { %v447_v23 = vmul.f32 0.5, %v446_v20  ;;  %v346_v24 = vpop.xlane.xlu0 %345  ;;  %v352_v25 = vpop.xlane.xlu2 %351 }
 0x110   : > { %v427_v26 = vmul.f32 0.5, %v426_v21  ;;  %v368_v27 = vmul.f32 %v346_v24, %v840_v22  ;;  %v370_v30 = vmul.f32 %v352_v25, %v840_v22 }
 0x111   : > { %v448_v31 = vsub.f32 1.5, %v447_v23 }
 0x112   : > { %v740_v32 = vpop.eup %739  ;;  %v428_v33 = vsub.f32 1.5, %v427_v26  ;;  %v906_v34 = vadd.f32 1e-05, %v368_v27  ;;  %v910_v37 = vadd.f32 1e-05, %v370_v30 }
 0x113   : > { %v908_v35 = vpop.eup %741  ;;  %v435_v36 = vmul.f32 %v740_v32, %v381_v14  ;;  %v449_v39 = vmul.f32 %v736_v13, %v448_v31  ;;  %vm441_vm10 = vweird.f32 %v740_v32 }
 0x114   : > { %v744_v38 = vpop.eup %743  ;;  %v429_v40 = vmul.f32 %v738_v16, %v428_v33  ;;  %v395_v45 = vmul.f32 %v908_v35, %v377_v18  ;;  %745 = vrsqrt.f32 %v906_v34  ;;  %vm401_vm11 = vweird.f32 %v908_v35  ;;  %vm442_vm14 = vmor %vm440_vm7, %vm441_vm10 }
 0x115   : > { %v436_v47 = vmul.f32 %v740_v32, %v435_v36  ;;  %v455_v48 = vmul.f32 %v744_v38, %v901_v15  ;;  %747 = vrsqrt.f32 %v910_v37  ;;  %v453_v55 = vsel %vm924_vm8, %v736_v13, %v449_v39  ;;  %vm946_vm15 = vmor %vm400_vm9, %vm401_vm11 }
 0x116   : > { %v433_v49 = vsel %vm914_vm6, %v738_v16, %v429_v40  ;;  %v396_v50 = vmul.f32 %v908_v35, %v395_v45  ;;  %vm461_vm13 = vweird.f32 %v744_v38  ;;  %v470_v3 = vmul.f32 %v453_v55, %v844_v28 }
 0x117   : > { %v437_v52 = vmul.f32 0.5, %v436_v47  ;;  %v456_v53 = vmul.f32 %v744_v38, %v455_v48  ;;  %v355_v54 = vpop.xlane.xlu0 %354  ;;  %v468_v60 = vmul.f32 %v433_v49, %v846_v29  ;;  %vm462_vm1 = vmor %vm460_vm12, %vm461_vm13  ;;  %vm390_vm2 = vweird.f32 %v906_v34 }
 0x118   : > { %v397_v58 = vmul.f32 0.5, %v396_v50  ;;  %v371_v59 = vmul.f32 %v355_v54, %v840_v22  ;;  %v482_v18 = vmul.f32 %v937_v63, %v470_v3  ;;  %vm410_vm4 = vweird.f32 %v910_v37 }
 0x119   : > { %v438_v61 = vsub.f32 1.5, %v437_v52  ;;  %v457_v62 = vmul.f32 0.5, %v456_v53  ;;  %v480_v28 = vmul.f32 %v937_v63, %v468_v60  ;;  %vm561_vm11 = vcmask 785408  }
 0x11a   : > { %v746_v0 = vpop.eup %745  ;;  %v398_v1 = vsub.f32 1.5, %v397_v58  ;;  %v379_v2 = vadd.f32 1e-05, %v371_v59 }
 0x11b   : > { %v439_v22 = vmul.f32 %v740_v32, %v438_v61  ;;  %v458_v29 = vsub.f32 1.5, %v457_v62  ;;  %v385_v4 = vmul.f32 %v746_v0, %v906_v34  ;;  %v748_v7 = vpop.eup %747  ;;  %vm391_vm3 = vweird.f32 %v746_v0 }
 0x11c   : > { %v399_v5 = vmul.f32 %v908_v35, %v398_v1  ;;  %749 = vrsqrt.f32 %v379_v2  ;;  %v405_v13 = vmul.f32 %v748_v7, %v910_v37  ;;  %v492_v15 = vadd.f32 %v731_v11, %v480_v28  ;;  %vm392_vm5 = vmor %vm390_vm2, %vm391_vm3 }
 0x11d   : > { %v443_v8 = vsel %vm442_vm14, %v740_v32, %v439_v22  ;;  %v459_v9 = vmul.f32 %v744_v38, %v458_v29  ;;  %v386_v10 = vmul.f32 %v746_v0, %v385_v4  ;;  %vm411_vm6 = vweird.f32 %v748_v7 }
 0x11e   : > { %v469_v12 = vmul.f32 %v443_v8, %v860_v42  ;;  %v403_v14 = vsel %vm946_vm15, %v908_v35, %v399_v5  ;;  %v406_v20 = vmul.f32 %v748_v7, %v405_v13  ;;  %vm412_vm7 = vmor %vm410_vm4, %vm411_vm6  ;;  %vm420_vm9 = vweird.f32 %v379_v2 }
 0x11f   : > { %v463_v16 = vsel %vm462_vm1, %v744_v38, %v459_v9  ;;  %v387_v17 = vmul.f32 0.5, %v386_v10  ;;  %v465_v24 = vmul.f32 %v403_v14, %v862_v43 }
 0x120   : > { %v471_v19 = vmul.f32 %v463_v16, %v858_v41  ;;  %v481_v21 = vmul.f32 %v937_v63, %v469_v12  ;;  %v407_v25 = vmul.f32 0.5, %v406_v20  ;;  %v494_v41 = vadd.f32 %v731_v11, %v482_v18 }
 0x121   : > { %v388_v42 = vsub.f32 1.5, %v387_v17  ;;  %v477_v40 = vmul.f32 %v937_v63, %v465_v24 }
 0x122   : > { %v750_v23 = vpop.eup %749  ;;  %v493_v26 = vadd.f32 %v731_v11, %v481_v21  ;;  %v483_v27 = vmul.f32 %v937_v63, %v471_v19  ;;  %v408_v32 = vsub.f32 1.5, %v407_v25 }
 0x123   : > { %v389_v30 = vmul.f32 %v746_v0, %v388_v42  ;;  %v415_v31 = vmul.f32 %v750_v23, %v379_v2  ;;  %vm421_vm8 = vweird.f32 %v750_v23  ;;  %v489_v50 = vadd.f32 %v731_v11, %v477_v40 }
 0x124   : > { %v498_v33 = vpack.c.bf16 %v493_v26, %v492_v15  ;;  %v495_v35 = vadd.f32 %v731_v11, %v483_v27  ;;  %v409_v39 = vmul.f32 %v748_v7, %v408_v32  ;;  %vm422_vm10 = vmor %vm420_vm9, %vm421_vm8 }
 0x125   : > { %v393_v34 = vsel %vm392_vm5, %v746_v0, %v389_v30  ;;  %v416_v36 = vmul.f32 %v750_v23, %v415_v31 }
 0x126   : > { %v464_v38 = vmul.f32 %v393_v34, %v864_v44  ;;  %693 = vmatmul.msk.bf16.vlgmr.msra.gmra.mxu2 %vm288_vm0, %v498_v33  ;;  %v499_v43 = vpack.c.bf16 %v495_v35, %v494_v41  ;;  %v413_v46 = vsel %vm412_vm7, %v748_v7, %v409_v39 }
 0x127   : > { %v417_v45 = vmul.f32 0.5, %v416_v36  ;;  %v466_v49 = vmul.f32 %v413_v46, %v879_v56  ;;  %v732_v56 = vld [vmem:[%s1011_s4] ss:$0 sm:$0xff] }
 0x128   : > { %694 = vmatmul.msk.bf16.vlgmr.msra.gmra.mxu3 %vm288_vm0, %v499_v43  ;;  %v476_v47 = vmul.f32 %v937_v63, %v464_v38 }
 0x129   : > { %v418_v48 = vsub.f32 1.5, %v417_v45  ;;  %v478_v54 = vmul.f32 %v937_v63, %v466_v49 }
 0x12a   : > { %v488_v44 = vadd.f32 %v731_v11, %v476_v47 }
 0x12b   : > { %v419_v51 = vmul.f32 %v750_v23, %v418_v48  ;;  %v490_v58 = vadd.f32 %v731_v11, %v478_v54 }
 0x12c   : > { %v496_v52 = vpack.c.bf16 %v489_v50, %v488_v44 }
 0x12d   : > { %v423_v53 = vsel %vm422_vm10, %v750_v23, %v419_v51 }
 0x12e   : > { %v467_v37 = vmul.f32 %v423_v53, %v881_v57  ;;  %691 = vmatmul.msk.bf16.vlgmr.msra.gmra.mxu0 %vm288_vm0, %v496_v52 }
 0x130   : > { %v479_v55 = vmul.f32 %v937_v63, %v467_v37 }
 0x132   : > { %v491_v59 = vadd.f32 %v731_v11, %v479_v55 }
 0x134   : > { %v497_v60 = vpack.c.bf16 %v491_v59, %v490_v58 }
 0x136   : > { %692 = vmatmul.msk.bf16.vlgmr.msra.gmra.mxu1 %vm288_vm0, %v497_v60 }
 0x1a9   : > { %v551_v57 = vpop.f32.mrf.mxu2 }
 0x1aa   : > { %v552_v61 = vadd.f32 %v732_v56, %v551_v57 }
 0x1ab   : > { %v556_v62 = vpop.f32.mrf.mxu3  ;;  %v541_v0 = vpop.f32.mrf.mxu0 }
 0x1ac   : > { %566 = vst.msk [vmem:[%s277_s14 + $0x20] sm:$0xff] %vm561_vm11, %v552_v61  ;;  %v557_v63 = vadd.f32 %v732_v56, %v556_v62  ;;  %v542_v1 = vadd.f32 %v732_v56, %v541_v0 }
 0x1ae   : > { %568 = vst.msk [vmem:[%s277_s14 + $0x30] sm:$0xff] %vm561_vm11, %v557_v63 }
 0x1af   : > { %562 = vst.msk [vmem:[%s277_s14] sm:$0xff] %vm561_vm11, %v542_v1 }
 0x1b1   : > { %v553_v2 = vpop.f32.mrf.mxu2 }
 0x1b2   : > { %v554_v3 = vadd.f32 %v732_v56, %v553_v2 }
 0x1b3   : > { %v558_v22 = vpop.f32.mrf.mxu3  ;;  %v543_v29 = vpop.f32.mrf.mxu0 }
 0x1b4   : > { %567 = vst.msk [vmem:[%s277_s14 + $0x28] sm:$0xff] %vm561_vm11, %v554_v3  ;;  %v559_v4 = vadd.f32 %v732_v56, %v558_v22  ;;  %v544_v5 = vadd.f32 %v732_v56, %v543_v29  ;;  %v546_v6 = vpop.f32.mrf.mxu1 }
 0x1b5   : > { %v547_v7 = vadd.f32 %v732_v56, %v546_v6 }
 0x1b6   : > { %569 = vst.msk [vmem:[%s277_s14 + $0x38] sm:$0xff] %vm561_vm11, %v559_v4 }
 0x1b7   : > { %563 = vst.msk [vmem:[%s277_s14 + $0x8] sm:$0xff] %vm561_vm11, %v544_v5 }
 0x1b8   : > { %564 = vst.msk [vmem:[%s277_s14 + $0x10] sm:$0xff] %vm561_vm11, %v547_v7 }
 0x1bc   : > { %v548_v8 = vpop.f32.mrf.mxu1 }
 0x1bd   : > { %v549_v9 = vadd.f32 %v732_v56, %v548_v8 }
 0x1bf   : > { %565 = vst.msk [vmem:[%s277_s14 + $0x18] sm:$0xff] %vm561_vm11, %v549_v9 }
 0x1c0 PF: > { %s15_s20 = sadd.s32 1, %s773_s20   ;;  %s1019_s18 = smov %s769_s19 }
 0x1c1   : > { %p12_p5 = scmp.ge.s32.totalorder %s15_s20, 4   ;;  %s1020_s19 = smov %s1022_s21 }
 0x1c3   :  { %14 = sbr.rel (!%p12_p5) target bundleno = 2 (0x2), region = 76 }

// kernel: alternating_encoder_block.11
= control target key start
LH: loop header
LB: loop body
LE: loop exit
PB: predicated region body
PF: predicated region fallthrough
CT: control target
= control target key end

     0   :  { %s1722_s6 = smov 0   ;;  %s1724_s7 = smov 0   ;;  %s2222_s0 = inlined_call_operand.vmem [shape: f32[2,2,4,2,4,96], index: 0, kind: input, shape index: {}]   ;;  %s2223_s1 = inlined_call_operand.vmem [shape: f32[2,2,4,2,4,32], index: 1, kind: output, shape index: {}]  }
   0x1   :  { %s1726_s8 = smov 0   ;;  %s1728_s9 = smov 0  }
   0x2   :  { %s1730_s10 = smov 0   ;;  %s1732_s11 = smov 0  }
   0x3   :  { %s1734_s12 = smov 0  }
   0x4 LB: > { %s20_s13 = sadd.s32 1, %s1688_s10  ;;  %s23_s14 = sadd.s32 1, %s1692_s11  ;;  %s1696_s12 = sphi %s1734_s12, %s11_s12   ;;  %s1692_s11 = sphi %s1732_s11, %s2230_s11   ;;  %s1688_s10 = sphi %s1730_s10, %s2229_s10   ;;  %s1684_s9 = sphi %s1728_s9, %s2228_s9   ;;  %s1680_s8 = sphi %s1726_s8, %s2227_s8   ;;  %s1676_s7 = sphi %s1724_s7, %s2226_s7   ;;  %s1672_s6 = sphi %s1722_s6, %s2225_s6  }
   0x5   : > { %p21_p0 = scmp.ge.s32.totalorder %s20_s13, 2  ;;  %s1477_s15 = sadd.s32 4294967295, %s1696_s12  }
   0x6   : > { %p39_p1 = scmp.ne.s32.totalorder %s1676_s7, %s1672_s6  ;;  %p40_p2 = scmp.eq.s32.totalorder %s1696_s12, 0 }
   0x7   : > { %s2232_s13 = smov (%p21_p0, %s20_s13), 0  ;;  %s2234_s14 = smov (!%p21_p0, %s23_s14), %s1692_s11 }
   0x8   : > { %p25_p3 = scmp.ge.s32.totalorder %s2234_s14, 2  ;;  %p71_p4 = scmp.eq.s32.totalorder %s1477_s15, 3 }
   0x9   : > { %s28_s16 = ssub.s32 %s1688_s10, %s2232_s13  ;;  %p41_p5 = por %p40_p2, %p39_p1 }
   0xa   : > { %s2236_s14 = smov (%p25_p3, %s2234_s14), 0  ;;  %p1770_p6 = por %p71_p4, %p39_p1 }
   0xb   : > { %s27_s18 = ssub.s32 %s1692_s11, %s2236_s14  ;;  %s32_s20 = sadd.s32 1, %s1676_s7 }
   0xc   : > { %s29_s19 = sor.u32 %s28_s16, %s27_s18  ;;  %p1480_p8 = scmp.ge.s32.totalorder %s1696_s12, 4 }
   0xd   : > { %p30_p7 = scmp.eq.s32.totalorder %s29_s19, 0 }
   0xe   : > { %93 = sbr.rel (%p1480_p8) target bundleno = 33 (0x21), region = 16 }
   0xf   : > { %s1778_s21 = scalar_select %p30_p7, %s1676_s7, %s32_s20  }
  0x13   : > { %96 = sbr.rel (!%p41_p5) target bundleno = 33 (0x21), region = 20  ;;  %s98_s22 = sand.u32 (%p41_p5), 1, %s1676_s7  }
  0x14   : > { %s1482_s23 = sshll.u32 (%p41_p5), %s1692_s11, 4  ;;  %s1481_s24 = sshll.u32 (%p41_p5), %s98_s22, 5 }
  0x15   : > { %s102_s25 = sadd.s32 (%p41_p5), %s1688_s10, %s1482_s23  ;;  %s100_s30 = scalar_lea.vmem (%p41_p5), [#allocation2], %s1481_s24 }
  0x16   : > { %s1483_s26 = sshll.u32 (%p41_p5), %s102_s25, 2 }
  0x17   : > { %s104_s29 = scalar_lea.vmem (%p41_p5), %s2222_s0, %s1483_s26 }
  0x18   : > { %v121_v0 = vld [vmem:[%s104_s29] sm:$0xf]  ;;  %v123_v1 = vld [vmem:[%s104_s29 + $0x8] sm:$0xf]  ;;  %v125_v2 = vld [vmem:[%s104_s29 + $0x10] sm:$0xf] }
  0x19   : > { %122 = vst [vmem:[%s100_s30] sm:$0xf] %v121_v0  ;;  %v127_v3 = vld [vmem:[%s104_s29 + $0x18] sm:$0xf]  ;;  %v129_v4 = vld [vmem:[%s104_s29 + $0x20] sm:$0xf] }
  0x1a   : > { %124 = vst [vmem:[%s100_s30 + $0x4] sm:$0xf] %v123_v1  ;;  %v131_v5 = vld [vmem:[%s104_s29 + $0x28] sm:$0xf]  ;;  %v133_v6 = vld [vmem:[%s104_s29 + $0x30] sm:$0xf] }
  0x1b   : > { %126 = vst [vmem:[%s100_s30 + $0x8] sm:$0xf] %v125_v2  ;;  %v135_v7 = vld [vmem:[%s104_s29 + $0x38] sm:$0xf] }
  0x1c   : > { %128 = vst [vmem:[%s100_s30 + $0xc] sm:$0xf] %v127_v3 }
  0x1d   : > { %130 = vst [vmem:[%s100_s30 + $0x10] sm:$0xf] %v129_v4 }
  0x1e   : > { %132 = vst [vmem:[%s100_s30 + $0x14] sm:$0xf] %v131_v5 }
  0x1f   : > { %134 = vst [vmem:[%s100_s30 + $0x18] sm:$0xf] %v133_v6 }
  0x20   : > { %136 = vst [vmem:[%s100_s30 + $0x1c] sm:$0xf] %v135_v7 }
  0x21 PF: > { %p1484_p9 = scmp.ge.s32.totalorder %s1696_s12, 1  ;;  %p175_p10 = scmp.lt.s32.totalorder %s1696_s12, 5 }
  0x23   : > { %p176_p11 = pnand %p1484_p9, %p175_p10 }
  0x24   : > { %s182_s2 = sand.u32 (!%p176_p11), 1, %s1672_s6   ;;  %s1698_s5 = smov (!%p176_p11), 96  }
  0x25   : > { %179 = sbr.rel (%p176_p11) target bundleno = 1362 (0x552), region = 61  ;;  %s1790_s3 = sshll.u32 (!%p176_p11), %s182_s2, 5 }
  0x26   : > { %s184_s4 = scalar_lea.vmem (!%p176_p11), [#allocation2], %s1790_s3  ;;  %s1699_s6 = smov (!%p176_p11), 64  }
  0x27   : > { %s1700_s15 = smov (!%p176_p11), 88   ;;  %s1701_s16 = smov (!%p176_p11), 120  }
  0x28   : > { %s1702_s18 = smov (!%p176_p11), 80   ;;  %s1703_s19 = smov (!%p176_p11), 112  }
  0x29   : > { %s1704_s20 = smov (!%p176_p11), 72   ;;  %s1705_s22 = smov (!%p176_p11), 104  }
  0x2a   : > { %v1793_v8 = vld [vmem:[%s184_s4] sm:$0xf]  ;;  %v1795_v9 = vld [vmem:[%s184_s4 + $0x4] sm:$0xf]  ;;  %v1797_v10 = vld [vmem:[%s184_s4 + $0x8] sm:$0xf] }
  0x2b   : > { %v1799_v11 = vld [vmem:[%s184_s4 + $0xc] sm:$0xf]  ;;  %217 = vst [vmem:[#allocation1] ss:$2 sm:$0xff] %v1793_v8  ;;  %v1803_v12 = vld [vmem:[%s184_s4 + $0x10] sm:$0xf] }
  0x2c   : > { %219 = vst [vmem:[#allocation1 + $0x1] ss:$2 sm:$0xff] %v1795_v9  ;;  %v1806_v13 = vld [vmem:[%s184_s4 + $0x14] sm:$0xf]  ;;  %v1809_v14 = vld [vmem:[%s184_s4 + $0x18] sm:$0xf] }
  0x2d   : > { %221 = vst [vmem:[#allocation1 + $0x10] ss:$2 sm:$0xff] %v1797_v10  ;;  %v1811_v15 = vld [vmem:[%s184_s4 + $0x1c] sm:$0xf]  ;;  %vm310_vm0 = vcmask 64512   ;;  %vm363_vm1 = vcmask 130048  }
  0x2e   : > { %223 = vst [vmem:[#allocation1 + $0x11] ss:$2 sm:$0xff] %v1799_v11  ;;  %s1706_s23 = smov 56   ;;  %s1707_s24 = smov 48   ;;  %vm1299_vm2 = vcmask 195584   ;;  %vm1316_vm3 = vcmask 257024  }
  0x2f   : > { %227 = vst [vmem:[#allocation1 + $0x20] ss:$2 sm:$0xff] %v1803_v12  ;;  %s1708_s25 = smov 40   ;;  %s1709_s26 = smov 8  }
  0x30   : > { %229 = vst [vmem:[#allocation1 + $0x21] ss:$2 sm:$0xff] %v1806_v13  ;;  %s1710_s27 = smov 16   ;;  %s1711_s28 = smov 24  }
  0x31   : > { %231 = vst [vmem:[#allocation1 + $0x30] ss:$2 sm:$0xff] %v1809_v14  ;;  %s2159_s29 = scalar_lea.vmem [#allocation3], %s1790_s3  ;;  %s1504_s30 = sshll.u32 (%p1770_p6), %s1684_s9, 4 }
  0x32   : > { %233 = vst [vmem:[#allocation1 + $0x31] ss:$2 sm:$0xff] %v1811_v15  ;;  %s1333_s2 = sadd.s32 (%p1770_p6), %s1680_s8, %s1504_s30 }
  0x33   : > { %v1817_v16 = vld.sshfl [vmem:[#allocation1] sm:$0xff pattern:$0x75316420]  ;;  %s1505_s3 = sshll.u32 (%p1770_p6), %s1333_s2, 2 }
  0x34   : > { %244 = vst [vmem:[#allocation1] ss:$2 sm:$0xff] %v1793_v8  ;;  %v240_v48 = vpack.c.bf16 %v1817_v16, %v1817_v16  ;;  %s1335_s17 = scalar_lea.vmem (%p1770_p6), %s2223_s1, %s1505_s3 }
  0x35   : > { %v1820_v17 = vld.sshfl [vmem:[#allocation1 + $0x10] sm:$0xff pattern:$0x75316420]  ;;  %246 = vst [vmem:[#allocation1 + $0x1] ss:$2 sm:$0xff] %v1795_v9 }
  0x36   : > { %248 = vst [vmem:[#allocation1 + $0x10] ss:$2 sm:$0xff] %v1797_v10  ;;  %v241_v49 = vpack.c.bf16 %v1820_v17, %v1820_v17  ;;  %v300_v54 = vunpack.c.l.b16 %v240_v48 }
  0x37   : > { %250 = vst [vmem:[#allocation1 + $0x11] ss:$2 sm:$0xff] %v1799_v11  ;;  %v1825_v18 = vld.sshfl [vmem:[#allocation1 + $0x20] sm:$0xff pattern:$0x75316420] }
  0x38   : > { %254 = vst [vmem:[#allocation1 + $0x20] ss:$2 sm:$0xff] %v1803_v12  ;;  %v301_v55 = vunpack.c.l.b16 %v241_v49  ;;  %v242_v57 = vpack.c.bf16 %v1825_v18, %v1825_v18 }
  0x39   : > { %v1828_v19 = vld.sshfl [vmem:[#allocation1 + $0x30] sm:$0xff pattern:$0x75316420]  ;;  %256 = vst [vmem:[#allocation1 + $0x21] ss:$2 sm:$0xff] %v1806_v13 }
  0x3a   : > { %258 = vst [vmem:[#allocation1 + $0x30] ss:$2 sm:$0xff] %v1809_v14  ;;  %v302_v56 = vpack.c.b16 %v301_v55, %v300_v54  ;;  %v243_v58 = vpack.c.bf16 %v1828_v19, %v1828_v19  ;;  %v333_v63 = vunpack.c.l.b16 %v242_v57 }
  0x3b   : > { %260 = vst [vmem:[#allocation1 + $0x31] ss:$2 sm:$0xff] %v1811_v15 }
  0x3c   : > { %v251_v20 = vld.sshfl [vmem:[#allocation1] sm:$0xff pattern:$0x75316420]  ;;  %v334_v0 = vunpack.c.l.b16 %v243_v58 }
  0x3d   : > { %v267_v21 = vpack.c.bf16 %v251_v20, %v251_v20  ;;  %271 = vst [vmem:[#allocation1] ss:$2 sm:$0xff] %v1793_v8 }
  0x3e   : > { %v252_v22 = vld.sshfl [vmem:[#allocation1 + $0x10] sm:$0xff pattern:$0x75316420]  ;;  %273 = vst [vmem:[#allocation1 + $0x1] ss:$2 sm:$0xff] %v1795_v9  ;;  %v335_v5 = vpack.c.b16 %v334_v0, %v333_v63 }
  0x3f   : > { %v268_v23 = vpack.c.bf16 %v252_v22, %v252_v22  ;;  %v305_v24 = vunpack.c.l.b16 %v267_v21  ;;  %275 = vst [vmem:[#allocation1 + $0x10] ss:$2 sm:$0xff] %v1797_v10 }
  0x40   : > { %277 = vst [vmem:[#allocation1 + $0x11] ss:$2 sm:$0xff] %v1799_v11  ;;  %v261_v25 = vld.sshfl [vmem:[#allocation1 + $0x20] sm:$0xff pattern:$0x75316420] }
  0x41   : > { %v306_v26 = vunpack.c.l.b16 %v268_v23  ;;  %v269_v27 = vpack.c.bf16 %v261_v25, %v261_v25  ;;  %281 = vst [vmem:[#allocation1 + $0x20] ss:$2 sm:$0xff] %v1803_v12 }
  0x42   : > { %v262_v28 = vld.sshfl [vmem:[#allocation1 + $0x30] sm:$0xff pattern:$0x75316420]  ;;  %283 = vst [vmem:[#allocation1 + $0x21] ss:$2 sm:$0xff] %v1806_v13 }
  0x43   : > { %v307_v29 = vpack.c.b16 %v306_v26, %v305_v24  ;;  %v270_v30 = vpack.c.bf16 %v262_v28, %v262_v28  ;;  %285 = vst [vmem:[#allocation1 + $0x30] ss:$2 sm:$0xff] %v1809_v14  ;;  %v338_v31 = vunpack.c.l.b16 %v269_v27 }
  0x44   : > { %287 = vst [vmem:[#allocation1 + $0x31] ss:$2 sm:$0xff] %v1811_v15 }
  0x45   : > { %308 = vrot.lane.b32.xlu0 %v307_v29, %s1698_s5  ;;  %v339_v32 = vunpack.c.l.b16 %v270_v30  ;;  %v278_v38 = vld.sshfl [vmem:[#allocation1] sm:$0xff pattern:$0x75316420] }
  0x46   : > { %v294_v40 = vpack.c.bf16 %v278_v38, %v278_v38  ;;  %472 = vst [vmem:[#allocation1] ss:$2 sm:$0xff] %v1793_v8 }
  0x47   : > { %v340_v33 = vpack.c.b16 %v339_v32, %v338_v31  ;;  %v279_v39 = vld.sshfl [vmem:[#allocation1 + $0x10] sm:$0xff pattern:$0x75316420]  ;;  %474 = vst [vmem:[#allocation1 + $0x1] ss:$2 sm:$0xff] %v1795_v9 }
  0x48   : > { %v295_v43 = vpack.c.bf16 %v279_v39, %v279_v39  ;;  %v419_v44 = vunpack.c.l.b16 %v294_v40  ;;  %476 = vst [vmem:[#allocation1 + $0x10] ss:$2 sm:$0xff] %v1797_v10 }
  0x49   : > { %v288_v34 = vld.sshfl [vmem:[#allocation1 + $0x20] sm:$0xff pattern:$0x75316420]  ;;  %478 = vst [vmem:[#allocation1 + $0x11] ss:$2 sm:$0xff] %v1799_v11 }
  0x4a   : > { %v296_v36 = vpack.c.bf16 %v288_v34, %v288_v34  ;;  %482 = vst [vmem:[#allocation1 + $0x20] ss:$2 sm:$0xff] %v1803_v12  ;;  %v420_v46 = vunpack.c.l.b16 %v295_v43 }
  0x4b   : > { %v289_v35 = vld.sshfl [vmem:[#allocation1 + $0x30] sm:$0xff pattern:$0x75316420]  ;;  %484 = vst [vmem:[#allocation1 + $0x21] ss:$2 sm:$0xff] %v1806_v13 }
  0x4c   : > { %v297_v37 = vpack.c.bf16 %v289_v35, %v289_v35  ;;  %v449_v41 = vunpack.c.l.b16 %v296_v36  ;;  %486 = vst [vmem:[#allocation1 + $0x30] ss:$2 sm:$0xff] %v1809_v14  ;;  %v421_v47 = vpack.c.b16 %v420_v46, %v419_v44 }
  0x4d   : > { %341 = vrot.lane.b32.xlu0 %v340_v33, %s1698_s5  ;;  %488 = vst [vmem:[#allocation1 + $0x31] ss:$2 sm:$0xff] %v1811_v15 }
  0x4e   : > { %v450_v42 = vunpack.c.l.b16 %v297_v37  ;;  %422 = vrot.lane.b32.xlu2 %v421_v47, %s1699_s6  ;;  %v1853_v50 = vld.sshfl [vmem:[#allocation1] sm:$0xff pattern:$0x75316420] }
  0x4f   : > { %499 = vst [vmem:[#allocation1] ss:$2 sm:$0xff] %v1793_v8  ;;  %v495_v31 = vpack.c.bf16 %v1853_v50, %v1853_v50 }
  0x50   : > { %v451_v45 = vpack.c.b16 %v450_v42, %v449_v41  ;;  %v1856_v52 = vld.sshfl [vmem:[#allocation1 + $0x10] sm:$0xff pattern:$0x75316420]  ;;  %501 = vst [vmem:[#allocation1 + $0x1] ss:$2 sm:$0xff] %v1795_v9 }
  0x51   : > { %503 = vst [vmem:[#allocation1 + $0x10] ss:$2 sm:$0xff] %v1797_v10  ;;  %v496_v32 = vpack.c.bf16 %v1856_v52, %v1856_v52  ;;  %v555_v33 = vunpack.c.l.b16 %v495_v31 }
  0x52   : > { %452 = vrot.lane.b32.xlu1 %v451_v45, %s1699_s6  ;;  %505 = vst [vmem:[#allocation1 + $0x11] ss:$2 sm:$0xff] %v1799_v11  ;;  %v1876_v21 = vld.sshfl [vmem:[#allocation1 + $0x20] sm:$0xff pattern:$0x75316420] }
  0x53   : > { %509 = vst [vmem:[#allocation1 + $0x20] ss:$2 sm:$0xff] %v1803_v12  ;;  %v556_v34 = vunpack.c.l.b16 %v496_v32 }
  0x54   : > { %v1878_v22 = vld.sshfl [vmem:[#allocation1 + $0x30] sm:$0xff pattern:$0x75316420]  ;;  %511 = vst [vmem:[#allocation1 + $0x21] ss:$2 sm:$0xff] %v1806_v13 }
  0x55   : > { %513 = vst [vmem:[#allocation1 + $0x30] ss:$2 sm:$0xff] %v1809_v14  ;;  %v557_v37 = vpack.c.b16 %v556_v34, %v555_v33 }
  0x56   : > { %515 = vst [vmem:[#allocation1 + $0x31] ss:$2 sm:$0xff] %v1811_v15 }
  0x57   : > { %v506_v59 = vld.sshfl [vmem:[#allocation1] sm:$0xff pattern:$0x75316420] }
  0x58   : > { %v522_v61 = vpack.c.bf16 %v506_v59, %v506_v59  ;;  %526 = vst [vmem:[#allocation1] ss:$2 sm:$0xff] %v1793_v8 }
  0x59   : > { %v507_v1 = vld.sshfl [vmem:[#allocation1 + $0x10] sm:$0xff pattern:$0x75316420]  ;;  %528 = vst [vmem:[#allocation1 + $0x1] ss:$2 sm:$0xff] %v1795_v9 }
  0x5a   : > { %v523_v2 = vpack.c.bf16 %v507_v1, %v507_v1  ;;  %530 = vst [vmem:[#allocation1 + $0x10] ss:$2 sm:$0xff] %v1797_v10  ;;  %v562_v3 = vunpack.c.l.b16 %v522_v61 }
  0x5b   : > { %532 = vst [vmem:[#allocation1 + $0x11] ss:$2 sm:$0xff] %v1799_v11  ;;  %v516_v27 = vld.sshfl [vmem:[#allocation1 + $0x20] sm:$0xff pattern:$0x75316420] }
  0x5c   : > { %v563_v4 = vunpack.c.l.b16 %v523_v2  ;;  %536 = vst [vmem:[#allocation1 + $0x20] ss:$2 sm:$0xff] %v1803_v12  ;;  %v524_v35 = vpack.c.bf16 %v516_v27, %v516_v27 }
  0x5d   : > { %v517_v28 = vld.sshfl [vmem:[#allocation1 + $0x30] sm:$0xff pattern:$0x75316420]  ;;  %538 = vst [vmem:[#allocation1 + $0x21] ss:$2 sm:$0xff] %v1806_v13 }
  0x5e   : > { %v564_v6 = vpack.c.b16 %v563_v4, %v562_v3  ;;  %540 = vst [vmem:[#allocation1 + $0x30] ss:$2 sm:$0xff] %v1809_v14  ;;  %v525_v36 = vpack.c.bf16 %v517_v28, %v517_v28  ;;  %v596_v38 = vunpack.c.l.b16 %v524_v35  ;;  %v497_v4 = vpack.c.bf16 %v1876_v21, %v1876_v21 }
  0x5f   : > { %542 = vst [vmem:[#allocation1 + $0x31] ss:$2 sm:$0xff] %v1811_v15 }
  0x60   : > { %565 = vrot.lane.b32.xlu2 %v564_v6, %s1700_s15  ;;  %v597_v39 = vunpack.c.l.b16 %v525_v36  ;;  %v1897_v41 = vld.sshfl [vmem:[#allocation1] sm:$0xff pattern:$0x75316420] }
  0x61   : > { %729 = vst [vmem:[#allocation1] ss:$2 sm:$0xff] %v1793_v8 }
  0x62   : > { %v598_v40 = vpack.c.b16 %v597_v39, %v596_v38  ;;  %v1907_v47 = vld.sshfl [vmem:[#allocation1 + $0x10] sm:$0xff pattern:$0x75316420]  ;;  %731 = vst [vmem:[#allocation1 + $0x1] ss:$2 sm:$0xff] %v1795_v9 }
  0x63   : > { %733 = vst [vmem:[#allocation1 + $0x10] ss:$2 sm:$0xff] %v1797_v10 }
  0x64   : > { %v1900_v44 = vld.sshfl [vmem:[#allocation1 + $0x20] sm:$0xff pattern:$0x75316420]  ;;  %735 = vst [vmem:[#allocation1 + $0x11] ss:$2 sm:$0xff] %v1799_v11 }
  0x65   : > { %739 = vst [vmem:[#allocation1 + $0x20] ss:$2 sm:$0xff] %v1803_v12 }
  0x66   : > { %v1902_v45 = vld.sshfl [vmem:[#allocation1 + $0x30] sm:$0xff pattern:$0x75316420]  ;;  %741 = vst [vmem:[#allocation1 + $0x21] ss:$2 sm:$0xff] %v1806_v13 }
  0x67   : > { %743 = vst [vmem:[#allocation1 + $0x30] ss:$2 sm:$0xff] %v1809_v14 }
  0x68   : > { %745 = vst [vmem:[#allocation1 + $0x31] ss:$2 sm:$0xff] %v1811_v15 }
  0x69   : > { %v1924_v58 = vld.sshfl [vmem:[#allocation1] sm:$0xff pattern:$0x75316420] }
  0x6a   : > { %756 = vst [vmem:[#allocation1] ss:$2 sm:$0xff] %v1793_v8  ;;  %v752_v33 = vpack.c.bf16 %v1924_v58, %v1924_v58 }
  0x6b   : > { %v1927_v59 = vld.sshfl [vmem:[#allocation1 + $0x10] sm:$0xff pattern:$0x75316420]  ;;  %758 = vst [vmem:[#allocation1 + $0x1] ss:$2 sm:$0xff] %v1795_v9 }
  0x6c   : > { %760 = vst [vmem:[#allocation1 + $0x10] ss:$2 sm:$0xff] %v1797_v10  ;;  %v753_v34 = vpack.c.bf16 %v1927_v59, %v1927_v59  ;;  %v812_v39 = vunpack.c.l.b16 %v752_v33 }
  0x6d   : > { %v1913_v52 = vld.sshfl [vmem:[#allocation1 + $0x20] sm:$0xff pattern:$0x75316420]  ;;  %762 = vst [vmem:[#allocation1 + $0x11] ss:$2 sm:$0xff] %v1799_v11 }
  0x6e   : > { %766 = vst [vmem:[#allocation1 + $0x20] ss:$2 sm:$0xff] %v1803_v12 }
  0x6f   : > { %v1920_v57 = vld.sshfl [vmem:[#allocation1 + $0x30] sm:$0xff pattern:$0x75316420]  ;;  %768 = vst [vmem:[#allocation1 + $0x21] ss:$2 sm:$0xff] %v1806_v13 }
  0x70   : > { %770 = vst [vmem:[#allocation1 + $0x30] ss:$2 sm:$0xff] %v1809_v14 }
  0x71   : > { %772 = vst [vmem:[#allocation1 + $0x31] ss:$2 sm:$0xff] %v1811_v15 }
  0x76   : > { %v773_v0 = vld.sshfl [vmem:[#allocation1 + $0x20] sm:$0xff pattern:$0x75316420] }
  0x77   : > { %793 = vst [vmem:[#allocation1 + $0x20] ss:$2 sm:$0xff] %v1803_v12  ;;  %v781_v36 = vpack.c.bf16 %v773_v0, %v773_v0 }
  0x78   : > { %v774_v6 = vld.sshfl [vmem:[#allocation1 + $0x30] sm:$0xff pattern:$0x75316420]  ;;  %795 = vst [vmem:[#allocation1 + $0x21] ss:$2 sm:$0xff] %v1806_v13 }
  0x79   : > { %797 = vst [vmem:[#allocation1 + $0x30] ss:$2 sm:$0xff] %v1809_v14 }
  0x7a   : > { %799 = vst [vmem:[#allocation1 + $0x31] ss:$2 sm:$0xff] %v1811_v15 }
  0x81   : > { %v1976_v35 = vld.sshfl [vmem:[#allocation1 + $0x30] sm:$0xff pattern:$0x75316420] }
  0x82   : > { %1000 = vst [vmem:[#allocation1 + $0x30] ss:$2 sm:$0xff] %v1809_v14 }
  0x83   : > { %1002 = vst [vmem:[#allocation1 + $0x31] ss:$2 sm:$0xff] %v1811_v15 }
  0xa8   : > { %v423_v7 = vpop.permute.xlu2 %422 }
  0xa9   : > { %435 = vmatpush.bf16.msra.mxu2 %v423_v7  ;;  %v763_v7 = vld.sshfl [vmem:[#allocation1] sm:$0xff pattern:$0x75316420] }
  0xaa   : > { %783 = vst [vmem:[#allocation1] ss:$2 sm:$0xff] %v1793_v8 }
  0xab   : > { %785 = vst [vmem:[#allocation1 + $0x1] ss:$2 sm:$0xff] %v1795_v9 }
  0xb7   : > { %v309_v51 = vpop.permute.xlu0 %308 }
  0xb8   : > { %v315_v53 = vsel %vm310_vm0, %v309_v51, 0 }
  0xb9   : > { %324 = vmatpush.bf16.xpose.msra.mxu0 %v315_v53 }
  0xba   : > { %v566_v17 = vpop.permute.xlu2 %565 }
  0xbb   : > { %v571_v18 = vsel %vm310_vm0, %v566_v17, 0 }
  0xbc   : > { %580 = vmatpush.bf16.xpose.msrb.mxu2 %v571_v18  ;;  %v764_v18 = vld.sshfl [vmem:[#allocation1 + $0x10] sm:$0xff pattern:$0x75316420] }
  0xbd   : > { %787 = vst [vmem:[#allocation1 + $0x10] ss:$2 sm:$0xff] %v1797_v10 }
  0xbe   : > { %789 = vst [vmem:[#allocation1 + $0x11] ss:$2 sm:$0xff] %v1799_v11 }
  0xbf   : > { %v342_v60 = vpop.permute.xlu0 %341 }
  0xc0   : > { %1487 = vmatmul.msk.bf16.vlgmr.msra.gmra.mxu0 %vm310_vm0, %v302_v56  ;;  %v347_v62 = vsel %vm310_vm0, %v342_v60, 0 }
  0xc1   : > { %356 = vmatpush.bf16.xpose.msra.mxu1 %v347_v62 }
  0xc4   : > { %v453_v16 = vpop.permute.xlu1 %452 }
  0xc5   : > { %465 = vmatpush.bf16.msra.mxu3 %v453_v16  ;;  %v589_v16 = vunpack.c.l.b16 %v497_v4  ;;  %v1962_v27 = vld.sshfl [vmem:[#allocation1 + $0x10] sm:$0xff pattern:$0x75316420] }
  0xc6   : > { %990 = vst [vmem:[#allocation1 + $0x10] ss:$2 sm:$0xff] %v1797_v10 }
  0xc7   : > { %992 = vst [vmem:[#allocation1 + $0x11] ss:$2 sm:$0xff] %v1799_v11 }
  0xc8   : > { %1488 = vmatmul.msk.bf16.vlgmr.msra.gmra.mxu1 %vm310_vm0, %v335_v5  ;;  %v498_v5 = vpack.c.bf16 %v1878_v22, %v1878_v22 }
  0xca   : > { %v590_v17 = vunpack.c.l.b16 %v498_v5 }
  0xcc   : > { %v591_v21 = vpack.c.b16 %v590_v17, %v589_v16 }
  0xce   : > { %v994_v38 = vld.sshfl [vmem:[#allocation1 + $0x10] sm:$0xff pattern:$0x75316420] }
  0xcf   : > { %1017 = vst [vmem:[#allocation1 + $0x10] ss:$2 sm:$0xff] %v1797_v10 }
  0xd0   : > { %1019 = vst [vmem:[#allocation1 + $0x11] ss:$2 sm:$0xff] %v1799_v11 }
 0x13d   : > { %v326_v19 = vpop.f32.mrf.mxu0 }
 0x13e   : > { %v364_v20 = vsel %vm363_vm1, %v326_v19, -inf }
 0x13f   : > { %365 = vmax.xlane.f32.xlu1 %v364_v20 }
 0x145   : > { %v328_v23 = vpop.f32.mrf.mxu0  ;;  %v358_v24 = vpop.f32.mrf.mxu1 }
 0x146   : > { %v370_v25 = vsel %vm363_vm1, %v358_v24, -inf  ;;  %v367_v26 = vsel %vm363_vm1, %v328_v23, -inf }
 0x147   : > { %371 = vmax.xlane.f32.xlu2 %v370_v25  ;;  %368 = vmax.xlane.f32.xlu1 %v367_v26  ;;  %v779_v25 = vpack.c.bf16 %v763_v7, %v763_v7  ;;  %v780_v26 = vpack.c.bf16 %v764_v18, %v764_v18 }
 0x149   : > { %v819_v28 = vunpack.c.l.b16 %v779_v25 }
 0x14d   : > { %v360_v29 = vpop.f32.mrf.mxu1 }
 0x14e   : > { %v373_v30 = vsel %vm363_vm1, %v360_v29, -inf }
 0x14f   : > { %374 = vmax.xlane.f32.xlu2 %v373_v30  ;;  %v1967_v30 = vld.sshfl [vmem:[#allocation1 + $0x20] sm:$0xff pattern:$0x75316420] }
 0x150   : > { %996 = vst [vmem:[#allocation1 + $0x20] ss:$2 sm:$0xff] %v1803_v12 }
 0x151   : > { %998 = vst [vmem:[#allocation1 + $0x21] ss:$2 sm:$0xff] %v1806_v13 }
 0x160   : > { %558 = vrot.lane.b32.xlu1 %v557_v37, %s1701_s16  ;;  %v782_v37 = vpack.c.bf16 %v774_v6, %v774_v6 }
 0x167   : > { %599 = vrot.lane.b32.xlu2 %v598_v40, %s1700_s15  ;;  %v813_v40 = vunpack.c.l.b16 %v753_v34 }
 0x1b2   : > { %v366_v42 = vpop.xlane.xlu1 %365 }
 0x1b3   : > { %v376_v43 = vsub.f32 %v326_v19, %v366_v42  ;;  %v853_v42 = vunpack.c.l.b16 %v781_v36 }
 0x1b5   : > { %v380_v46 = vmul.f32 1.442695, %v376_v43  ;;  %v854_v43 = vunpack.c.l.b16 %v782_v37 }
 0x1b7   : > { %1578 = vpow2.f32 %v380_v46  ;;  %v1003_v46 = vld.sshfl [vmem:[#allocation1 + $0x20] sm:$0xff pattern:$0x75316420] }
 0x1b8   : > { %1023 = vst [vmem:[#allocation1 + $0x20] ss:$2 sm:$0xff] %v1803_v12 }
 0x1b9   : > { %1025 = vst [vmem:[#allocation1 + $0x21] ss:$2 sm:$0xff] %v1806_v13 }
 0x1ba   : > { %v372_v48 = vpop.xlane.xlu2 %371  ;;  %v369_v49 = vpop.xlane.xlu1 %368 }
 0x1bb   : > { %v378_v50 = vsub.f32 %v358_v24, %v372_v48  ;;  %v377_v51 = vsub.f32 %v328_v23, %v369_v49  ;;  %v1957_v23 = vld.sshfl [vmem:[#allocation1] sm:$0xff pattern:$0x75316420]  ;;  %v814_v48 = vpack.c.b16 %v813_v40, %v812_v39 }
 0x1bc   : > { %986 = vst [vmem:[#allocation1] ss:$2 sm:$0xff] %v1793_v8 }
 0x1bd   : > { %v1915_v53 = vpop.eup %1578  ;;  %v384_v54 = vmul.f32 1.442695, %v378_v50  ;;  %v382_v55 = vmul.f32 1.442695, %v377_v51  ;;  %988 = vst [vmem:[#allocation1 + $0x1] ss:$2 sm:$0xff] %v1795_v9  ;;  %v754_v50 = vpack.c.bf16 %v1913_v52, %v1913_v52  ;;  %v755_v51 = vpack.c.bf16 %v1920_v57, %v1920_v57 }
 0x1be   : > { %v388_v56 = vsel %vm363_vm1, %v1915_v53, 0.0  ;;  %v1004_v57 = vld.sshfl [vmem:[#allocation1 + $0x30] sm:$0xff pattern:$0x75316420] }
 0x1bf   : > { %1580 = vpow2.f32 %v384_v54  ;;  %389 = vadd.xlane.f32.xlu0 %v388_v56  ;;  %v855_v54 = vpack.c.b16 %v854_v43, %v853_v42  ;;  %v1021_v56 = vld.sshfl [vmem:[#allocation1 + $0x10] sm:$0xff pattern:$0x75316420]  ;;  %v846_v52 = vunpack.c.l.b16 %v754_v50  ;;  %v1012_v0 = vpack.c.bf16 %v1004_v57, %v1004_v57  ;;  %1027 = vst [vmem:[#allocation1 + $0x30] ss:$2 sm:$0xff] %v1809_v14 }
 0x1c0   : > { %1582 = vpow2.f32 %v382_v55  ;;  %v1037_v58 = vpack.c.bf16 %v1021_v56, %v1021_v56  ;;  %1044 = vst [vmem:[#allocation1 + $0x10] ss:$2 sm:$0xff] %v1797_v10  ;;  %v549_v57 = vpack.c.bf16 %v1897_v41, %v1897_v41 }
 0x1c1   : > { %1046 = vst [vmem:[#allocation1 + $0x11] ss:$2 sm:$0xff] %v1799_v11  ;;  %v1010_v11 = vpack.c.bf16 %v994_v38, %v994_v38  ;;  %v1104_v4 = vunpack.c.l.b16 %v1012_v0 }
 0x1c2   : > { %v375_v60 = vpop.xlane.xlu2 %374  ;;  %1029 = vst [vmem:[#allocation1 + $0x31] ss:$2 sm:$0xff] %v1811_v15 }
 0x1c3   : > { %v379_v61 = vsub.f32 %v360_v29, %v375_v60  ;;  %v820_v29 = vunpack.c.l.b16 %v780_v26  ;;  %v847_v60 = vunpack.c.l.b16 %v755_v51  ;;  %v1070_v7 = vunpack.c.l.b16 %v1010_v11 }
 0x1c4   : > { %v993_v31 = vld.sshfl [vmem:[#allocation1] sm:$0xff pattern:$0x75316420] }
 0x1c5   : > { %v1933_v62 = vpop.eup %1580  ;;  %v386_v63 = vmul.f32 1.442695, %v379_v61  ;;  %v821_v32 = vpack.c.b16 %v820_v29, %v819_v28  ;;  %1013 = vst [vmem:[#allocation1] ss:$2 sm:$0xff] %v1793_v8  ;;  %v1077_v61 = vunpack.c.l.b16 %v1037_v58  ;;  %v1009_v10 = vpack.c.bf16 %v993_v31, %v993_v31 }
 0x1c6   : > { %v1935_v1 = vpop.eup %1582  ;;  %v394_v2 = vsel %vm363_vm1, %v1933_v62, 0.0  ;;  %1015 = vst [vmem:[#allocation1 + $0x1] ss:$2 sm:$0xff] %v1795_v9 }
 0x1c7   : > { %1584 = vpow2.f32 %v386_v63  ;;  %395 = vadd.xlane.f32.xlu2 %v394_v2  ;;  %v391_v3 = vsel %vm363_vm1, %v1935_v1, 0.0  ;;  %v1011_v63 = vpack.c.bf16 %v1003_v46, %v1003_v46  ;;  %v848_v2 = vpack.c.b16 %v847_v60, %v846_v52 }
 0x1c8   : > { %392 = vadd.xlane.f32.xlu1 %v391_v3  ;;  %v1069_v6 = vunpack.c.l.b16 %v1009_v10  ;;  %v551_v52 = vpack.c.bf16 %v1900_v44, %v1900_v44  ;;  %v552_v60 = vpack.c.bf16 %v1902_v45, %v1902_v45 }
 0x1c9   : > { %v1103_v3 = vunpack.c.l.b16 %v1011_v63  ;;  %v1031_v17 = vld.sshfl [vmem:[#allocation1 + $0x30] sm:$0xff pattern:$0x75316420] }
 0x1ca   : > { %v600_v22 = vpop.permute.xlu2 %599  ;;  %v1039_v18 = vpack.c.bf16 %v1031_v17, %v1031_v17  ;;  %1054 = vst [vmem:[#allocation1 + $0x30] ss:$2 sm:$0xff] %v1809_v14  ;;  %v706_v63 = vunpack.c.l.b16 %v551_v52  ;;  %v707_v0 = vunpack.c.l.b16 %v552_v60 }
 0x1cb   : > { %v605_v24 = vsel %vm310_vm0, %v600_v22, 0  ;;  %v1105_v16 = vpack.c.b16 %v1104_v4, %v1103_v3  ;;  %1056 = vst [vmem:[#allocation1 + $0x31] ss:$2 sm:$0xff] %v1811_v15 }
 0x1cc   : > { %614 = vmatpush.bf16.xpose.msrb.mxu3 %v605_v24 }
 0x1cd   : > { %v1952_v19 = vpop.eup %1584  ;;  %v1020_v49 = vld.sshfl [vmem:[#allocation1] sm:$0xff pattern:$0x75316420] }
 0x1ce   : > { %v397_v20 = vsel %vm363_vm1, %v1952_v19, 0.0  ;;  %v1036_v55 = vpack.c.bf16 %v1020_v49, %v1020_v49  ;;  %1040 = vst [vmem:[#allocation1] ss:$2 sm:$0xff] %v1793_v8 }
 0x1cf   : > { %1042 = vst [vmem:[#allocation1 + $0x1] ss:$2 sm:$0xff] %v1795_v9  ;;  %v1030_v9 = vld.sshfl [vmem:[#allocation1 + $0x20] sm:$0xff pattern:$0x75316420] }
 0x1d0   : > { %398 = vadd.xlane.f32.xlu1 %v397_v20  ;;  %v1076_v59 = vunpack.c.l.b16 %v1036_v55  ;;  %1050 = vst [vmem:[#allocation1 + $0x20] ss:$2 sm:$0xff] %v1803_v12  ;;  %v1038_v5 = vpack.c.bf16 %v1030_v9, %v1030_v9  ;;  %v1111_v12 = vunpack.c.l.b16 %v1039_v18 }
 0x1d1   : > { %1052 = vst [vmem:[#allocation1 + $0x21] ss:$2 sm:$0xff] %v1806_v13 }
 0x1d2   : > { %v1078_v8 = vpack.c.b16 %v1077_v61, %v1076_v59  ;;  %v1110_v20 = vunpack.c.l.b16 %v1038_v5  ;;  %v559_v13 = vpop.permute.xlu1 %558  ;;  %v550_v61 = vpack.c.bf16 %v1907_v47, %v1907_v47 }
 0x1d3   : > { %592 = vrot.lane.b32.xlu0 %v591_v21, %s1701_s16  ;;  %v1071_v21 = vpack.c.b16 %v1070_v7, %v1069_v6 }
 0x1d4   : > { %v1112_v22 = vpack.c.b16 %v1111_v12, %v1110_v20  ;;  %v677_v9 = vunpack.c.l.b16 %v550_v61 }
 0x1db   : > { %1079 = vrot.lane.b32.xlu0 %v1078_v8, %s1704_s20  ;;  %v676_v8 = vunpack.c.l.b16 %v549_v57 }
 0x1dd   : > { %v678_v10 = vpack.c.b16 %v677_v9, %v676_v8 }
 0x1df   : > { %822 = vrot.lane.b32.xlu2 %v821_v32, %s1702_s18 }
 0x1e3   : > { %1106 = vrot.lane.b32.xlu0 %v1105_v16, %s1705_s22 }
 0x1e7   : > { %815 = vrot.lane.b32.xlu2 %v814_v48, %s1703_s19 }
 0x1e9   : > { %856 = vrot.lane.b32.xlu1 %v855_v54, %s1702_s18 }
 0x1ef   : > { %1113 = vrot.lane.b32.xlu2 %v1112_v22, %s1704_s20 }
 0x1f1   : > { %849 = vrot.lane.b32.xlu1 %v848_v2, %s1703_s19  ;;  %v708_v2 = vpack.c.b16 %v707_v0, %v706_v63 }
 0x1f3   : > { %709 = vrot.lane.b32.xlu0 %v708_v2, %s1706_s23 }
 0x1f9   : > { %1072 = vrot.lane.b32.xlu1 %v1071_v21, %s1705_s22 }
 0x201   : > { %679 = vrot.lane.b32.xlu1 %v678_v10, %s1706_s23 }
 0x232   : > { %v390_v24 = vpop.xlane.xlu0 %389 }
 0x233   : > { %1586 = vrcp.f32 %v390_v24 }
 0x239   : > { %v1587_v28 = vpop.eup %1586 }
 0x23a   : > { %v396_v25 = vpop.xlane.xlu2 %395  ;;  %v404_v29 = vmul.f32 %v1587_v28, %v1915_v53 }
 0x23b   : > { %v393_v26 = vpop.xlane.xlu1 %392 }
 0x23c   : > { %1588 = vrcp.f32 %v393_v26  ;;  %v408_v32 = vpack.c.bf16 %v404_v29, %v404_v29 }
 0x23d   : > { %1590 = vrcp.f32 %v396_v25 }
 0x23e   : > { %v414_v37 = vunpack.c.l.b16 %v408_v32 }
 0x242   : > { %v1589_v14 = vpop.eup %1588  ;;  %v823_v36 = vpop.permute.xlu2 %822 }
 0x243   : > { %v399_v31 = vpop.xlane.xlu1 %398  ;;  %v405_v15 = vmul.f32 %v1589_v14, %v1935_v1  ;;  %v1591_v33 = vpop.eup %1590  ;;  %v828_v42 = vsel %vm310_vm0, %v823_v36, 0 }
 0x244   : > { %1592 = vrcp.f32 %v399_v31  ;;  %v406_v39 = vmul.f32 %v1591_v33, %v1933_v62 }
 0x245   : > { %v409_v34 = vpack.c.bf16 %v405_v15, %v405_v15  ;;  %v593_v54 = vpop.permute.xlu0 %592 }
 0x246   : > { %v410_v46 = vpack.c.bf16 %v406_v39, %v406_v39 }
 0x247   : > { %v415_v38 = vunpack.c.l.b16 %v409_v34 }
 0x248   : > { %v444_v48 = vunpack.c.l.b16 %v410_v46 }
 0x249   : > { %v416_v40 = vpack.c.b16 %v415_v38, %v414_v37 }
 0x24a   : > { %v1593_v43 = vpop.eup %1592  ;;  %v816_v51 = vpop.permute.xlu2 %815 }
 0x24b   : > { %1489 = vmatmul.msk.bf16.vlgmr.msra.gmra.mxu2 %vm363_vm1, %v416_v40  ;;  %v407_v53 = vmul.f32 %v1593_v43, %v1952_v19  ;;  %v806_v40 = vpack.c.bf16 %v1957_v23, %v1957_v23 }
 0x24c   : > { %837 = vmatpush.bf16.xpose.msra.mxu2 %v828_v42  ;;  %v807_v42 = vpack.c.bf16 %v1962_v27, %v1962_v27 }
 0x24d   : > { %v411_v1 = vpack.c.bf16 %v407_v53, %v407_v53  ;;  %v1080_v58 = vpop.permute.xlu0 %1079  ;;  %v933_v43 = vunpack.c.l.b16 %v806_v40 }
 0x24e   : > { %v1085_v19 = vsel %vm310_vm0, %v1080_v58, 0  ;;  %v934_v53 = vunpack.c.l.b16 %v807_v42 }
 0x24f   : > { %v445_v49 = vunpack.c.l.b16 %v411_v1 }
 0x250   : > { %v935_v46 = vpack.c.b16 %v934_v53, %v933_v43  ;;  %v1047_v43 = vld.sshfl [vmem:[#allocation1] sm:$0xff pattern:$0x75316420]  ;;  %v1048_v53 = vld.sshfl [vmem:[#allocation1 + $0x10] sm:$0xff pattern:$0x75316420] }
 0x251   : > { %v446_v50 = vpack.c.b16 %v445_v49, %v444_v48 }
 0x252   : > { %v1114_v56 = vpop.permute.xlu2 %1113 }
 0x253   : > { %1490 = vmatmul.msk.bf16.vlgmr.msra.gmra.mxu3 %vm363_vm1, %v446_v50  ;;  %v1119_v59 = vsel %vm310_vm0, %v1114_v56, 0 }
 0x255   : > { %v1107_v41 = vpop.permute.xlu0 %1106 }
 0x25b   : > { %1491 = vmatmul.msk.bf16.vlgmr.msrb.gmra.mxu2 %vm310_vm0, %v559_v13  ;;  %v857_v62 = vpop.permute.xlu1 %856 }
 0x25c   : > { %v862_v55 = vsel %vm310_vm0, %v857_v62, 0  ;;  %1094 = vmatpush.bf16.xpose.msrb.mxu2 %v1085_v19 }
 0x25d   : > { %871 = vmatpush.bf16.xpose.msra.mxu3 %v862_v55 }
 0x263   : > { %1492 = vmatmul.msk.bf16.vlgmr.msrb.gmra.mxu3 %vm310_vm0, %v593_v54  ;;  %v850_v44 = vpop.permute.xlu1 %849 }
 0x265   : > { %1128 = vmatpush.bf16.xpose.msrb.mxu3 %v1119_v59  ;;  %v710_v32 = vpop.permute.xlu0 %709 }
 0x266   : > { %722 = vmatpush.bf16.msrb.mxu1 %v710_v32 }
 0x26b   : > { %1495 = vmatmul.msk.bf16.vlgmr.msra.gmra.mxu2 %vm310_vm0, %v816_v51  ;;  %v1073_v45 = vpop.permute.xlu1 %1072 }
 0x273   : > { %1496 = vmatmul.msk.bf16.vlgmr.msra.gmra.mxu3 %vm310_vm0, %v850_v44  ;;  %v680_v13 = vpop.permute.xlu1 %679 }
 0x274   : > { %692 = vmatpush.bf16.msrb.mxu0 %v680_v13 }
 0x27b   : > { %1499 = vmatmul.msk.bf16.vlgmr.msrb.gmra.mxu2 %vm310_vm0, %v1073_v45 }
 0x283   : > { %1500 = vmatmul.msk.bf16.vlgmr.msrb.gmra.mxu3 %vm310_vm0, %v1107_v41 }
 0x2ce   : > { %v2023_v47 = vpop.f32.mrf.mxu2 }
 0x2d6   : > { %v2025_v11 = vpop.f32.mrf.mxu2  ;;  %v2027_v3 = vpop.f32.mrf.mxu3 }
 0x2de   : > { %v2029_v4 = vpop.f32.mrf.mxu3  ;;  %v582_v5 = vpop.f32.mrf.mxu2 }
 0x2df   : > { %v621_v6 = vsel %vm363_vm1, %v582_v5, -inf }
 0x2e0   : > { %622 = vmax.xlane.f32.xlu2 %v621_v6 }
 0x2e6   : > { %v584_v7 = vpop.f32.mrf.mxu2  ;;  %v616_v16 = vpop.f32.mrf.mxu3 }
 0x2e7   : > { %v624_v17 = vsel %vm363_vm1, %v584_v7, -inf  ;;  %v627_v18 = vsel %vm363_vm1, %v616_v16, -inf }
 0x2e8   : > { %625 = vmax.xlane.f32.xlu1 %v624_v17  ;;  %628 = vmax.xlane.f32.xlu0 %v627_v18 }
 0x2ee   : > { %v618_v20 = vpop.f32.mrf.mxu3  ;;  %v2034_v12 = vpop.f32.mrf.mxu2 }
 0x2ef   : > { %v878_v21 = vsel %vm363_vm1, %v2034_v12, -inf  ;;  %v630_v22 = vsel %vm363_vm1, %v618_v20, -inf }
 0x2f0   : > { %879 = vmax.xlane.f32.xlu1 %v878_v21  ;;  %631 = vmax.xlane.f32.xlu2 %v630_v22 }
 0x2f6   : > { %v2039_v24 = vpop.f32.mrf.mxu2  ;;  %v2041_v25 = vpop.f32.mrf.mxu3 }
 0x2f7   : > { %v881_v26 = vsel %vm363_vm1, %v2039_v24, -inf  ;;  %v884_v28 = vsel %vm363_vm1, %v2041_v25, -inf }
 0x2f8   : > { %882 = vmax.xlane.f32.xlu0 %v881_v26  ;;  %885 = vmax.xlane.f32.xlu2 %v884_v28 }
 0x2fe   : > { %v2047_v29 = vpop.f32.mrf.mxu3  ;;  %v2049_v14 = vpop.f32.mrf.mxu2 }
 0x2ff   : > { %v887_v31 = vsel %vm363_vm1, %v2047_v29, -inf  ;;  %v1135_v15 = vsel %vm363_vm1, %v2049_v14, -inf }
 0x300   : > { %888 = vmax.xlane.f32.xlu1 %v887_v31  ;;  %1136 = vmax.xlane.f32.xlu0 %v1135_v15 }
 0x306   : > { %v2055_v33 = vpop.f32.mrf.mxu2  ;;  %v2057_v34 = vpop.f32.mrf.mxu3 }
 0x307   : > { %v1141_v36 = vsel %vm363_vm1, %v2057_v34, -inf  ;;  %v1138_v37 = vsel %vm363_vm1, %v2055_v33, -inf }
 0x308   : > { %1142 = vmax.xlane.f32.xlu1 %v1141_v36  ;;  %1139 = vmax.xlane.f32.xlu2 %v1138_v37 }
 0x30e   : > { %v2063_v38 = vpop.f32.mrf.mxu3 }
 0x30f   : > { %v1144_v39 = vsel %vm363_vm1, %v2063_v38, -inf }
 0x310   : > { %1145 = vmax.xlane.f32.xlu0 %v1144_v39 }
 0x321   : > { %936 = vrot.lane.b32.xlu1 %v935_v46, %s1707_s24  ;;  %v1063_v46 = vpack.c.bf16 %v1047_v43, %v1047_v43 }
 0x353   : > { %v623_v1 = vpop.xlane.xlu2 %622 }
 0x354   : > { %v633_v48 = vsub.f32 %v582_v5, %v623_v1  ;;  %v1064_v1 = vpack.c.bf16 %v1048_v53, %v1048_v53 }
 0x356   : > { %v637_v49 = vmul.f32 1.442695, %v633_v48 }
 0x358   : > { %1594 = vpow2.f32 %v637_v49  ;;  %v1190_v49 = vunpack.c.l.b16 %v1063_v46 }
 0x35b   : > { %v629_v50 = vpop.xlane.xlu0 %628  ;;  %v626_v51 = vpop.xlane.xlu1 %625 }
 0x35c   : > { %v635_v54 = vsub.f32 %v616_v16, %v629_v50  ;;  %v634_v62 = vsub.f32 %v584_v7, %v626_v51  ;;  %v1191_v50 = vunpack.c.l.b16 %v1064_v1  ;;  %v808_v51 = vpack.c.bf16 %v1967_v30, %v1967_v30 }
 0x35e   : > { %v2072_v55 = vpop.eup %1594  ;;  %v641_v23 = vmul.f32 1.442695, %v635_v54  ;;  %v639_v56 = vmul.f32 1.442695, %v634_v62  ;;  %v809_v54 = vpack.c.bf16 %v1976_v35, %v1976_v35  ;;  %v1192_v62 = vpack.c.b16 %v1191_v50, %v1190_v49 }
 0x35f   : > { %v645_v27 = vsel %vm363_vm1, %v2072_v55, 0.0 }
 0x360   : > { %1596 = vpow2.f32 %v641_v23  ;;  %646 = vadd.xlane.f32.xlu2 %v645_v27  ;;  %v1057_v23 = vld.sshfl [vmem:[#allocation1 + $0x20] sm:$0xff pattern:$0x75316420]  ;;  %v963_v27 = vunpack.c.l.b16 %v808_v51 }
 0x361   : > { %1598 = vpow2.f32 %v639_v56  ;;  %v1058_v56 = vld.sshfl [vmem:[#allocation1 + $0x30] sm:$0xff pattern:$0x75316420] }
 0x363   : > { %v632_v58 = vpop.xlane.xlu2 %631  ;;  %v880_v19 = vpop.xlane.xlu1 %879 }
 0x364   : > { %v636_v59 = vsub.f32 %v618_v20, %v632_v58  ;;  %v890_v57 = vsub.f32 %v2034_v12, %v880_v19  ;;  %v964_v58 = vunpack.c.l.b16 %v809_v54  ;;  %v1065_v19 = vpack.c.bf16 %v1057_v23, %v1057_v23 }
 0x366   : > { %v2076_v52 = vpop.eup %1596  ;;  %v643_v60 = vmul.f32 1.442695, %v636_v59  ;;  %v894_v8 = vmul.f32 1.442695, %v890_v57  ;;  %v1066_v59 = vpack.c.bf16 %v1058_v56, %v1058_v56  ;;  %v1220_v57 = vunpack.c.l.b16 %v1065_v19 }
 0x367   : > { %v2079_v61 = vpop.eup %1598  ;;  %v651_v63 = vsel %vm363_vm1, %v2076_v52, 0.0 }
 0x368   : > { %1600 = vpow2.f32 %v643_v60  ;;  %652 = vadd.xlane.f32.xlu0 %v651_v63  ;;  %v648_v0 = vsel %vm363_vm1, %v2079_v61, 0.0  ;;  %v965_v60 = vpack.c.b16 %v964_v58, %v963_v27  ;;  %v1221_v63 = vunpack.c.l.b16 %v1066_v59 }
 0x369   : > { %649 = vadd.xlane.f32.xlu1 %v648_v0  ;;  %1602 = vpow2.f32 %v894_v8 }
 0x36a   : > { %v1222_v0 = vpack.c.b16 %v1221_v63, %v1220_v57 }
 0x36b   : > { %v883_v9 = vpop.xlane.xlu0 %882  ;;  %v886_v2 = vpop.xlane.xlu2 %885 }
 0x36c   : > { %v892_v44 = vsub.f32 %v2041_v25, %v886_v2  ;;  %v891_v18 = vsub.f32 %v2039_v24, %v883_v9 }
 0x36e   : > { %v2085_v10 = vpop.eup %1600  ;;  %v898_v41 = vmul.f32 1.442695, %v892_v44  ;;  %v896_v22 = vmul.f32 1.442695, %v891_v18 }
 0x36f   : > { %v654_v45 = vsel %vm363_vm1, %v2085_v10, 0.0  ;;  %v2090_v7 = vpop.eup %1602 }
 0x370   : > { %655 = vadd.xlane.f32.xlu2 %v654_v45  ;;  %1604 = vpow2.f32 %v898_v41  ;;  %v902_v21 = vsel %vm363_vm1, %v2090_v7, 0.0 }
 0x373   : > { %v1137_v5 = vpop.xlane.xlu0 %1136  ;;  %v889_v6 = vpop.xlane.xlu1 %888 }
 0x374   : > { %v1147_v16 = vsub.f32 %v2049_v14, %v1137_v5  ;;  %v893_v17 = vsub.f32 %v2047_v29, %v889_v6 }
 0x376   : > { %v1151_v20 = vmul.f32 1.442695, %v1147_v16  ;;  %v900_v12 = vmul.f32 1.442695, %v893_v17  ;;  %v2097_v25 = vpop.eup %1604 }
 0x377   : > { %v908_v31 = vsel %vm363_vm1, %v2097_v25, 0.0 }
 0x378   : > { %1606 = vpow2.f32 %v1151_v20  ;;  %903 = vadd.xlane.f32.xlu2 %v902_v21 }
 0x379   : > { %1608 = vpow2.f32 %v900_v12 }
 0x37a   : > { %1610 = vpow2.f32 %v896_v22 }
 0x37b   : > { %v1143_v13 = vpop.xlane.xlu1 %1142  ;;  %v1140_v30 = vpop.xlane.xlu2 %1139 }
 0x37c   : > { %v1149_v26 = vsub.f32 %v2057_v34, %v1143_v13  ;;  %v1148_v35 = vsub.f32 %v2055_v33, %v1140_v30 }
 0x37e   : > { %v2100_v28 = vpop.eup %1606  ;;  %v1155_v29 = vmul.f32 1.442695, %v1149_v26  ;;  %v1153_v9 = vmul.f32 1.442695, %v1148_v35 }
 0x37f   : > { %v2102_v24 = vpop.eup %1608  ;;  %v1159_v14 = vsel %vm363_vm1, %v2100_v28, 0.0 }
 0x380   : > { %1160 = vadd.xlane.f32.xlu1 %v1159_v14  ;;  %909 = vadd.xlane.f32.xlu2 %v908_v31  ;;  %v911_v15 = vsel %vm363_vm1, %v2102_v24, 0.0  ;;  %1612 = vpow2.f32 %v1155_v29  ;;  %v2110_v34 = vpop.eup %1610 }
 0x381   : > { %912 = vadd.xlane.f32.xlu0 %v911_v15  ;;  %v905_v40 = vsel %vm363_vm1, %v2110_v34, 0.0 }
 0x383   : > { %v1146_v32 = vpop.xlane.xlu0 %1145 }
 0x384   : > { %v1150_v36 = vsub.f32 %v2063_v38, %v1146_v32 }
 0x386   : > { %v1157_v37 = vmul.f32 1.442695, %v1150_v36  ;;  %v2113_v39 = vpop.eup %1612 }
 0x387   : > { %v1165_v42 = vsel %vm363_vm1, %v2113_v39, 0.0 }
 0x388   : > { %1614 = vpow2.f32 %v1157_v37  ;;  %906 = vadd.xlane.f32.xlu2 %v905_v40 }
 0x389   : > { %1166 = vadd.xlane.f32.xlu0 %v1165_v42  ;;  %1616 = vpow2.f32 %v1153_v9 }
 0x38e   : > { %v2119_v48 = vpop.eup %1614 }
 0x38f   : > { %v1168_v38 = vsel %vm363_vm1, %v2119_v48, 0.0  ;;  %v2129_v2 = vpop.eup %1616 }
 0x390   : > { %v1162_v44 = vsel %vm363_vm1, %v2129_v2, 0.0 }
 0x391   : > { %1169 = vadd.xlane.f32.xlu0 %v1168_v38 }
 0x393   : > { %v937_v8 = vpop.permute.xlu1 %936 }
 0x394   : > { %949 = vmatpush.bf16.msra.mxu0 %v937_v8 }
 0x399   : > { %1193 = vrot.lane.b32.xlu1 %v1192_v62, %s1708_s25 }
 0x3a0   : > { %966 = vrot.lane.b32.xlu2 %v965_v60, %s1707_s24 }
 0x3a5   : > { %1223 = vrot.lane.b32.xlu0 %v1222_v0, %s1708_s25 }
 0x3c9   : > { %1163 = vadd.xlane.f32.xlu2 %v1162_v44 }
 0x3d3   : > { %v647_v45 = vpop.xlane.xlu2 %646 }
 0x3d4   : > { %1618 = vrcp.f32 %v647_v45 }
 0x3da   : > { %v1619_v6 = vpop.eup %1618 }
 0x3db   : > { %v653_v41 = vpop.xlane.xlu0 %652  ;;  %v661_v16 = vmul.f32 %v1619_v6, %v2072_v55 }
 0x3dc   : > { %v650_v5 = vpop.xlane.xlu1 %649 }
 0x3dd   : > { %1620 = vrcp.f32 %v650_v5  ;;  %v665_v20 = vpack.c.bf16 %v661_v16, %v661_v16 }
 0x3de   : > { %1622 = vrcp.f32 %v653_v41 }
 0x3df   : > { %v671_v13 = vunpack.c.l.b16 %v665_v20 }
 0x3e3   : > { %v1621_v17 = vpop.eup %1620  ;;  %v656_v18 = vpop.xlane.xlu2 %655 }
 0x3e4   : > { %v1623_v33 = vpop.eup %1622  ;;  %v662_v12 = vmul.f32 %v1621_v17, %v2079_v61  ;;  %1624 = vrcp.f32 %v656_v18 }
 0x3e5   : > { %v663_v22 = vmul.f32 %v1623_v33, %v2076_v52 }
 0x3e6   : > { %v666_v21 = vpack.c.bf16 %v662_v12, %v662_v12 }
 0x3e7   : > { %v667_v31 = vpack.c.bf16 %v663_v22, %v663_v22 }
 0x3e8   : > { %v672_v26 = vunpack.c.l.b16 %v666_v21 }
 0x3e9   : > { %v701_v36 = vunpack.c.l.b16 %v667_v31 }
 0x3ea   : > { %v1625_v29 = vpop.eup %1624  ;;  %v673_v14 = vpack.c.b16 %v672_v26, %v671_v13 }
 0x3eb   : > { %v664_v15 = vmul.f32 %v1625_v29, %v2085_v10  ;;  %v904_v32 = vpop.xlane.xlu2 %903 }
 0x3ec   : > { %1493 = vmatmul.msk.bf16.vlgmr.msrb.gmra.mxu0 %vm363_vm1, %v673_v14 }
 0x3ed   : > { %v668_v55 = vpack.c.bf16 %v664_v15, %v664_v15 }
 0x3ef   : > { %v702_v37 = vunpack.c.l.b16 %v668_v55 }
 0x3f1   : > { %v703_v40 = vpack.c.b16 %v702_v37, %v701_v36 }
 0x3f3   : > { %1494 = vmatmul.msk.bf16.vlgmr.msrb.gmra.mxu1 %vm363_vm1, %v703_v40  ;;  %v910_v61 = vpop.xlane.xlu2 %909  ;;  %v1161_v27 = vpop.xlane.xlu1 %1160 }
 0x3f4   : > { %1626 = vrcp.f32 %v910_v61  ;;  %v913_v42 = vpop.xlane.xlu0 %912 }
 0x3f5   : > { %1628 = vrcp.f32 %v913_v42 }
 0x3f6   : > { %1630 = vrcp.f32 %v904_v32 }
 0x3fa   : > { %v1627_v52 = vpop.eup %1626 }
 0x3fb   : > { %v1629_v43 = vpop.eup %1628  ;;  %v920_v53 = vmul.f32 %v1627_v52, %v2097_v25  ;;  %v907_v46 = vpop.xlane.xlu2 %906 }
 0x3fc   : > { %v1631_v10 = vpop.eup %1630  ;;  %v921_v1 = vmul.f32 %v1629_v43, %v2102_v24  ;;  %1632 = vrcp.f32 %v907_v46  ;;  %v1167_v38 = vpop.xlane.xlu0 %1166 }
 0x3fd   : > { %v924_v49 = vpack.c.bf16 %v920_v53, %v920_v53  ;;  %v918_v51 = vmul.f32 %v1631_v10, %v2090_v7 }
 0x3fe   : > { %v925_v50 = vpack.c.bf16 %v921_v1, %v921_v1 }
 0x3ff   : > { %v958_v54 = vunpack.c.l.b16 %v924_v49  ;;  %v922_v56 = vpack.c.bf16 %v918_v51, %v918_v51 }
 0x400   : > { %v959_v62 = vunpack.c.l.b16 %v925_v50 }
 0x401   : > { %v928_v24 = vunpack.c.l.b16 %v922_v56 }
 0x402   : > { %v1633_v23 = vpop.eup %1632  ;;  %v960_v25 = vpack.c.b16 %v959_v62, %v958_v54 }
 0x403   : > { %v919_v58 = vmul.f32 %v1633_v23, %v2110_v34  ;;  %v967_v19 = vpop.permute.xlu2 %966 }
 0x404   : > { %v1170_v59 = vpop.xlane.xlu0 %1169  ;;  %979 = vmatpush.bf16.msra.mxu1 %v967_v19 }
 0x405   : > { %v923_v60 = vpack.c.bf16 %v919_v58, %v919_v58  ;;  %1634 = vrcp.f32 %v1170_v59 }
 0x406   : > { %1636 = vrcp.f32 %v1167_v38 }
 0x407   : > { %v929_v57 = vunpack.c.l.b16 %v923_v60  ;;  %1498 = vmatmul.msk.bf16.vlgmr.msra.gmra.mxu1 %vm363_vm1, %v960_v25  ;;  %1638 = vrcp.f32 %v1161_v27 }
 0x409   : > { %v930_v63 = vpack.c.b16 %v929_v57, %v928_v24 }
 0x40b   : > { %v1635_v7 = vpop.eup %1634  ;;  %1497 = vmatmul.msk.bf16.vlgmr.msra.gmra.mxu0 %vm363_vm1, %v930_v63  ;;  %v1194_v0 = vpop.permute.xlu1 %1193 }
 0x40c   : > { %v1637_v30 = vpop.eup %1636  ;;  %1206 = vmatpush.bf16.msrb.mxu0 %v1194_v0  ;;  %v1178_v34 = vmul.f32 %v1635_v7, %v2119_v48 }
 0x40d   : > { %v1177_v8 = vmul.f32 %v1637_v30, %v2113_v39  ;;  %v1639_v16 = vpop.eup %1638 }
 0x40e   : > { %v1182_v35 = vpack.c.bf16 %v1178_v34, %v1178_v34  ;;  %v1175_v17 = vmul.f32 %v1639_v16, %v2100_v28 }
 0x40f   : > { %v1181_v9 = vpack.c.bf16 %v1177_v8, %v1177_v8 }
 0x410   : > { %v1216_v44 = vunpack.c.l.b16 %v1182_v35  ;;  %v1179_v33 = vpack.c.bf16 %v1175_v17, %v1175_v17 }
 0x411   : > { %v1215_v45 = vunpack.c.l.b16 %v1181_v9 }
 0x412   : > { %v1185_v20 = vunpack.c.l.b16 %v1179_v33 }
 0x413   : > { %v1217_v5 = vpack.c.b16 %v1216_v44, %v1215_v45 }
 0x417   : > { %v1224_v41 = vpop.permute.xlu0 %1223 }
 0x418   : > { %1236 = vmatpush.bf16.msrb.mxu1 %v1224_v41 }
 0x41b   : > { %1502 = vmatmul.msk.bf16.vlgmr.msrb.gmra.mxu1 %vm363_vm1, %v1217_v5 }
 0x43c   : > { %v1164_v6 = vpop.xlane.xlu2 %1163 }
 0x43d   : > { %1640 = vrcp.f32 %v1164_v6 }
 0x443   : > { %v1641_v18 = vpop.eup %1640 }
 0x444   : > { %v1176_v48 = vmul.f32 %v1641_v18, %v2129_v2 }
 0x446   : > { %v1180_v39 = vpack.c.bf16 %v1176_v48, %v1176_v48 }
 0x448   : > { %v1186_v12 = vunpack.c.l.b16 %v1180_v39 }
 0x44a   : > { %v1187_v21 = vpack.c.b16 %v1186_v12, %v1185_v20 }
 0x44c   : > { %1501 = vmatmul.msk.bf16.vlgmr.msrb.gmra.mxu0 %vm363_vm1, %v1187_v21 }
 0x469   : > { %v694_v22 = vpop.f32.mrf.mxu0 }
 0x46a   : > { %1247 = vrot.lane.b32.xlu2 %v694_v22, %s1709_s26 }
 0x470   : > { %v724_v13 = vpop.f32.mrf.mxu1 }
 0x471   : > { %v696_v26 = vpop.f32.mrf.mxu0  ;;  %1251 = vrot.lane.b32.xlu0 %v724_v13, %s1709_s26 }
 0x472   : > { %1249 = vrot.lane.b32.xlu1 %v696_v26, %s1709_s26 }
 0x478   : > { %v726_v29 = vpop.f32.mrf.mxu1 }
 0x47a   : > { %1253 = vrot.lane.b32.xlu1 %v726_v29, %s1709_s26 }
 0x484   : > { %v981_v28 = vpop.f32.mrf.mxu1 }
 0x488   : > { %v951_v14 = vpop.f32.mrf.mxu0 }
 0x489   : > { %1263 = vrot.lane.b32.xlu0 %v951_v14, %s1710_s27 }
 0x48c   : > { %v983_v2 = vpop.f32.mrf.mxu1 }
 0x48d   : > { %1269 = vrot.lane.b32.xlu2 %v983_v2, %s1710_s27 }
 0x490   : > { %v953_v31 = vpop.f32.mrf.mxu0 }
 0x491   : > { %1267 = vrot.lane.b32.xlu0 %v981_v28, %s1710_s27  ;;  %1265 = vrot.lane.b32.xlu1 %v953_v31, %s1710_s27 }
 0x498   : > { %v1238_v15 = vpop.f32.mrf.mxu1 }
 0x499   : > { %1283 = vrot.lane.b32.xlu2 %v1238_v15, %s1711_s28 }
 0x4a0   : > { %v1240_v55 = vpop.f32.mrf.mxu1 }
 0x4c4   : > { %v1248_v40 = vpop.permute.xlu2 %1247 }
 0x4c5   : > { %v1291_v61 = vsel %vm310_vm0, %v2023_v47, %v1248_v40 }
 0x4c9   : > { %v1208_v32 = vpop.f32.mrf.mxu0 }
 0x4ca   : > { %1279 = vrot.lane.b32.xlu1 %v1208_v32, %s1711_s28 }
 0x4d1   : > { %v1210_v36 = vpop.f32.mrf.mxu0 }
 0x4d2   : > { %1285 = vrot.lane.b32.xlu1 %v1240_v55, %s1711_s28  ;;  %1281 = vrot.lane.b32.xlu0 %v1210_v36, %s1711_s28 }
 0x4e3   : > { %v1252_v37 = vpop.permute.xlu0 %1251 }
 0x4e4   : > { %v1293_v53 = vsel %vm310_vm0, %v2027_v3, %v1252_v37  ;;  %v1250_v47 = vpop.permute.xlu1 %1249 }
 0x4e5   : > { %v1292_v56 = vsel %vm310_vm0, %v2025_v11, %v1250_v47 }
 0x4e7   : > { %v1270_v52 = vpop.permute.xlu2 %1269 }
 0x4ec   : > { %v1254_v3 = vpop.permute.xlu1 %1253 }
 0x4ed   : > { %v1294_v23 = vsel %vm310_vm0, %v2029_v4, %v1254_v3 }
 0x4ee   : > { %v1298_v19 = vsel %vm363_vm1, %v1294_v23, %v1270_v52 }
 0x4f3   : > { %v1284_v10 = vpop.permute.xlu2 %1283 }
 0x4fb   : > { %v1264_v42 = vpop.permute.xlu0 %1263 }
 0x4fc   : > { %v1295_v43 = vsel %vm363_vm1, %v1291_v61, %v1264_v42 }
 0x503   : > { %v1268_v46 = vpop.permute.xlu0 %1267  ;;  %v1266_v50 = vpop.permute.xlu1 %1265 }
 0x504   : > { %v1297_v1 = vsel %vm363_vm1, %v1293_v53, %v1268_v46  ;;  %v1296_v27 = vsel %vm363_vm1, %v1292_v56, %v1266_v50 }
 0x505   : > { %v1302_v38 = vsel %vm1299_vm2, %v1297_v1, %v1284_v10 }
 0x506   : > { %v1310_v49 = vrot.slane %v1302_v38, 4  ;;  %1321 = vst.msk [vmem:[%s2159_s29 + $0x10] sm:$0xf] %vm1316_vm3, %v1302_v38 }
 0x508   : > { %1322 = vst.msk [vmem:[%s2159_s29 + $0x14] sm:$0xf] %vm1316_vm3, %v1310_v49 }
 0x50d   : > { %v1360_v0 = vld [vmem:[%s2159_s29 + $0x10] sm:$0xf] (%p1770_p6) }
 0x50e   : > { %1361 = vst [vmem:[%s1335_s17 + $0x20] sm:$0xf] (%p1770_p6), %v1360_v0 }
 0x50f   : > { %v1362_v30 = vld [vmem:[%s2159_s29 + $0x14] sm:$0xf] (%p1770_p6) }
 0x510   : > { %1363 = vst [vmem:[%s1335_s17 + $0x28] sm:$0xf] (%p1770_p6), %v1362_v30 }
 0x53c   : > { %v1280_v51 = vpop.permute.xlu1 %1279 }
 0x53d   : > { %v1300_v54 = vsel %vm1299_vm2, %v1295_v43, %v1280_v51 }
 0x53e   : > { %v1308_v62 = vrot.slane %v1300_v54, 4  ;;  %1317 = vst.msk [vmem:[%s2159_s29] sm:$0xf] %vm1316_vm3, %v1300_v54 }
 0x540   : > { %1318 = vst.msk [vmem:[%s2159_s29 + $0x4] sm:$0xf] %vm1316_vm3, %v1308_v62 }
 0x544   : > { %v1282_v58 = vpop.permute.xlu0 %1281  ;;  %v1286_v59 = vpop.permute.xlu1 %1285 }
 0x545   : > { %v1301_v25 = vsel %vm1299_vm2, %v1296_v27, %v1282_v58  ;;  %v1303_v60 = vsel %vm1299_vm2, %v1298_v19, %v1286_v59  ;;  %1331 = sbr.rel (!%p1770_p6) target bundleno = 1362 (0x552), region = 69  ;;  %v1352_v11 = vld [vmem:[%s2159_s29] sm:$0xf] (%p1770_p6) }
 0x546   : > { %v1309_v24 = vrot.slane %v1301_v25, 4  ;;  %1319 = vst.msk [vmem:[%s2159_s29 + $0x8] sm:$0xf] %vm1316_vm3, %v1301_v25  ;;  %v1311_v57 = vrot.slane %v1303_v60, 4 }
 0x547   : > { %1323 = vst.msk [vmem:[%s2159_s29 + $0x18] sm:$0xf] %vm1316_vm3, %v1303_v60  ;;  %v1354_v4 = vld [vmem:[%s2159_s29 + $0x4] sm:$0xf] (%p1770_p6) }
 0x548   : > { %1320 = vst.msk [vmem:[%s2159_s29 + $0xc] sm:$0xf] %vm1316_vm3, %v1309_v24 }
 0x549   : > { %1324 = vst.msk [vmem:[%s2159_s29 + $0x1c] sm:$0xf] %vm1316_vm3, %v1311_v57 }
 0x54a   : > { %1353 = vst [vmem:[%s1335_s17] sm:$0xf] %v1352_v11 }
 0x54b   : > { %1355 = vst [vmem:[%s1335_s17 + $0x8] sm:$0xf] %v1354_v4 }
 0x54d   : > { %v1356_v63 = vld [vmem:[%s2159_s29 + $0x8] sm:$0xf] }
 0x54e   : > { %1357 = vst [vmem:[%s1335_s17 + $0x10] sm:$0xf] %v1356_v63  ;;  %v1364_v34 = vld [vmem:[%s2159_s29 + $0x18] sm:$0xf] }
 0x54f   : > { %v1358_v7 = vld [vmem:[%s2159_s29 + $0xc] sm:$0xf]  ;;  %1365 = vst [vmem:[%s1335_s17 + $0x30] sm:$0xf] %v1364_v34 }
 0x550   : > { %1359 = vst [vmem:[%s1335_s17 + $0x18] sm:$0xf] %v1358_v7  ;;  %v1366_v8 = vld [vmem:[%s2159_s29 + $0x1c] sm:$0xf] }
 0x551   : > { %1367 = vst [vmem:[%s1335_s17 + $0x38] sm:$0xf] %v1366_v8 }
 0x552 PF: > { %s11_s12 = sadd.s32 1, %s1696_s12   ;;  %s2225_s6 = smov %s1676_s7 }
 0x553   : > { %p8_p12 = scmp.ge.s32.totalorder %s11_s12, 6   ;;  %s2226_s7 = smov %s1778_s21 }
 0x554   : > { %s2227_s8 = smov %s1688_s10  ;;  %s2228_s9 = smov %s1692_s11 }
 0x555   : > { %s2229_s10 = smov %s2232_s13  ;;  %s2230_s11 = smov %s2236_s14 }
 0x556   :  { %10 = sbr.rel (!%p8_p12) target bundleno = 4 (0x4), region = 225 }

// kernel: alternating_encoder_block.14
= control target key start
LH: loop header
LB: loop body
LE: loop exit
PB: predicated region body
PF: predicated region fallthrough
CT: control target
= control target key end

     0   :  { %s689_s15 = smov 0   ;;  %s691_s16 = smov 0   ;;  %s788_s0 = inlined_call_operand.vmem [shape: f32[128,128], index: 0, kind: input, shape index: {}]   ;;  %s789_s1 = inlined_call_operand.vmem [shape: bf16[128,32], index: 1, kind: input, shape index: {}]   ;;  %s790_s2 = inlined_call_operand.vmem [shape: f32[1,32], index: 2, kind: input, shape index: {}]   ;;  %s791_s3 = inlined_call_operand.vmem [shape: f32[128,32], index: 3, kind: input, shape index: {}]   ;;  %s792_s4 = inlined_call_operand.vmem [shape: f32[128,32], index: 4, kind: output, shape index: {}]  }
   0x1   :  { %s693_s17 = smov 0  }
   0x2 LB: > { %s26_s18 = sadd.s32 1, %s658_s16  ;;  %p542_p0 = scmp.ge.s32.totalorder %s662_s17, 1  ;;  %s662_s17 = sphi %s693_s17, %s14_s17   ;;  %s658_s16 = sphi %s691_s16, %s794_s16   ;;  %s654_s15 = sphi %s689_s15, %s793_s15  }
   0x3   : > { %p28_p1 = scmp.ge.s32.totalorder %s26_s18, 2  ;;  %p210_p2 = scmp.lt.s32.totalorder %s662_s17, 3 }
   0x5   : > { %s796_s18 = smov (%p28_p1, %s26_s18), 0  ;;  %p211_p3 = pnand %p542_p0, %p210_p2 }
   0x6   : > { %s543_s25 = sshll.u32 (!%p211_p3), %s654_s15, 3 }
   0x7   : > { %214 = sbr.rel (%p211_p3) target bundleno = 191 (0xbf), region = 36  ;;  %p255_p4 = scmp.lt.s32.totalorder (!%p211_p3), %s543_s25, 15 }
   0xc   : > { %v590_v0 = vld [vmem:[%s789_s1 + $0x38] sm:$0xff]  ;;  %v589_v1 = vld [vmem:[%s789_s1 + $0x30] sm:$0xff]  ;;  %v588_v2 = vld [vmem:[%s789_s1 + $0x28] sm:$0xff]  ;;  %s798_s25 = smov (!%p255_p4, %s543_s25), 15  ;;  %vm410_vm0 = vcmask 261120  }
   0xd   : > { %365 = vmatpush.bf16.msra.mxu0 %v590_v0  ;;  %591 = vmatpush.bf16.msra.mxu1 %v590_v0  ;;  %v587_v3 = vld [vmem:[%s789_s1 + $0x20] sm:$0xff]  ;;  %v586_v4 = vld [vmem:[%s789_s1 + $0x18] sm:$0xff]  ;;  %v585_v5 = vld [vmem:[%s789_s1 + $0x10] sm:$0xff]  ;;  %s728_s6 = sshll.u32 %s798_s25, 3 }
   0xe   : > { %592 = vmatpush.bf16.msra.mxu2 %v590_v0  ;;  %593 = vmatpush.bf16.msra.mxu3 %v590_v0  ;;  %v584_v6 = vld [vmem:[%s789_s1 + $0x8] sm:$0xff]  ;;  %s258_s11 = scalar_lea.vmem %s788_s0, %s728_s6  ;;  %v583_v7 = vld [vmem:[%s789_s1] sm:$0xff]  ;;  %s744_s19 = scalar_lea.vmem %s791_s3, %s728_s6 }
   0xf   : > { %v285_v8 = vld [vmem:[%s258_s11] sm:$0xff]  ;;  %v286_v9 = vld [vmem:[%s258_s11 + $0x8] sm:$0xff]  ;;  %v287_v10 = vld [vmem:[%s258_s11 + $0x10] sm:$0xff]  ;;  %s755_s24 = scalar_lea.vmem %s792_s4, %s728_s6 }
  0x10   : > { %v288_v11 = vld [vmem:[%s258_s11 + $0x18] sm:$0xff]  ;;  %v289_v12 = vld [vmem:[%s258_s11 + $0x20] sm:$0xff]  ;;  %v290_v13 = vld [vmem:[%s258_s11 + $0x28] sm:$0xff]  ;;  %v293_v16 = vpack.c.bf16 %v286_v9, %v285_v8 }
  0x11   : > { %366 = vmatpush.bf16.msra.mxu0 %v589_v1  ;;  %594 = vmatpush.bf16.msra.mxu1 %v589_v1  ;;  %v291_v14 = vld [vmem:[%s258_s11 + $0x30] sm:$0xff]  ;;  %v292_v15 = vld [vmem:[%s258_s11 + $0x38] sm:$0xff]  ;;  %v294_v17 = vpack.c.bf16 %v288_v11, %v287_v10  ;;  %v295_v18 = vpack.c.bf16 %v290_v13, %v289_v12  ;;  %v639_v20 = vld [vmem:[%s790_s2] ss:$0 sm:$0xff] }
  0x12   : > { %595 = vmatpush.bf16.msra.mxu2 %v589_v1  ;;  %596 = vmatpush.bf16.msra.mxu3 %v589_v1  ;;  %v296_v19 = vpack.c.bf16 %v292_v15, %v291_v14  ;;  %v394_v22 = vld [vmem:[%s744_s19] sm:$0xff]  ;;  %v396_v24 = vld [vmem:[%s744_s19 + $0x10] sm:$0xff]  ;;  %v395_v36 = vld [vmem:[%s744_s19 + $0x8] sm:$0xff] }
  0x13   : > { %v398_v30 = vld [vmem:[%s744_s19 + $0x20] sm:$0xff]  ;;  %v400_v32 = vld [vmem:[%s744_s19 + $0x30] sm:$0xff]  ;;  %v397_v38 = vld [vmem:[%s744_s19 + $0x18] sm:$0xff] }
  0x14   : > { %v399_v46 = vld [vmem:[%s744_s19 + $0x28] sm:$0xff]  ;;  %v401_v48 = vld [vmem:[%s744_s19 + $0x38] sm:$0xff] }
  0x15   : > { %367 = vmatpush.bf16.msra.mxu0 %v588_v2  ;;  %597 = vmatpush.bf16.msra.mxu1 %v588_v2 }
  0x16   : > { %598 = vmatpush.bf16.msra.mxu2 %v588_v2  ;;  %599 = vmatpush.bf16.msra.mxu3 %v588_v2 }
  0x19   : > { %368 = vmatpush.bf16.msra.mxu0 %v587_v3  ;;  %600 = vmatpush.bf16.msra.mxu1 %v587_v3 }
  0x1a   : > { %601 = vmatpush.bf16.msra.mxu2 %v587_v3  ;;  %602 = vmatpush.bf16.msra.mxu3 %v587_v3 }
  0x1d   : > { %369 = vmatpush.bf16.msra.mxu0 %v586_v4  ;;  %603 = vmatpush.bf16.msra.mxu1 %v586_v4 }
  0x1e   : > { %604 = vmatpush.bf16.msra.mxu2 %v586_v4  ;;  %605 = vmatpush.bf16.msra.mxu3 %v586_v4 }
  0x21   : > { %370 = vmatpush.bf16.msra.mxu0 %v585_v5  ;;  %606 = vmatpush.bf16.msra.mxu1 %v585_v5 }
  0x22   : > { %607 = vmatpush.bf16.msra.mxu2 %v585_v5  ;;  %608 = vmatpush.bf16.msra.mxu3 %v585_v5 }
  0x25   : > { %371 = vmatpush.bf16.msra.mxu0 %v584_v6  ;;  %609 = vmatpush.bf16.msra.mxu1 %v584_v6 }
  0x26   : > { %610 = vmatpush.bf16.msra.mxu2 %v584_v6  ;;  %611 = vmatpush.bf16.msra.mxu3 %v584_v6 }
  0x29   : > { %372 = vmatpush.bf16.msra.mxu0 %v583_v7  ;;  %612 = vmatpush.bf16.msra.mxu1 %v583_v7 }
  0x2a   : > { %613 = vmatpush.bf16.msra.mxu2 %v583_v7  ;;  %614 = vmatpush.bf16.msra.mxu3 %v583_v7 }
  0x2c   : > { %373 = vmatmul.bf16.vlgmr.msra.gmra.mxu0 %v293_v16  ;;  %378 = vmatmul.bf16.vlgmr.msra.gmra.mxu1 %v294_v17 }
  0x2d   : > { %383 = vmatmul.bf16.vlgmr.msra.gmra.mxu2 %v295_v18  ;;  %388 = vmatmul.bf16.vlgmr.msra.gmra.mxu3 %v296_v19 }
  0xa9   : > { %v374_v21 = vpop.f32.mrf.mxu0  ;;  %v379_v23 = vpop.f32.mrf.mxu1 }
  0xaa   : > { %v375_v25 = vadd.f32 %v639_v20, %v374_v21  ;;  %v380_v26 = vadd.f32 %v639_v20, %v379_v23 }
  0xac   : > { %v402_v27 = vadd.f32 %v394_v22, %v375_v25  ;;  %v404_v28 = vadd.f32 %v396_v24, %v380_v26 }
  0xae   : > { %411 = vst.msk [vmem:[%s755_s24] sm:$0xff] %vm410_vm0, %v402_v27 }
  0xaf   : > { %413 = vst.msk [vmem:[%s755_s24 + $0x10] sm:$0xff] %vm410_vm0, %v404_v28 }
  0xb0   : > { %v384_v29 = vpop.f32.mrf.mxu2  ;;  %v389_v31 = vpop.f32.mrf.mxu3 }
  0xb1   : > { %v385_v33 = vadd.f32 %v639_v20, %v384_v29  ;;  %v390_v34 = vadd.f32 %v639_v20, %v389_v31  ;;  %v376_v35 = vpop.f32.mrf.mxu0  ;;  %v381_v37 = vpop.f32.mrf.mxu1 }
  0xb2   : > { %v377_v39 = vadd.f32 %v639_v20, %v376_v35  ;;  %v382_v40 = vadd.f32 %v639_v20, %v381_v37 }
  0xb3   : > { %v406_v41 = vadd.f32 %v398_v30, %v385_v33  ;;  %v408_v42 = vadd.f32 %v400_v32, %v390_v34 }
  0xb4   : > { %v403_v43 = vadd.f32 %v395_v36, %v377_v39  ;;  %v405_v44 = vadd.f32 %v397_v38, %v382_v40 }
  0xb5   : > { %415 = vst.msk [vmem:[%s755_s24 + $0x20] sm:$0xff] %vm410_vm0, %v406_v41 }
  0xb6   : > { %417 = vst.msk [vmem:[%s755_s24 + $0x30] sm:$0xff] %vm410_vm0, %v408_v42 }
  0xb7   : > { %412 = vst.msk [vmem:[%s755_s24 + $0x8] sm:$0xff] %vm410_vm0, %v403_v43 }
  0xb8   : > { %414 = vst.msk [vmem:[%s755_s24 + $0x18] sm:$0xff] %vm410_vm0, %v405_v44  ;;  %v386_v45 = vpop.f32.mrf.mxu2  ;;  %v391_v47 = vpop.f32.mrf.mxu3 }
  0xb9   : > { %v387_v49 = vadd.f32 %v639_v20, %v386_v45  ;;  %v392_v50 = vadd.f32 %v639_v20, %v391_v47 }
  0xbb   : > { %v407_v51 = vadd.f32 %v399_v46, %v387_v49  ;;  %v409_v52 = vadd.f32 %v401_v48, %v392_v50 }
  0xbd   : > { %416 = vst.msk [vmem:[%s755_s24 + $0x28] sm:$0xff] %vm410_vm0, %v407_v51 }
  0xbe   : > { %418 = vst.msk [vmem:[%s755_s24 + $0x38] sm:$0xff] %vm410_vm0, %v409_v52 }
  0xbf PF: > { %s14_s17 = sadd.s32 1, %s662_s17   ;;  %s793_s15 = smov %s658_s16 }
  0xc0   : > { %p11_p5 = scmp.ge.s32.totalorder %s14_s17, 4   ;;  %s794_s16 = smov %s796_s18 }
  0xc2   :  { %13 = sbr.rel (!%p11_p5) target bundleno = 2 (0x2), region = 75 }

// kernel: alternating_encoder_block.13
= control target key start
LH: loop header
LB: loop body
LE: loop exit
PB: predicated region body
PF: predicated region fallthrough
CT: control target
= control target key end

     0   :  { %s1157_s18 = smov 0   ;;  %s1159_s19 = smov 0   ;;  %s1590_s0 = inlined_call_operand.vmem [shape: f32[128,32], index: 0, kind: input, shape index: {}]   ;;  %s1591_s1 = inlined_call_operand.vmem [shape: f32[1,32], index: 1, kind: input, shape index: {}]   ;;  %s1592_s2 = inlined_call_operand.vmem [shape: f32[1,32], index: 2, kind: input, shape index: {}]   ;;  %s1593_s3 = inlined_call_operand.vmem [shape: bf16[32,128], index: 3, kind: input, shape index: {}]   ;;  %s1594_s4 = inlined_call_operand.vmem [shape: f32[1,128], index: 4, kind: input, shape index: {}]   ;;  %s1595_s5 = inlined_call_operand.vmem [shape: f32[128,128], index: 5, kind: output, shape index: {}]  }
   0x1   :  { %s1161_s20 = smov 0  }
   0x2 LB: > { %s27_s21 = sadd.s32 1, %s1120_s19  ;;  %p997_p0 = scmp.ge.s32.totalorder %s1124_s20, 1  ;;  %s1124_s20 = sphi %s1161_s20, %s15_s20   ;;  %s1120_s19 = sphi %s1159_s19, %s1613_s19   ;;  %s1116_s18 = sphi %s1157_s18, %s1612_s18  }
   0x3   : > { %p29_p1 = scmp.ge.s32.totalorder %s27_s21, 2  ;;  %p219_p2 = scmp.lt.s32.totalorder %s1124_s20, 3 }
   0x5   : > { %s1615_s21 = smov (%p29_p1, %s27_s21), 0  ;;  %p220_p3 = pnand %p997_p0, %p219_p2 }
   0x6   : > { %s998_s22 = sshll.u32 (!%p220_p3), %s1116_s18, 3 }
   0x7   : > { %223 = sbr.rel (%p220_p3) target bundleno = 539 (0x21b), region = 40  ;;  %p258_p4 = scmp.lt.s32.totalorder (!%p220_p3), %s998_s22, 15 }
   0xc   : > { %s1617_s22 = smov (!%p258_p4, %s998_s22), 15  ;;  %vm288_vm0 = vcmask 261120   ;;  %v1126_v16 = vmov 32.0  }
   0xd   : > { %s999_s23 = sshll.u32 %s1617_s22, 3  ;;  %1052 = vrcp.f32 %v1126_v16 }
   0xe   : > { %s261_s26 = scalar_lea.vmem %s1590_s0, %s999_s23  ;;  %s1527_s14 = scalar_lea.vmem %s1595_s5, %s999_s23 }
   0xf   : > { %v286_v0 = vld [vmem:[%s261_s26 + $0x30] sm:$0xff]  ;;  %v284_v1 = vld [vmem:[%s261_s26 + $0x20] sm:$0xff]  ;;  %v287_v6 = vld [vmem:[%s261_s26 + $0x38] sm:$0xff] }
  0x10   : > { %v280_v2 = vld [vmem:[%s261_s26] sm:$0xff]  ;;  %v307_v3 = vsel %vm288_vm0, %v286_v0, 0.0  ;;  %v301_v4 = vsel %vm288_vm0, %v284_v1, 0.0  ;;  %v285_v7 = vld [vmem:[%s261_s26 + $0x28] sm:$0xff]  ;;  %v310_v9 = vsel %vm288_vm0, %v287_v6, 0.0  ;;  %v282_v12 = vld [vmem:[%s261_s26 + $0x10] sm:$0xff] }
  0x11   : > { %v289_v5 = vsel %vm288_vm0, %v280_v2, 0.0  ;;  %308 = vadd.xlane.f32.xlu1 %v307_v3  ;;  %302 = vadd.xlane.f32.xlu0 %v301_v4  ;;  %v281_v8 = vld [vmem:[%s261_s26 + $0x8] sm:$0xff]  ;;  %v304_v10 = vsel %vm288_vm0, %v285_v7, 0.0  ;;  %v283_v13 = vld [vmem:[%s261_s26 + $0x18] sm:$0xff]  ;;  %v295_v14 = vsel %vm288_vm0, %v282_v12, 0.0 }
  0x12   : > { %290 = vadd.xlane.f32.xlu2 %v289_v5  ;;  %v292_v11 = vsel %vm288_vm0, %v281_v8, 0.0  ;;  %v298_v15 = vsel %vm288_vm0, %v283_v13, 0.0  ;;  %v1017_v3 = vld [vmem:[%s1593_s3 + $0x8] sm:$0xff] }
  0x13   : > { %v1053_v17 = vpop.eup %1052  ;;  %1019 = vmatpush.bf16.msra.mxu2 %v1017_v3  ;;  %1020 = vmatpush.bf16.msra.mxu3 %v1017_v3 }
  0x14   : > { %v314_v18 = vmul.f32 32.0, %v1053_v17  ;;  %vm318_vm1 = vweird.f32 %v1053_v17  ;;  %538 = vmatpush.bf16.msra.mxu0 %v1017_v3  ;;  %1018 = vmatpush.bf16.msra.mxu1 %v1017_v3 }
  0x16   : > { %v315_v19 = vsub.f32 1.0, %v314_v18 }
  0x18   : > { %v316_v20 = vmul.f32 %v1053_v17, %v315_v19 }
  0x19   : > { %311 = vadd.xlane.f32.xlu1 %v310_v9  ;;  %305 = vadd.xlane.f32.xlu0 %v304_v10 }
  0x1a   : > { %293 = vadd.xlane.f32.xlu2 %v292_v11  ;;  %v317_v21 = vadd.f32 %v1053_v17, %v316_v20 }
  0x1c   : > { %v1191_v22 = vsel %vm318_vm1, %v1053_v17, %v317_v21 }
  0x21   : > { %296 = vadd.xlane.f32.xlu0 %v295_v14  ;;  %299 = vadd.xlane.f32.xlu1 %v298_v15 }
  0x84   : > { %v309_v23 = vpop.xlane.xlu1 %308  ;;  %v303_v24 = vpop.xlane.xlu0 %302 }
  0x85   : > { %v326_v25 = vmul.f32 %v1191_v22, %v309_v23  ;;  %v324_v26 = vmul.f32 %v1191_v22, %v303_v24  ;;  %v291_v27 = vpop.xlane.xlu2 %290 }
  0x86   : > { %v320_v36 = vmul.f32 %v1191_v22, %v291_v27 }
  0x87   : > { %v1195_v28 = vsub.f32 %v286_v0, %v326_v25  ;;  %v1197_v29 = vsub.f32 %v284_v1, %v324_v26 }
  0x88   : > { %v1215_v44 = vsub.f32 %v280_v2, %v320_v36 }
  0x89   : > { %v342_v30 = vmul.f32 %v1195_v28, %v1195_v28  ;;  %v340_v31 = vmul.f32 %v1197_v29, %v1197_v29 }
  0x8a   : > { %v336_v55 = vmul.f32 %v1215_v44, %v1215_v44 }
  0x8b   : > { %v362_v32 = vsel %vm288_vm0, %v342_v30, 0.0  ;;  %v356_v33 = vsel %vm288_vm0, %v340_v31, 0.0 }
  0x8c   : > { %v312_v34 = vpop.xlane.xlu1 %311  ;;  %v306_v35 = vpop.xlane.xlu0 %305  ;;  %363 = vadd.xlane.f32.xlu1 %v362_v32  ;;  %357 = vadd.xlane.f32.xlu2 %v356_v33  ;;  %v344_v59 = vsel %vm288_vm0, %v336_v55, 0.0 }
  0x8d   : > { %v327_v37 = vmul.f32 %v1191_v22, %v312_v34  ;;  %v325_v38 = vmul.f32 %v1191_v22, %v306_v35  ;;  %v294_v39 = vpop.xlane.xlu2 %293 }
  0x8e   : > { %v321_v40 = vmul.f32 %v1191_v22, %v294_v39 }
  0x8f   : > { %v1209_v41 = vsub.f32 %v287_v6, %v327_v37  ;;  %v1211_v42 = vsub.f32 %v285_v7, %v325_v38  ;;  %v1016_v6 = vld [vmem:[%s1593_s3] sm:$0xff] }
  0x90   : > { %v1213_v43 = vsub.f32 %v281_v8, %v321_v40  ;;  %1022 = vmatpush.bf16.msra.mxu2 %v1016_v6  ;;  %1023 = vmatpush.bf16.msra.mxu3 %v1016_v6 }
  0x91   : > { %v341_v45 = vmul.f32 %v1211_v42, %v1211_v42  ;;  %v343_v46 = vmul.f32 %v1209_v41, %v1209_v41  ;;  %539 = vmatpush.bf16.msra.mxu0 %v1016_v6  ;;  %1021 = vmatpush.bf16.msra.mxu1 %v1016_v6 }
  0x92   : > { %v337_v47 = vmul.f32 %v1213_v43, %v1213_v43 }
  0x93   : > { %v359_v48 = vsel %vm288_vm0, %v341_v45, 0.0  ;;  %v365_v49 = vsel %vm288_vm0, %v343_v46, 0.0 }
  0x94   : > { %360 = vadd.xlane.f32.xlu0 %v359_v48  ;;  %v297_v50 = vpop.xlane.xlu0 %296  ;;  %366 = vadd.xlane.f32.xlu2 %v365_v49  ;;  %v347_v51 = vsel %vm288_vm0, %v337_v47, 0.0  ;;  %v300_v52 = vpop.xlane.xlu1 %299 }
  0x95   : > { %v322_v53 = vmul.f32 %v1191_v22, %v297_v50  ;;  %348 = vadd.xlane.f32.xlu1 %v347_v51  ;;  %v323_v54 = vmul.f32 %v1191_v22, %v300_v52 }
  0x97   : > { %v1230_v56 = vsub.f32 %v282_v12, %v322_v53  ;;  %v1232_v57 = vsub.f32 %v283_v13, %v323_v54 }
  0x99   : > { %v338_v58 = vmul.f32 %v1230_v56, %v1230_v56  ;;  %v339_v61 = vmul.f32 %v1232_v57, %v1232_v57 }
  0x9b   : > { %v350_v60 = vsel %vm288_vm0, %v338_v58, 0.0  ;;  %v353_v62 = vsel %vm288_vm0, %v339_v61, 0.0 }
  0x9c   : > { %351 = vadd.xlane.f32.xlu2 %v350_v60  ;;  %345 = vadd.xlane.f32.xlu0 %v344_v59 }
  0xa4   : > { %354 = vadd.xlane.f32.xlu0 %v353_v62 }
  0xff   : > { %v364_v63 = vpop.xlane.xlu1 %363  ;;  %v358_v0 = vpop.xlane.xlu2 %357 }
 0x100   : > { %v374_v1 = vmul.f32 %v364_v63, %v1191_v22  ;;  %v372_v2 = vmul.f32 %v358_v0, %v1191_v22  ;;  %v1288_v63 = vld [vmem:[%s1591_s1] ss:$0 sm:$0xff] }
 0x102   : > { %v382_v4 = vadd.f32 1e-05, %v374_v1  ;;  %v380_v5 = vadd.f32 1e-05, %v372_v2 }
 0x104   : > { %1054 = vrsqrt.f32 %v382_v4  ;;  %vm450_vm2 = vweird.f32 %v382_v4  ;;  %vm430_vm5 = vweird.f32 %v380_v5 }
 0x105   : > { %1056 = vrsqrt.f32 %v380_v5 }
 0x107   : > { %v361_v7 = vpop.xlane.xlu0 %360  ;;  %v367_v8 = vpop.xlane.xlu2 %366 }
 0x108   : > { %v373_v9 = vmul.f32 %v361_v7, %v1191_v22  ;;  %v349_v10 = vpop.xlane.xlu1 %348  ;;  %v375_v11 = vmul.f32 %v367_v8, %v1191_v22 }
 0x109   : > { %v369_v12 = vmul.f32 %v349_v10, %v1191_v22 }
 0x10a   : > { %v1055_v13 = vpop.eup %1054  ;;  %v381_v14 = vadd.f32 1e-05, %v373_v9  ;;  %v1252_v15 = vadd.f32 1e-05, %v375_v11  ;;  %v1050_v11 = vld [vmem:[%s1592_s2] ss:$0 sm:$0xff] }
 0x10b   : > { %v1057_v16 = vpop.eup %1056  ;;  %v445_v17 = vmul.f32 %v1055_v13, %v382_v4  ;;  %v377_v18 = vadd.f32 1e-05, %v369_v12  ;;  %vm451_vm4 = vweird.f32 %v1055_v13 }
 0x10c   : > { %v425_v19 = vmul.f32 %v1057_v16, %v380_v5  ;;  %1058 = vrsqrt.f32 %v381_v14  ;;  %vm431_vm3 = vweird.f32 %v1057_v16  ;;  %vm440_vm7 = vweird.f32 %v381_v14  ;;  %vm1275_vm8 = vmor %vm450_vm2, %vm451_vm4 }
 0x10d   : > { %v446_v20 = vmul.f32 %v1055_v13, %v445_v17  ;;  %1060 = vrsqrt.f32 %v377_v18  ;;  %vm1265_vm6 = vmor %vm430_vm5, %vm431_vm3  ;;  %vm400_vm9 = vweird.f32 %v377_v18  ;;  %vm460_vm12 = vweird.f32 %v1252_v15 }
 0x10e   : > { %v426_v21 = vmul.f32 %v1057_v16, %v425_v19  ;;  %1062 = vrsqrt.f32 %v1252_v15 }
 0x10f   : > { %v447_v23 = vmul.f32 0.5, %v446_v20  ;;  %v346_v24 = vpop.xlane.xlu0 %345  ;;  %v352_v25 = vpop.xlane.xlu2 %351 }
 0x110   : > { %v427_v26 = vmul.f32 0.5, %v426_v21  ;;  %v368_v27 = vmul.f32 %v346_v24, %v1191_v22  ;;  %v370_v30 = vmul.f32 %v352_v25, %v1191_v22 }
 0x111   : > { %v448_v31 = vsub.f32 1.5, %v447_v23 }
 0x112   : > { %v1059_v32 = vpop.eup %1058  ;;  %v428_v33 = vsub.f32 1.5, %v427_v26  ;;  %v1257_v34 = vadd.f32 1e-05, %v368_v27  ;;  %v1261_v37 = vadd.f32 1e-05, %v370_v30 }
 0x113   : > { %v1259_v35 = vpop.eup %1060  ;;  %v435_v36 = vmul.f32 %v1059_v32, %v381_v14  ;;  %v449_v39 = vmul.f32 %v1055_v13, %v448_v31  ;;  %vm441_vm10 = vweird.f32 %v1059_v32 }
 0x114   : > { %v1063_v38 = vpop.eup %1062  ;;  %v429_v40 = vmul.f32 %v1057_v16, %v428_v33  ;;  %v395_v45 = vmul.f32 %v1259_v35, %v377_v18  ;;  %1064 = vrsqrt.f32 %v1257_v34  ;;  %vm401_vm11 = vweird.f32 %v1259_v35  ;;  %vm442_vm14 = vmor %vm440_vm7, %vm441_vm10 }
 0x115   : > { %v436_v47 = vmul.f32 %v1059_v32, %v435_v36  ;;  %v455_v48 = vmul.f32 %v1063_v38, %v1252_v15  ;;  %1066 = vrsqrt.f32 %v1261_v37  ;;  %v453_v55 = vsel %vm1275_vm8, %v1055_v13, %v449_v39  ;;  %vm1297_vm15 = vmor %vm400_vm9, %vm401_vm11 }
 0x116   : > { %v433_v49 = vsel %vm1265_vm6, %v1057_v16, %v429_v40  ;;  %v396_v50 = vmul.f32 %v1259_v35, %v395_v45  ;;  %vm461_vm13 = vweird.f32 %v1063_v38  ;;  %v470_v3 = vmul.f32 %v453_v55, %v1195_v28 }
 0x117   : > { %v437_v52 = vmul.f32 0.5, %v436_v47  ;;  %v456_v53 = vmul.f32 %v1063_v38, %v455_v48  ;;  %v355_v54 = vpop.xlane.xlu0 %354  ;;  %v468_v60 = vmul.f32 %v433_v49, %v1197_v29  ;;  %vm462_vm1 = vmor %vm460_vm12, %vm461_vm13  ;;  %vm390_vm2 = vweird.f32 %v1257_v34 }
 0x118   : > { %v397_v58 = vmul.f32 0.5, %v396_v50  ;;  %v371_v59 = vmul.f32 %v355_v54, %v1191_v22  ;;  %v482_v18 = vmul.f32 %v1288_v63, %v470_v3  ;;  %vm410_vm4 = vweird.f32 %v1261_v37 }
 0x119   : > { %v438_v61 = vsub.f32 1.5, %v437_v52  ;;  %v457_v62 = vmul.f32 0.5, %v456_v53  ;;  %v480_v28 = vmul.f32 %v1288_v63, %v468_v60 }
 0x11a   : > { %v1065_v0 = vpop.eup %1064  ;;  %v398_v1 = vsub.f32 1.5, %v397_v58  ;;  %v379_v2 = vadd.f32 1e-05, %v371_v59 }
 0x11b   : > { %v439_v22 = vmul.f32 %v1059_v32, %v438_v61  ;;  %v458_v29 = vsub.f32 1.5, %v457_v62  ;;  %v385_v4 = vmul.f32 %v1065_v0, %v1257_v34  ;;  %v1067_v7 = vpop.eup %1066  ;;  %vm391_vm3 = vweird.f32 %v1065_v0 }
 0x11c   : > { %v399_v5 = vmul.f32 %v1259_v35, %v398_v1  ;;  %1068 = vrsqrt.f32 %v379_v2  ;;  %v405_v13 = vmul.f32 %v1067_v7, %v1261_v37  ;;  %v492_v15 = vadd.f32 %v1050_v11, %v480_v28  ;;  %vm392_vm5 = vmor %vm390_vm2, %vm391_vm3 }
 0x11d   : > { %v443_v8 = vsel %vm442_vm14, %v1059_v32, %v439_v22  ;;  %v459_v9 = vmul.f32 %v1063_v38, %v458_v29  ;;  %v386_v10 = vmul.f32 %v1065_v0, %v385_v4  ;;  %vm411_vm6 = vweird.f32 %v1067_v7 }
 0x11e   : > { %v469_v12 = vmul.f32 %v443_v8, %v1211_v42  ;;  %v403_v14 = vsel %vm1297_vm15, %v1259_v35, %v399_v5  ;;  %v406_v20 = vmul.f32 %v1067_v7, %v405_v13  ;;  %vm412_vm7 = vmor %vm410_vm4, %vm411_vm6  ;;  %vm420_vm9 = vweird.f32 %v379_v2 }
 0x11f   : > { %v463_v16 = vsel %vm462_vm1, %v1063_v38, %v459_v9  ;;  %v387_v17 = vmul.f32 0.5, %v386_v10  ;;  %v465_v24 = vmul.f32 %v403_v14, %v1213_v43 }
 0x120   : > { %v471_v19 = vmul.f32 %v463_v16, %v1209_v41  ;;  %v481_v21 = vmul.f32 %v1288_v63, %v469_v12  ;;  %v407_v25 = vmul.f32 0.5, %v406_v20  ;;  %v494_v41 = vadd.f32 %v1050_v11, %v482_v18 }
 0x121   : > { %v388_v42 = vsub.f32 1.5, %v387_v17  ;;  %v477_v40 = vmul.f32 %v1288_v63, %v465_v24 }
 0x122   : > { %v1069_v23 = vpop.eup %1068  ;;  %v493_v26 = vadd.f32 %v1050_v11, %v481_v21  ;;  %v483_v27 = vmul.f32 %v1288_v63, %v471_v19  ;;  %v408_v32 = vsub.f32 1.5, %v407_v25 }
 0x123   : > { %v389_v30 = vmul.f32 %v1065_v0, %v388_v42  ;;  %v415_v31 = vmul.f32 %v1069_v23, %v379_v2  ;;  %vm421_vm8 = vweird.f32 %v1069_v23  ;;  %v489_v50 = vadd.f32 %v1050_v11, %v477_v40 }
 0x124   : > { %v498_v33 = vpack.c.bf16 %v493_v26, %v492_v15  ;;  %v495_v35 = vadd.f32 %v1050_v11, %v483_v27  ;;  %v409_v39 = vmul.f32 %v1067_v7, %v408_v32  ;;  %vm422_vm10 = vmor %vm420_vm9, %vm421_vm8 }
 0x125   : > { %v393_v34 = vsel %vm392_vm5, %v1065_v0, %v389_v30  ;;  %v416_v36 = vmul.f32 %v1069_v23, %v415_v31 }
 0x126   : > { %v464_v38 = vmul.f32 %v393_v34, %v1215_v44  ;;  %1012 = vmatmul.msk.bf16.vlgmr.msra.gmra.mxu2 %vm288_vm0, %v498_v33  ;;  %v499_v43 = vpack.c.bf16 %v495_v35, %v494_v41  ;;  %v413_v46 = vsel %vm412_vm7, %v1067_v7, %v409_v39 }
 0x127   : > { %v417_v45 = vmul.f32 0.5, %v416_v36  ;;  %v466_v49 = vmul.f32 %v413_v46, %v1230_v56  ;;  %v1336_v56 = vld [vmem:[%s1594_s4] ss:$0 sm:$0xff] }
 0x128   : > { %1013 = vmatmul.msk.bf16.vlgmr.msra.gmra.mxu3 %vm288_vm0, %v499_v43  ;;  %v476_v47 = vmul.f32 %v1288_v63, %v464_v38 }
 0x129   : > { %v418_v48 = vsub.f32 1.5, %v417_v45  ;;  %v478_v54 = vmul.f32 %v1288_v63, %v466_v49 }
 0x12a   : > { %v488_v44 = vadd.f32 %v1050_v11, %v476_v47 }
 0x12b   : > { %v419_v51 = vmul.f32 %v1069_v23, %v418_v48  ;;  %v490_v58 = vadd.f32 %v1050_v11, %v478_v54 }
 0x12c   : > { %v496_v52 = vpack.c.bf16 %v489_v50, %v488_v44 }
 0x12d   : > { %v423_v53 = vsel %vm422_vm10, %v1069_v23, %v419_v51 }
 0x12e   : > { %v467_v37 = vmul.f32 %v423_v53, %v1232_v57  ;;  %1010 = vmatmul.msk.bf16.vlgmr.msra.gmra.mxu0 %vm288_vm0, %v496_v52 }
 0x130   : > { %v479_v55 = vmul.f32 %v1288_v63, %v467_v37 }
 0x132   : > { %v491_v59 = vadd.f32 %v1050_v11, %v479_v55 }
 0x134   : > { %v497_v60 = vpack.c.bf16 %v491_v59, %v490_v58 }
 0x136   : > { %1011 = vmatmul.msk.bf16.vlgmr.msra.gmra.mxu1 %vm288_vm0, %v497_v60 }
 0x1a9   : > { %v551_v61 = vpop.f32.mrf.mxu2 }
 0x1aa   : > { %v552_v62 = vadd.f32 %v1336_v56, %v551_v61 }
 0x1ab   : > { %v556_v57 = vpop.f32.mrf.mxu3  ;;  %v541_v0 = vpop.f32.mrf.mxu0 }
 0x1ac   : > { %v1339_v1 = vmul.f32 0.70710677, %v552_v62  ;;  %v557_v2 = vadd.f32 %v1336_v56, %v556_v57  ;;  %v1343_v63 = vadd.f32 %v1336_v56, %v541_v0  ;;  %v1361_v42 = vmul.f32 0.5, %v552_v62 }
 0x1ae   : > { %v581_v3 = vand.u32 2147483647, %v1339_v1  ;;  %v1346_v22 = vmul.f32 0.70710677, %v557_v2  ;;  %v1349_v29 = vmul.f32 0.70710677, %v1343_v63 }
 0x1af   : > { %v1364_v24 = vmul.f32 0.5, %v557_v2 }
 0x1b0   : > { %v589_v4 = vmul.f32 0.3275911, %v581_v3  ;;  %v583_v5 = vand.u32 2147483647, %v1346_v22  ;;  %v797_v6 = vsub.f32 0.0, %v581_v3 }
 0x1b1   : > { %v577_v7 = vand.u32 2147483647, %v1349_v29  ;;  %v553_v28 = vpop.f32.mrf.mxu2 }
 0x1b2   : > { %v597_v8 = vadd.f32 1.0, %v589_v4  ;;  %v591_v9 = vmul.f32 0.3275911, %v583_v5  ;;  %v799_v11 = vsub.f32 0.0, %v583_v5  ;;  %v805_v12 = vmul.f32 %v797_v6, %v581_v3 }
 0x1b3   : > { %v585_v10 = vmul.f32 0.3275911, %v577_v7  ;;  %v1358_v16 = vadd.f32 %v1336_v56, %v553_v28  ;;  %v793_v20 = vsub.f32 0.0, %v577_v7  ;;  %v558_v21 = vpop.f32.mrf.mxu3  ;;  %v543_v53 = vpop.f32.mrf.mxu0 }
 0x1b4   : > { %1070 = vrcp.f32 %v597_v8  ;;  %v1353_v13 = vadd.f32 1.0, %v591_v9  ;;  %v670_v17 = vand.u32 2147483647, %v597_v8  ;;  %v672_v18 = vand.u32 2147483648, %v597_v8  ;;  %v546_v6 = vpop.f32.mrf.mxu1 }
 0x1b5   : > { %v1355_v14 = vadd.f32 1.0, %v585_v10  ;;  %v807_v19 = vmul.f32 %v799_v11, %v583_v5  ;;  %v817_v15 = vmul.f32 1.442695, %v805_v12  ;;  %vm666_vm0 = vweird.f32 %v597_v8 }
 0x1b6   : > { %1072 = vrcp.f32 %v1353_v13  ;;  %v702_v25 = vand.u32 2147483648, %v1353_v13  ;;  %v1368_v26 = vmul.f32 0.70710677, %v1358_v16  ;;  %vm1370_vm11 = vcmp.eq.f32.partialorder %v670_v17, 8.507059e+37 }
 0x1b7   : > { %1074 = vrcp.f32 %v1355_v14  ;;  %v700_v31 = vand.u32 2147483647, %v1353_v13  ;;  %v1376_v41 = vadd.f32 %v1336_v56, %v558_v21  ;;  %v673_v32 = vor.u32 1.1754944e-38, %v672_v18 }
 0x1b8   : > { %v821_v33 = vmul.f32 1.442695, %v807_v19  ;;  %v801_v35 = vmul.f32 %v793_v20, %v577_v7  ;;  %v582_v34 = vand.u32 2147483647, %v1368_v26  ;;  %1076 = vpow2.f32 %v817_v15 }
 0x1b9   : > { %vm696_vm12 = vweird.f32 %v1353_v13  ;;  %v1381_v38 = vmul.f32 0.70710677, %v1376_v41  ;;  %v703_v43 = vor.u32 1.1754944e-38, %v702_v25  ;;  %vm606_vm13 = vweird.f32 %v1355_v14 }
 0x1ba   : > { %v1071_v23 = vpop.eup %1070  ;;  %v610_v40 = vand.u32 2147483647, %v1355_v14  ;;  %v590_v45 = vmul.f32 0.3275911, %v582_v34  ;;  %vm1386_vm15 = vcmp.eq.f32.partialorder %v700_v31, 8.507059e+37  ;;  %1078 = vpow2.f32 %v821_v33 }
 0x1bb   : > { %v662_v27 = vmul.f32 %v1071_v23, %v597_v8  ;;  %vm667_vm14 = vweird.f32 %v1071_v23  ;;  %v1391_v44 = vand.u32 2147483647, %v1381_v38  ;;  %v612_v51 = vand.u32 2147483648, %v1355_v14 }
 0x1bc   : > { %v1073_v39 = vpop.eup %1072  ;;  %v1395_v52 = vadd.f32 1.0, %v590_v45  ;;  %v798_v55 = vsub.f32 0.0, %v582_v34  ;;  %vm668_vm1 = vmor %vm666_vm0, %vm667_vm14  ;;  %vm1399_vm2 = vcmp.eq.f32.partialorder %v610_v40, 8.507059e+37  ;;  %v1403_v61 = vmul.f32 1.442695, %v801_v35 }
 0x1bd   : > { %v663_v36 = vsub.f32 1.0, %v662_v27  ;;  %v1075_v46 = vpop.eup %1074  ;;  %v692_v48 = vmul.f32 %v1073_v39, %v1353_v13  ;;  %v592_v58 = vmul.f32 0.3275911, %v1391_v44  ;;  %vm697_vm3 = vweird.f32 %v1073_v39 }
 0x1be   : > { %v602_v50 = vmul.f32 %v1075_v46, %v1355_v14  ;;  %1080 = vrcp.f32 %v1395_v52  ;;  %v1406_v62 = vpop.eup %1076  ;;  %v1409_v2 = vadd.f32 %v1336_v56, %v543_v53  ;;  %vm607_vm4 = vweird.f32 %v1075_v46  ;;  %vm698_vm5 = vmor %vm696_vm12, %vm697_vm3 }
 0x1bf   : > { %v664_v47 = vmul.f32 %v1071_v23, %v663_v36  ;;  %v693_v54 = vsub.f32 1.0, %v692_v48  ;;  %v1415_v5 = vadd.f32 1.0, %v592_v58  ;;  %v613_v9 = vor.u32 1.1754944e-38, %v612_v51  ;;  %vm608_vm6 = vmor %vm606_vm13, %vm607_vm4 }
 0x1c0   : > { %v603_v59 = vsub.f32 1.0, %v602_v50  ;;  %v806_v10 = vmul.f32 %v798_v55, %v582_v34  ;;  %v1418_v28 = vpop.eup %1078  ;;  %v685_v12 = vand.u32 2147483647, %v1395_v52  ;;  %v687_v17 = vand.u32 2147483648, %v1395_v52 }
 0x1c1   : > { %v665_v37 = vadd.f32 %v1071_v23, %v664_v47  ;;  %v694_v0 = vmul.f32 %v1073_v39, %v693_v54  ;;  %1082 = vrcp.f32 %v1415_v5  ;;  %v1429_v20 = vmul.f32 0.70710677, %v1409_v2 }
 0x1c2   : > { %v604_v4 = vmul.f32 %v1075_v46, %v603_v59  ;;  %v1432_v21 = vadd.f32 %v1336_v56, %v546_v6  ;;  %vm681_vm7 = vweird.f32 %v1395_v52  ;;  %v800_v25 = vsub.f32 0.0, %v1391_v44 }
 0x1c3   : > { %v669_v57 = vsel %vm668_vm1, %v1071_v23, %v665_v37  ;;  %v695_v8 = vadd.f32 %v1073_v39, %v694_v0  ;;  %vm1448_vm8 = vcmp.eq.f32.partialorder %v685_v12, 8.507059e+37  ;;  %v688_v35 = vor.u32 1.1754944e-38, %v687_v17 }
 0x1c4   : > { %v1413_v3 = vsel %vm1370_vm11, %v673_v32, %v669_v57  ;;  %v605_v11 = vadd.f32 %v1075_v46, %v604_v4  ;;  %v1081_v13 = vpop.eup %1080  ;;  %v819_v34 = vmul.f32 1.442695, %v806_v10  ;;  %vm711_vm9 = vweird.f32 %v1415_v5 }
 0x1c5   : > { %v725_v7 = vmul.f32 1.0614054, %v1413_v3  ;;  %v699_v19 = vsel %vm698_vm5, %v1073_v39, %v695_v8  ;;  %v677_v31 = vmul.f32 %v1081_v13, %v1395_v52  ;;  %vm682_vm10 = vweird.f32 %v1081_v13 }
 0x1c6   : > { %v1436_v15 = vsel %vm1386_vm15, %v703_v43, %v699_v19  ;;  %v609_v23 = vsel %vm608_vm6, %v1075_v46, %v605_v11  ;;  %v715_v46 = vand.u32 2147483647, %v1415_v5  ;;  %v1455_v47 = vand.u32 2147483647, %v1429_v20  ;;  %vm683_vm0 = vmor %vm681_vm7, %vm682_vm10 }
 0x1c7   : > { %v733_v18 = vadd.f32 -1.4531521, %v725_v7  ;;  %v727_v14 = vmul.f32 1.0614054, %v1436_v15  ;;  %v1444_v30 = vsel %vm1399_vm2, %v613_v9, %v609_v23  ;;  %v678_v43 = vsub.f32 1.0, %v677_v31  ;;  %v1083_v40 = vpop.eup %1082 }
 0x1c8   : > { %v721_v32 = vmul.f32 1.0614054, %v1444_v30  ;;  %v707_v51 = vmul.f32 %v1083_v40, %v1415_v5  ;;  %v717_v37 = vand.u32 2147483648, %v1415_v5  ;;  %v808_v54 = vmul.f32 %v800_v25, %v1391_v44 }
 0x1c9   : > { %v741_v27 = vmul.f32 %v733_v18, %v1413_v3  ;;  %v735_v39 = vadd.f32 -1.4531521, %v727_v14  ;;  %v679_v50 = vmul.f32 %v1081_v13, %v678_v43  ;;  %v586_v55 = vmul.f32 0.3275911, %v1455_v47 }
 0x1ca   : > { %v729_v45 = vadd.f32 -1.4531521, %v721_v32  ;;  %v708_v57 = vsub.f32 1.0, %v707_v51  ;;  %vm712_vm11 = vweird.f32 %v1083_v40  ;;  %vm1467_vm12 = vcmp.eq.f32.partialorder %v715_v46, 8.507059e+37 }
 0x1cb   : > { %v749_v36 = vadd.f32 1.4214138, %v741_v27  ;;  %v743_v49 = vmul.f32 %v735_v39, %v1436_v15  ;;  %v680_v60 = vadd.f32 %v1081_v13, %v679_v50  ;;  %v1471_v6 = vadd.f32 1.0, %v586_v55  ;;  %vm713_vm14 = vmor %vm711_vm9, %vm712_vm11 }
 0x1cc   : > { %v737_v53 = vmul.f32 %v729_v45, %v1444_v30  ;;  %v709_v9 = vmul.f32 %v1083_v40, %v708_v57  ;;  %v718_v52 = vor.u32 1.1754944e-38, %v717_v37  ;;  %vm845_vm13 = vcmp.lt.f32.partialorder %v1339_v1, 0.0 }
 0x1cd   : > { %v757_v48 = vmul.f32 %v749_v36, %v1413_v3  ;;  %v751_v59 = vadd.f32 1.4214138, %v743_v49  ;;  %v684_v8 = vsel %vm683_vm0, %v1081_v13, %v680_v60  ;;  %1084 = vrcp.f32 %v1471_v6 }
 0x1ce   : > { %v745_v0 = vadd.f32 1.4214138, %v737_v53  ;;  %v1478_v11 = vsel %vm1448_vm8, %v688_v35, %v684_v8  ;;  %v710_v19 = vadd.f32 %v1083_v40, %v709_v9  ;;  %1086 = vpow2.f32 %v1403_v61 }
 0x1cf   : > { %v765_v58 = vadd.f32 -0.28449672, %v757_v48  ;;  %v759_v7 = vmul.f32 %v751_v59, %v1436_v15  ;;  %v726_v18 = vmul.f32 1.0614054, %v1478_v11  ;;  %v823_v13 = vmul.f32 1.442695, %v808_v54 }
 0x1d0   : > { %v753_v10 = vmul.f32 %v745_v0, %v1444_v30  ;;  %v1488_v25 = vmul.f32 0.70710677, %v1432_v21  ;;  %v714_v32 = vsel %vm713_vm14, %v1083_v40, %v710_v19  ;;  %v1493_v33 = vmul.f32 0.5, %v1343_v63 }
 0x1d1   : > { %v773_v44 = vmul.f32 %v765_v58, %v1413_v3  ;;  %v767_v17 = vadd.f32 -0.28449672, %v759_v7  ;;  %v734_v31 = vadd.f32 -1.4531521, %v726_v18  ;;  %1088 = vpow2.f32 %v819_v34 }
 0x1d2   : > { %v761_v23 = vadd.f32 -0.28449672, %v753_v10  ;;  %v1498_v61 = vsel %vm1467_vm12, %v718_v52, %v714_v32  ;;  %vm847_vm15 = vcmp.lt.f32.partialorder %v1346_v22, 0.0  ;;  %1090 = vpow2.f32 %v823_v13  ;;  %v548_v32 = vpop.f32.mrf.mxu1 }
 0x1d3   : > { %v781_v12 = vadd.f32 0.2548296, %v773_v44  ;;  %v775_v14 = vmul.f32 %v767_v17, %v1436_v15  ;;  %v742_v39 = vmul.f32 %v734_v31, %v1478_v11  ;;  %v1085_v43 = vpop.eup %1084  ;;  %v794_v63 = vsub.f32 0.0, %v1455_v47 }
 0x1d4   : > { %v769_v35 = vmul.f32 %v761_v23, %v1444_v30  ;;  %v1506_v34 = vand.u32 2147483647, %v1488_v25  ;;  %vm841_vm1 = vcmp.lt.f32.partialorder %v1349_v29, 0.0  ;;  %v1087_v49 = vpop.eup %1086  ;;  %v617_v51 = vmul.f32 %v1085_v43, %v1471_v6 }
 0x1d5   : > { %v789_v27 = vmul.f32 %v781_v12, %v1413_v3  ;;  %v783_v36 = vadd.f32 0.2548296, %v775_v14  ;;  %v728_v3 = vmul.f32 1.0614054, %v1498_v61  ;;  %v625_v53 = vand.u32 2147483647, %v1471_v6 }
 0x1d6   : > { %v777_v40 = vadd.f32 0.2548296, %v769_v35  ;;  %v627_v37 = vand.u32 2147483648, %v1471_v6  ;;  %v618_v57 = vsub.f32 1.0, %v617_v51  ;;  %vm622_vm2 = vweird.f32 %v1085_v43 }
 0x1d7   : > { %v829_v5 = vmul.f32 %v1406_v62, %v789_v27  ;;  %v791_v46 = vmul.f32 %v783_v36, %v1436_v15  ;;  %v750_v62 = vadd.f32 1.4214138, %v742_v39  ;;  %v736_v48 = vadd.f32 -1.4531521, %v728_v3  ;;  %v1089_v59 = vpop.eup %1088 }
 0x1d8   : > { %v785_v50 = vmul.f32 %v777_v40, %v1444_v30  ;;  %v587_v30 = vmul.f32 0.3275911, %v1506_v34  ;;  %v1091_v8 = vpop.eup %1090  ;;  %v619_v10 = vmul.f32 %v1085_v43, %v618_v57  ;;  %vm621_vm3 = vweird.f32 %v1471_v6 }
 0x1d9   : > { %v837_v45 = vsub.f32 1.0, %v829_v5  ;;  %v831_v55 = vmul.f32 %v1418_v28, %v791_v46  ;;  %v758_v58 = vmul.f32 %v750_v62, %v1478_v11  ;;  %v744_v15 = vmul.f32 %v736_v48, %v1498_v61  ;;  %vm623_vm4 = vmor %vm621_vm3, %vm622_vm2 }
 0x1da   : > { %v825_v60 = vmul.f32 %v1087_v49, %v785_v50  ;;  %v1520_v52 = vadd.f32 1.0, %v587_v30  ;;  %v620_v23 = vadd.f32 %v1085_v43, %v619_v10  ;;  %v628_v31 = vor.u32 1.1754944e-38, %v627_v37 }
 0x1db   : > { %v853_v54 = vsub.f32 0.0, %v837_v45  ;;  %v839_v4 = vsub.f32 1.0, %v831_v55  ;;  %v766_v44 = vadd.f32 -0.28449672, %v758_v58  ;;  %v752_v7 = vadd.f32 1.4214138, %v744_v15 }
 0x1dc   : > { %v833_v28 = vsub.f32 1.0, %v825_v60  ;;  %1092 = vrcp.f32 %v1520_v52  ;;  %vm626_vm5 = vcmp.eq.f32.partialorder %v625_v53, 8.507059e+37  ;;  %v1545_v46 = vadd.f32 %v1336_v56, %v548_v32 }
 0x1dd   : > { %v861_v0 = vsel %vm845_vm13, %v853_v54, %v837_v45  ;;  %v855_v12 = vsub.f32 0.0, %v839_v4  ;;  %v774_v1 = vmul.f32 %v766_v44, %v1478_v11  ;;  %v760_v17 = vmul.f32 %v752_v7, %v1498_v61 }
 0x1de   : > { %v869_v9 = vadd.f32 1.0, %v861_v0  ;;  %v849_v19 = vsub.f32 0.0, %v833_v28  ;;  %v802_v45 = vmul.f32 %v794_v63, %v1455_v47  ;;  %vm846_vm6 = vcmp.lt.f32.partialorder %v1368_v26, 0.0 }
 0x1df   : > { %v863_v13 = vsel %vm847_vm15, %v855_v12, %v839_v4  ;;  %v782_v27 = vadd.f32 0.2548296, %v774_v1  ;;  %v768_v14 = vadd.f32 -0.28449672, %v760_v17  ;;  %v1555_v63 = vmul.f32 0.70710677, %v1545_v46 }
 0x1e0   : > { %v877_v18 = vmul.f32 %v869_v9, %v1361_v42  ;;  %v871_v35 = vadd.f32 1.0, %v863_v13  ;;  %v857_v6 = vsel %vm841_vm1, %v849_v19, %v833_v28  ;;  %v624_v42 = vsel %vm623_vm4, %v1085_v43, %v620_v23 }
 0x1e1   : > { %v865_v5 = vadd.f32 1.0, %v857_v6  ;;  %v790_v36 = vmul.f32 %v782_v27, %v1478_v11  ;;  %v776_v22 = vmul.f32 %v768_v14, %v1498_v61  ;;  %v629_v39 = vsel %vm626_vm5, %v628_v31, %v624_v42 }
 0x1e2   : > { %885 = vst [vmem:[%s1527_s14 + $0x20] sm:$0xff] %v877_v18  ;;  %v879_v3 = vmul.f32 %v871_v35, %v1364_v24  ;;  %v722_v40 = vmul.f32 1.0614054, %v629_v39  ;;  %v1093_v48 = vpop.eup %1092  ;;  %v566_v11 = vmul.f32 0.5, %v1358_v16  ;;  %v811_v56 = vmul.f32 1.442695, %v802_v45 }
 0x1e3   : > { %v873_v29 = vmul.f32 %v865_v5, %v1493_v33  ;;  %v830_v62 = vmul.f32 %v1089_v59, %v790_v36  ;;  %v784_v43 = vadd.f32 0.2548296, %v776_v22  ;;  %v632_v24 = vmul.f32 %v1093_v48, %v1520_v52 }
 0x1e4   : > { %887 = vst [vmem:[%s1527_s14 + $0x30] sm:$0xff] %v879_v3  ;;  %v730_v49 = vadd.f32 -1.4531521, %v722_v40  ;;  %v640_v54 = vand.u32 2147483647, %v1520_v52  ;;  %v568_v55 = vmul.f32 0.5, %v1376_v41  ;;  %vm637_vm7 = vweird.f32 %v1093_v48 }
 0x1e5   : > { %881 = vst [vmem:[%s1527_s14] sm:$0xff] %v873_v29  ;;  %v838_v50 = vsub.f32 1.0, %v830_v62  ;;  %v792_v51 = vmul.f32 %v784_v43, %v1498_v61  ;;  %v633_v37 = vsub.f32 1.0, %v632_v24  ;;  %v642_v58 = vand.u32 2147483648, %v1520_v52 }
 0x1e6   : > { %v738_v47 = vmul.f32 %v730_v49, %v629_v39  ;;  %v1561_v61 = vand.u32 2147483647, %v1555_v63  ;;  %vm848_vm8 = vcmp.lt.f32.partialorder %v1381_v38, 0.0  ;;  %1094 = vpow2.f32 %v811_v56 }
 0x1e7   : > { %v854_v33 = vsub.f32 0.0, %v838_v50  ;;  %v832_v53 = vmul.f32 %v1091_v8, %v792_v51  ;;  %v634_v59 = vmul.f32 %v1093_v48, %v633_v37  ;;  %vm636_vm9 = vweird.f32 %v1520_v52 }
 0x1e8   : > { %v746_v16 = vadd.f32 1.4214138, %v738_v47  ;;  %v588_v30 = vmul.f32 0.3275911, %v1561_v61  ;;  %vm638_vm10 = vmor %vm636_vm9, %vm637_vm7  ;;  %v643_v7 = vor.u32 1.1754944e-38, %v642_v58  ;;  %vm641_vm0 = vcmp.eq.f32.partialorder %v640_v54, 8.507059e+37 }
 0x1e9   : > { %v862_v15 = vsel %vm846_vm6, %v854_v33, %v838_v50  ;;  %v840_v26 = vsub.f32 1.0, %v832_v53  ;;  %v635_v41 = vadd.f32 %v1093_v48, %v634_v59  ;;  %v795_v38 = vsub.f32 0.0, %v1506_v34 }
 0x1ea   : > { %v870_v60 = vadd.f32 1.0, %v862_v15  ;;  %v754_v57 = vmul.f32 %v746_v16, %v629_v39  ;;  %v596_v8 = vadd.f32 1.0, %v588_v30  ;;  %vm842_vm11 = vcmp.lt.f32.partialorder %v1429_v20, 0.0 }
 0x1eb   : > { %v856_v0 = vsub.f32 0.0, %v840_v26  ;;  %v639_v28 = vsel %vm638_vm10, %v1093_v48, %v635_v41  ;;  %v803_v27 = vmul.f32 %v795_v38, %v1506_v34  ;;  %v562_v34 = vmul.f32 0.5, %v1409_v2 }
 0x1ec   : > { %v878_v4 = vmul.f32 %v870_v60, %v566_v11  ;;  %v762_v44 = vadd.f32 -0.28449672, %v754_v57  ;;  %v644_v1 = vsel %vm641_vm0, %v643_v7, %v639_v28  ;;  %1096 = vrcp.f32 %v596_v8  ;;  %v1095_v52 = vpop.eup %1094 }
 0x1ed   : > { %v864_v9 = vsel %vm848_vm8, %v856_v0, %v840_v26  ;;  %v723_v17 = vmul.f32 1.0614054, %v644_v1  ;;  %v813_v5 = vmul.f32 1.442695, %v803_v27  ;;  %v657_v40 = vand.u32 2147483648, %v596_v8 }
 0x1ee   : > { %886 = vst [vmem:[%s1527_s14 + $0x28] sm:$0xff] %v878_v4  ;;  %v872_v10 = vadd.f32 1.0, %v864_v9  ;;  %v770_v12 = vmul.f32 %v762_v44, %v629_v39  ;;  %v655_v62 = vand.u32 2147483647, %v596_v8  ;;  %vm651_vm13 = vweird.f32 %v596_v8 }
 0x1ef   : > { %v731_v23 = vadd.f32 -1.4531521, %v723_v17  ;;  %1098 = vpow2.f32 %v813_v5  ;;  %v658_v11 = vor.u32 1.1754944e-38, %v657_v40  ;;  %v796_v47 = vsub.f32 0.0, %v1561_v61 }
 0x1f0   : > { %v880_v18 = vmul.f32 %v872_v10, %v568_v55  ;;  %v778_v19 = vadd.f32 0.2548296, %v770_v12  ;;  %vm656_vm15 = vcmp.eq.f32.partialorder %v655_v62, 8.507059e+37  ;;  %vm843_vm1 = vcmp.lt.f32.partialorder %v1488_v25, 0.0 }
 0x1f1   : > { %v739_v14 = vmul.f32 %v731_v23, %v644_v1  ;;  %v804_v54 = vmul.f32 %v796_v47, %v1561_v61  ;;  %v563_v57 = vmul.f32 0.5, %v1432_v21  ;;  %vm844_vm2 = vcmp.lt.f32.partialorder %v1555_v63, 0.0 }
 0x1f2   : > { %888 = vst [vmem:[%s1527_s14 + $0x38] sm:$0xff] %v880_v18  ;;  %v786_v13 = vmul.f32 %v778_v19, %v629_v39  ;;  %v1097_v31 = vpop.eup %1096  ;;  %v564_v38 = vmul.f32 0.5, %v1545_v46 }
 0x1f3   : > { %v747_v35 = vadd.f32 1.4214138, %v739_v14  ;;  %v647_v6 = vmul.f32 %v1097_v31, %v596_v8  ;;  %vm652_vm12 = vweird.f32 %v1097_v31  ;;  %v815_v26 = vmul.f32 1.442695, %v804_v54 }
 0x1f4   : > { %v826_v32 = vmul.f32 %v1095_v52, %v786_v13  ;;  %vm653_vm14 = vmor %vm651_vm13, %vm652_vm12 }
 0x1f5   : > { %v755_v36 = vmul.f32 %v747_v35, %v644_v1  ;;  %v648_v22 = vsub.f32 1.0, %v647_v6  ;;  %v1099_v53 = vpop.eup %1098  ;;  %1100 = vpow2.f32 %v815_v26 }
 0x1f6   : > { %v834_v42 = vsub.f32 1.0, %v826_v32 }
 0x1f7   : > { %v763_v45 = vadd.f32 -0.28449672, %v755_v36  ;;  %v649_v29 = vmul.f32 %v1097_v31, %v648_v22 }
 0x1f8   : > { %v850_v3 = vsub.f32 0.0, %v834_v42 }
 0x1f9   : > { %v771_v48 = vmul.f32 %v763_v45, %v644_v1  ;;  %v650_v49 = vadd.f32 %v1097_v31, %v649_v29 }
 0x1fa   : > { %v858_v39 = vsel %vm842_vm11, %v850_v3, %v834_v42 }
 0x1fb   : > { %v866_v43 = vadd.f32 1.0, %v858_v39  ;;  %v779_v51 = vadd.f32 0.2548296, %v771_v48  ;;  %v654_v20 = vsel %vm653_vm14, %v1097_v31, %v650_v49  ;;  %v1101_v7 = vpop.eup %1100 }
 0x1fc   : > { %v659_v24 = vsel %vm656_vm15, %v658_v11, %v654_v20 }
 0x1fd   : > { %v874_v50 = vmul.f32 %v866_v43, %v562_v34  ;;  %v787_v56 = vmul.f32 %v779_v51, %v644_v1  ;;  %v724_v33 = vmul.f32 1.0614054, %v659_v24 }
 0x1ff   : > { %882 = vst [vmem:[%s1527_s14 + $0x8] sm:$0xff] %v874_v50  ;;  %v827_v2 = vmul.f32 %v1099_v53, %v787_v56  ;;  %v732_v37 = vadd.f32 -1.4531521, %v724_v33 }
 0x201   : > { %v835_v55 = vsub.f32 1.0, %v827_v2  ;;  %v740_v16 = vmul.f32 %v732_v37, %v659_v24 }
 0x203   : > { %v851_v58 = vsub.f32 0.0, %v835_v55  ;;  %v748_v15 = vadd.f32 1.4214138, %v740_v16 }
 0x205   : > { %v859_v59 = vsel %vm843_vm1, %v851_v58, %v835_v55  ;;  %v756_v60 = vmul.f32 %v748_v15, %v659_v24 }
 0x206   : > { %v867_v30 = vadd.f32 1.0, %v859_v59 }
 0x207   : > { %v764_v0 = vadd.f32 -0.28449672, %v756_v60 }
 0x208   : > { %v875_v41 = vmul.f32 %v867_v30, %v563_v57 }
 0x209   : > { %v772_v4 = vmul.f32 %v764_v0, %v659_v24 }
 0x20a   : > { %883 = vst [vmem:[%s1527_s14 + $0x10] sm:$0xff] %v875_v41 }
 0x20b   : > { %v780_v44 = vadd.f32 0.2548296, %v772_v4 }
 0x20d   : > { %v788_v61 = vmul.f32 %v780_v44, %v659_v24 }
 0x20f   : > { %v828_v8 = vmul.f32 %v1101_v7, %v788_v61 }
 0x211   : > { %v836_v9 = vsub.f32 1.0, %v828_v8 }
 0x213   : > { %v852_v28 = vsub.f32 0.0, %v836_v9 }
 0x215   : > { %v860_v25 = vsel %vm844_vm2, %v852_v28, %v836_v9 }
 0x216   : > { %v868_v10 = vadd.f32 1.0, %v860_v25 }
 0x218   : > { %v876_v21 = vmul.f32 %v868_v10, %v564_v38 }
 0x21a   : > { %884 = vst [vmem:[%s1527_s14 + $0x18] sm:$0xff] %v876_v21 }
 0x21b PF: > { %s15_s20 = sadd.s32 1, %s1124_s20   ;;  %s1612_s18 = smov %s1120_s19 }
 0x21c   : > { %p12_p5 = scmp.ge.s32.totalorder %s15_s20, 4   ;;  %s1613_s19 = smov %s1615_s21 }
 0x21e   :  { %14 = sbr.rel (!%p12_p5) target bundleno = 2 (0x2), region = 76 }

// kernel: alternating_encoder_block.16
= control target key start
LH: loop header
LB: loop body
LE: loop exit
PB: predicated region body
PF: predicated region fallthrough
CT: control target
= control target key end

     0   :  { %s1810_s12 = smov 0   ;;  %s1812_s13 = smov 0   ;;  %s2359_s0 = inlined_call_operand.vmem [shape: f32[2,2,4,2,4,96], index: 0, kind: input, shape index: {}]   ;;  %s2360_s1 = inlined_call_operand.vmem [shape: f32[16,16], index: 1, kind: input, shape index: {}]   ;;  %s2361_s2 = inlined_call_operand.vmem [shape: f32[16,16], index: 2, kind: input, shape index: {}]   ;;  %s2362_s3 = inlined_call_operand.vmem [shape: f32[2,2,4,2,4,32], index: 3, kind: output, shape index: {}]  }
   0x1   :  { %s1814_s14 = smov 0   ;;  %s1816_s15 = smov 0  }
   0x2   :  { %s1818_s16 = smov 0   ;;  %s1820_s17 = smov 0  }
   0x3   :  { %s1822_s18 = smov 0  }
   0x4 LB: > { %s22_s19 = sadd.s32 1, %s1766_s16  ;;  %s25_s20 = sadd.s32 1, %s1770_s17  ;;  %s1774_s18 = sphi %s1822_s18, %s13_s18   ;;  %s1770_s17 = sphi %s1820_s17, %s2369_s17   ;;  %s1766_s16 = sphi %s1818_s16, %s2368_s16   ;;  %s1762_s15 = sphi %s1816_s15, %s2367_s15   ;;  %s1758_s14 = sphi %s1814_s14, %s2366_s14   ;;  %s1754_s13 = sphi %s1812_s13, %s2365_s13   ;;  %s1750_s12 = sphi %s1810_s12, %s2364_s12  }
   0x5   : > { %p23_p0 = scmp.ge.s32.totalorder %s22_s19, 2  ;;  %s1549_s21 = sadd.s32 4294967295, %s1774_s18  }
   0x6   : > { %p41_p1 = scmp.ne.s32.totalorder %s1754_s13, %s1750_s12  ;;  %p42_p2 = scmp.eq.s32.totalorder %s1774_s18, 0 }
   0x7   : > { %s2371_s19 = smov (%p23_p0, %s22_s19), 0  ;;  %s2373_s20 = smov (!%p23_p0, %s25_s20), %s1770_s17 }
   0x8   : > { %p27_p3 = scmp.ge.s32.totalorder %s2373_s20, 2  ;;  %p115_p4 = scmp.eq.s32.totalorder %s1549_s21, 3 }
   0x9   : > { %s30_s22 = ssub.s32 %s1766_s16, %s2371_s19  ;;  %p43_p5 = por %p42_p2, %p41_p1 }
   0xa   : > { %s2375_s20 = smov (%p27_p3, %s2373_s20), 0  ;;  %p1858_p6 = por %p115_p4, %p41_p1 }
   0xb   : > { %s29_s24 = ssub.s32 %s1770_s17, %s2375_s20  ;;  %s34_s26 = sadd.s32 1, %s1754_s13 }
   0xc   : > { %s31_s25 = sor.u32 %s30_s22, %s29_s24  ;;  %p1552_p8 = scmp.ge.s32.totalorder %s1774_s18, 4 }
   0xd   : > { %p32_p7 = scmp.eq.s32.totalorder %s31_s25, 0 }
   0xe   : > { %143 = sbr.rel (%p1552_p8) target bundleno = 33 (0x21), region = 24 }
   0xf   : > { %s1866_s27 = scalar_select %p32_p7, %s1754_s13, %s34_s26  }
  0x13   : > { %146 = sbr.rel (!%p43_p5) target bundleno = 33 (0x21), region = 28  ;;  %s148_s28 = sand.u32 (%p43_p5), 1, %s1754_s13  }
  0x14   : > { %s1554_s29 = sshll.u32 (%p43_p5), %s1770_s17, 4  ;;  %s1553_s30 = sshll.u32 (%p43_p5), %s148_s28, 5 }
  0x15   : > { %s152_s4 = sadd.s32 (%p43_p5), %s1766_s16, %s1554_s29  ;;  %s150_s9 = scalar_lea.vmem (%p43_p5), [#allocation2], %s1553_s30 }
  0x16   : > { %s1555_s5 = sshll.u32 (%p43_p5), %s152_s4, 2 }
  0x17   : > { %s154_s8 = scalar_lea.vmem (%p43_p5), %s2359_s0, %s1555_s5 }
  0x18   : > { %v171_v0 = vld [vmem:[%s154_s8] sm:$0xf]  ;;  %v173_v1 = vld [vmem:[%s154_s8 + $0x8] sm:$0xf]  ;;  %v175_v2 = vld [vmem:[%s154_s8 + $0x10] sm:$0xf] }
  0x19   : > { %172 = vst [vmem:[%s150_s9] sm:$0xf] %v171_v0  ;;  %v177_v3 = vld [vmem:[%s154_s8 + $0x18] sm:$0xf]  ;;  %v179_v4 = vld [vmem:[%s154_s8 + $0x20] sm:$0xf] }
  0x1a   : > { %174 = vst [vmem:[%s150_s9 + $0x4] sm:$0xf] %v173_v1  ;;  %v181_v5 = vld [vmem:[%s154_s8 + $0x28] sm:$0xf]  ;;  %v183_v6 = vld [vmem:[%s154_s8 + $0x30] sm:$0xf] }
  0x1b   : > { %176 = vst [vmem:[%s150_s9 + $0x8] sm:$0xf] %v175_v2  ;;  %v185_v7 = vld [vmem:[%s154_s8 + $0x38] sm:$0xf] }
  0x1c   : > { %178 = vst [vmem:[%s150_s9 + $0xc] sm:$0xf] %v177_v3 }
  0x1d   : > { %180 = vst [vmem:[%s150_s9 + $0x10] sm:$0xf] %v179_v4 }
  0x1e   : > { %182 = vst [vmem:[%s150_s9 + $0x14] sm:$0xf] %v181_v5 }
  0x1f   : > { %184 = vst [vmem:[%s150_s9 + $0x18] sm:$0xf] %v183_v6 }
  0x20   : > { %186 = vst [vmem:[%s150_s9 + $0x1c] sm:$0xf] %v185_v7 }
  0x21 PF: > { %p1556_p9 = scmp.ge.s32.totalorder %s1774_s18, 1  ;;  %p225_p10 = scmp.lt.s32.totalorder %s1774_s18, 5 }
  0x23   : > { %p226_p11 = pnand %p1556_p9, %p225_p10 }
  0x24   : > { %s232_s10 = sand.u32 (!%p226_p11), 1, %s1750_s12   ;;  %s1776_s12 = smov (!%p226_p11), 96  }
  0x25   : > { %229 = sbr.rel (%p226_p11) target bundleno = 1366 (0x556), region = 69  ;;  %s1878_s11 = sshll.u32 (!%p226_p11), %s232_s10, 5 }
  0x26   : > { %s234_s21 = scalar_lea.vmem (!%p226_p11), [#allocation2], %s1878_s11  ;;  %p269_p12 = scmp.eq.s32.totalorder (!%p226_p11), %s1758_s14, 1 }
  0x27   : > { %s1777_s22 = smov (!%p226_p11), 64   ;;  %s1778_s24 = smov (!%p226_p11), 88  }
  0x28   : > { %s1779_s8 = smov (!%p226_p11), 120   ;;  %s1780_s9 = smov (!%p226_p11), 80  }
  0x29   : > { %s1781_s10 = smov (!%p226_p11), 112   ;;  %s1787_s26 = smov (!%p226_p11), 8  }
  0x2a   : > { %v1881_v8 = vld [vmem:[%s234_s21] sm:$0xf]  ;;  %v1883_v9 = vld [vmem:[%s234_s21 + $0x4] sm:$0xf]  ;;  %v1885_v10 = vld [vmem:[%s234_s21 + $0x8] sm:$0xf] }
  0x2b   : > { %v1887_v11 = vld [vmem:[%s234_s21 + $0xc] sm:$0xf]  ;;  %289 = vst [vmem:[#allocation1] ss:$2 sm:$0xff] %v1881_v8  ;;  %v1891_v12 = vld [vmem:[%s234_s21 + $0x10] sm:$0xf] }
  0x2c   : > { %291 = vst [vmem:[#allocation1 + $0x1] ss:$2 sm:$0xff] %v1883_v9  ;;  %v1894_v13 = vld [vmem:[%s234_s21 + $0x14] sm:$0xf]  ;;  %v1897_v14 = vld [vmem:[%s234_s21 + $0x18] sm:$0xf] }
  0x2d   : > { %293 = vst [vmem:[#allocation1 + $0x10] ss:$2 sm:$0xff] %v1885_v10  ;;  %v1899_v15 = vld [vmem:[%s234_s21 + $0x1c] sm:$0xf]  ;;  %vm382_vm0 = vcmask 64512   ;;  %vm435_vm1 = vcmask 130048  }
  0x2e   : > { %295 = vst [vmem:[#allocation1 + $0x11] ss:$2 sm:$0xff] %v1887_v11  ;;  %s1651_s25 = scalar_select %p269_p12, 255, 0  ;;  %vm1371_vm2 = vcmask 195584   ;;  %vm1388_vm3 = vcmask 257024  }
  0x2f   : > { %299 = vst [vmem:[#allocation1 + $0x20] ss:$2 sm:$0xff] %v1891_v12  ;;  %s1782_s21 = smov 72   ;;  %s1788_s28 = smov 16  }
  0x30   : > { %301 = vst [vmem:[#allocation1 + $0x21] ss:$2 sm:$0xff] %v1894_v13  ;;  %s1789_s29 = smov 24   ;;  %s2296_s30 = scalar_lea.vmem [#allocation3], %s1878_s11 }
  0x31   : > { %303 = vst [vmem:[#allocation1 + $0x30] ss:$2 sm:$0xff] %v1897_v14  ;;  %s1576_s11 = sshll.u32 (%p1858_p6), %s1762_s15, 4 }
  0x32   : > { %305 = vst [vmem:[#allocation1 + $0x31] ss:$2 sm:$0xff] %v1899_v15  ;;  %s1405_s4 = sadd.s32 (%p1858_p6), %s1758_s14, %s1576_s11 }
  0x33   : > { %v1905_v16 = vld.sshfl [vmem:[#allocation1] sm:$0xff pattern:$0x75316420]  ;;  %s1577_s5 = sshll.u32 (%p1858_p6), %s1405_s4, 2 }
  0x34   : > { %316 = vst [vmem:[#allocation1] ss:$2 sm:$0xff] %v1881_v8  ;;  %v312_v48 = vpack.c.bf16 %v1905_v16, %v1905_v16  ;;  %s1407_s23 = scalar_lea.vmem (%p1858_p6), %s2362_s3, %s1577_s5 }
  0x35   : > { %v1908_v17 = vld.sshfl [vmem:[#allocation1 + $0x10] sm:$0xff pattern:$0x75316420]  ;;  %318 = vst [vmem:[#allocation1 + $0x1] ss:$2 sm:$0xff] %v1883_v9 }
  0x36   : > { %320 = vst [vmem:[#allocation1 + $0x10] ss:$2 sm:$0xff] %v1885_v10  ;;  %v313_v49 = vpack.c.bf16 %v1908_v17, %v1908_v17  ;;  %v372_v54 = vunpack.c.l.b16 %v312_v48 }
  0x37   : > { %322 = vst [vmem:[#allocation1 + $0x11] ss:$2 sm:$0xff] %v1887_v11  ;;  %v1913_v18 = vld.sshfl [vmem:[#allocation1 + $0x20] sm:$0xff pattern:$0x75316420] }
  0x38   : > { %326 = vst [vmem:[#allocation1 + $0x20] ss:$2 sm:$0xff] %v1891_v12  ;;  %v373_v55 = vunpack.c.l.b16 %v313_v49  ;;  %v314_v57 = vpack.c.bf16 %v1913_v18, %v1913_v18 }
  0x39   : > { %v1916_v19 = vld.sshfl [vmem:[#allocation1 + $0x30] sm:$0xff pattern:$0x75316420]  ;;  %328 = vst [vmem:[#allocation1 + $0x21] ss:$2 sm:$0xff] %v1894_v13 }
  0x3a   : > { %330 = vst [vmem:[#allocation1 + $0x30] ss:$2 sm:$0xff] %v1897_v14  ;;  %v374_v56 = vpack.c.b16 %v373_v55, %v372_v54  ;;  %v315_v58 = vpack.c.bf16 %v1916_v19, %v1916_v19  ;;  %v405_v63 = vunpack.c.l.b16 %v314_v57  ;;  %v1969_v19 = vld [vmem:[%s2361_s2] sm:%s1651_s25] }
  0x3b   : > { %332 = vst [vmem:[#allocation1 + $0x31] ss:$2 sm:$0xff] %v1899_v15 }
  0x3c   : > { %v323_v20 = vld.sshfl [vmem:[#allocation1] sm:$0xff pattern:$0x75316420]  ;;  %v406_v0 = vunpack.c.l.b16 %v315_v58 }
  0x3d   : > { %v339_v21 = vpack.c.bf16 %v323_v20, %v323_v20  ;;  %343 = vst [vmem:[#allocation1] ss:$2 sm:$0xff] %v1881_v8 }
  0x3e   : > { %v324_v22 = vld.sshfl [vmem:[#allocation1 + $0x10] sm:$0xff pattern:$0x75316420]  ;;  %345 = vst [vmem:[#allocation1 + $0x1] ss:$2 sm:$0xff] %v1883_v9  ;;  %v407_v5 = vpack.c.b16 %v406_v0, %v405_v63 }
  0x3f   : > { %v340_v23 = vpack.c.bf16 %v324_v22, %v324_v22  ;;  %v377_v24 = vunpack.c.l.b16 %v339_v21  ;;  %347 = vst [vmem:[#allocation1 + $0x10] ss:$2 sm:$0xff] %v1885_v10  ;;  %v263_v22 = vld [vmem:[%s2360_s1] sm:$0xff] }
  0x40   : > { %349 = vst [vmem:[#allocation1 + $0x11] ss:$2 sm:$0xff] %v1887_v11  ;;  %v333_v25 = vld.sshfl [vmem:[#allocation1 + $0x20] sm:$0xff pattern:$0x75316420] }
  0x41   : > { %v378_v26 = vunpack.c.l.b16 %v340_v23  ;;  %v341_v27 = vpack.c.bf16 %v333_v25, %v333_v25  ;;  %353 = vst [vmem:[#allocation1 + $0x20] ss:$2 sm:$0xff] %v1891_v12 }
  0x42   : > { %v334_v28 = vld.sshfl [vmem:[#allocation1 + $0x30] sm:$0xff pattern:$0x75316420]  ;;  %355 = vst [vmem:[#allocation1 + $0x21] ss:$2 sm:$0xff] %v1894_v13 }
  0x43   : > { %v379_v29 = vpack.c.b16 %v378_v26, %v377_v24  ;;  %v342_v30 = vpack.c.bf16 %v334_v28, %v334_v28  ;;  %357 = vst [vmem:[#allocation1 + $0x30] ss:$2 sm:$0xff] %v1897_v14  ;;  %v410_v31 = vunpack.c.l.b16 %v341_v27  ;;  %v1977_v24 = vadd.f32 %v1969_v19, %v263_v22  ;;  %v1986_v27 = vld [vmem:[%s2361_s2 + $0x8] sm:%s1651_s25]  ;;  %s1786_s25 = smov 40  }
  0x44   : > { %359 = vst [vmem:[#allocation1 + $0x31] ss:$2 sm:$0xff] %v1899_v15 }
  0x45   : > { %380 = vrot.lane.b32.xlu0 %v379_v29, %s1776_s12  ;;  %v411_v32 = vunpack.c.l.b16 %v342_v30  ;;  %v350_v38 = vld.sshfl [vmem:[#allocation1] sm:$0xff pattern:$0x75316420] }
  0x46   : > { %v366_v40 = vpack.c.bf16 %v350_v38, %v350_v38  ;;  %544 = vst [vmem:[#allocation1] ss:$2 sm:$0xff] %v1881_v8 }
  0x47   : > { %v412_v33 = vpack.c.b16 %v411_v32, %v410_v31  ;;  %v351_v39 = vld.sshfl [vmem:[#allocation1 + $0x10] sm:$0xff pattern:$0x75316420]  ;;  %546 = vst [vmem:[#allocation1 + $0x1] ss:$2 sm:$0xff] %v1883_v9  ;;  %v264_v32 = vld [vmem:[%s2360_s1 + $0x8] sm:$0xff] }
  0x48   : > { %v367_v43 = vpack.c.bf16 %v351_v39, %v351_v39  ;;  %v491_v44 = vunpack.c.l.b16 %v366_v40  ;;  %548 = vst [vmem:[#allocation1 + $0x10] ss:$2 sm:$0xff] %v1885_v10 }
  0x49   : > { %v360_v34 = vld.sshfl [vmem:[#allocation1 + $0x20] sm:$0xff pattern:$0x75316420]  ;;  %550 = vst [vmem:[#allocation1 + $0x11] ss:$2 sm:$0xff] %v1887_v11 }
  0x4a   : > { %v368_v36 = vpack.c.bf16 %v360_v34, %v360_v34  ;;  %554 = vst [vmem:[#allocation1 + $0x20] ss:$2 sm:$0xff] %v1891_v12  ;;  %v492_v46 = vunpack.c.l.b16 %v367_v43 }
  0x4b   : > { %v361_v35 = vld.sshfl [vmem:[#allocation1 + $0x30] sm:$0xff pattern:$0x75316420]  ;;  %556 = vst [vmem:[#allocation1 + $0x21] ss:$2 sm:$0xff] %v1894_v13 }
  0x4c   : > { %v369_v37 = vpack.c.bf16 %v361_v35, %v361_v35  ;;  %v521_v41 = vunpack.c.l.b16 %v368_v36  ;;  %558 = vst [vmem:[#allocation1 + $0x30] ss:$2 sm:$0xff] %v1897_v14  ;;  %v493_v47 = vpack.c.b16 %v492_v46, %v491_v44  ;;  %v2000_v35 = vadd.f32 %v1986_v27, %v264_v32 }
  0x4d   : > { %413 = vrot.lane.b32.xlu0 %v412_v33, %s1776_s12  ;;  %560 = vst [vmem:[#allocation1 + $0x31] ss:$2 sm:$0xff] %v1899_v15  ;;  %s1783_s12 = smov 104  }
  0x4e   : > { %v522_v42 = vunpack.c.l.b16 %v369_v37  ;;  %494 = vrot.lane.b32.xlu2 %v493_v47, %s1777_s22  ;;  %v1942_v50 = vld.sshfl [vmem:[#allocation1] sm:$0xff pattern:$0x75316420] }
  0x4f   : > { %571 = vst [vmem:[#allocation1] ss:$2 sm:$0xff] %v1881_v8 }
  0x50   : > { %v523_v45 = vpack.c.b16 %v522_v42, %v521_v41  ;;  %v1945_v52 = vld.sshfl [vmem:[#allocation1 + $0x10] sm:$0xff pattern:$0x75316420]  ;;  %573 = vst [vmem:[#allocation1 + $0x1] ss:$2 sm:$0xff] %v1883_v9  ;;  %v567_v41 = vpack.c.bf16 %v1942_v50, %v1942_v50 }
  0x51   : > { %575 = vst [vmem:[#allocation1 + $0x10] ss:$2 sm:$0xff] %v1885_v10  ;;  %v568_v42 = vpack.c.bf16 %v1945_v52, %v1945_v52 }
  0x52   : > { %524 = vrot.lane.b32.xlu1 %v523_v45, %s1777_s22  ;;  %577 = vst [vmem:[#allocation1 + $0x11] ss:$2 sm:$0xff] %v1887_v11  ;;  %v1979_v25 = vld.sshfl [vmem:[#allocation1 + $0x20] sm:$0xff pattern:$0x75316420]  ;;  %v627_v43 = vunpack.c.l.b16 %v567_v41  ;;  %s1784_s22 = smov 56  }
  0x53   : > { %581 = vst [vmem:[#allocation1 + $0x20] ss:$2 sm:$0xff] %v1891_v12  ;;  %v628_v44 = vunpack.c.l.b16 %v568_v42 }
  0x54   : > { %v1981_v26 = vld.sshfl [vmem:[#allocation1 + $0x30] sm:$0xff pattern:$0x75316420]  ;;  %583 = vst [vmem:[#allocation1 + $0x21] ss:$2 sm:$0xff] %v1894_v13 }
  0x55   : > { %585 = vst [vmem:[#allocation1 + $0x30] ss:$2 sm:$0xff] %v1897_v14  ;;  %v629_v47 = vpack.c.b16 %v628_v44, %v627_v43 }
  0x56   : > { %587 = vst [vmem:[#allocation1 + $0x31] ss:$2 sm:$0xff] %v1899_v15 }
  0x57   : > { %v578_v59 = vld.sshfl [vmem:[#allocation1] sm:$0xff pattern:$0x75316420] }
  0x58   : > { %v594_v61 = vpack.c.bf16 %v578_v59, %v578_v59  ;;  %598 = vst [vmem:[#allocation1] ss:$2 sm:$0xff] %v1881_v8 }
  0x59   : > { %v579_v1 = vld.sshfl [vmem:[#allocation1 + $0x10] sm:$0xff pattern:$0x75316420]  ;;  %600 = vst [vmem:[#allocation1 + $0x1] ss:$2 sm:$0xff] %v1883_v9 }
  0x5a   : > { %v595_v2 = vpack.c.bf16 %v579_v1, %v579_v1  ;;  %602 = vst [vmem:[#allocation1 + $0x10] ss:$2 sm:$0xff] %v1885_v10  ;;  %v634_v3 = vunpack.c.l.b16 %v594_v61 }
  0x5b   : > { %604 = vst [vmem:[#allocation1 + $0x11] ss:$2 sm:$0xff] %v1887_v11  ;;  %v588_v36 = vld.sshfl [vmem:[#allocation1 + $0x20] sm:$0xff pattern:$0x75316420] }
  0x5c   : > { %v635_v4 = vunpack.c.l.b16 %v595_v2  ;;  %608 = vst [vmem:[#allocation1 + $0x20] ss:$2 sm:$0xff] %v1891_v12  ;;  %v596_v45 = vpack.c.bf16 %v588_v36, %v588_v36 }
  0x5d   : > { %v589_v38 = vld.sshfl [vmem:[#allocation1 + $0x30] sm:$0xff pattern:$0x75316420]  ;;  %610 = vst [vmem:[#allocation1 + $0x21] ss:$2 sm:$0xff] %v1894_v13 }
  0x5e   : > { %v636_v6 = vpack.c.b16 %v635_v4, %v634_v3  ;;  %612 = vst [vmem:[#allocation1 + $0x30] ss:$2 sm:$0xff] %v1897_v14  ;;  %v597_v46 = vpack.c.bf16 %v589_v38, %v589_v38  ;;  %v668_v48 = vunpack.c.l.b16 %v596_v45 }
  0x5f   : > { %614 = vst [vmem:[#allocation1 + $0x31] ss:$2 sm:$0xff] %v1899_v15 }
  0x60   : > { %637 = vrot.lane.b32.xlu2 %v636_v6, %s1778_s24  ;;  %v669_v49 = vunpack.c.l.b16 %v597_v46 }
  0x62   : > { %v2024_v57 = vld.sshfl [vmem:[#allocation1 + $0x10] sm:$0xff pattern:$0x75316420] }
  0x63   : > { %805 = vst [vmem:[#allocation1 + $0x10] ss:$2 sm:$0xff] %v1885_v10 }
  0x64   : > { %v2017_v52 = vld.sshfl [vmem:[#allocation1 + $0x20] sm:$0xff pattern:$0x75316420]  ;;  %807 = vst [vmem:[#allocation1 + $0x11] ss:$2 sm:$0xff] %v1887_v11 }
  0x65   : > { %811 = vst [vmem:[#allocation1 + $0x20] ss:$2 sm:$0xff] %v1891_v12 }
  0x66   : > { %v2019_v55 = vld.sshfl [vmem:[#allocation1 + $0x30] sm:$0xff pattern:$0x75316420]  ;;  %813 = vst [vmem:[#allocation1 + $0x21] ss:$2 sm:$0xff] %v1894_v13 }
  0x67   : > { %815 = vst [vmem:[#allocation1 + $0x30] ss:$2 sm:$0xff] %v1897_v14 }
  0x68   : > { %817 = vst [vmem:[#allocation1 + $0x31] ss:$2 sm:$0xff] %v1899_v15 }
  0x6f   : > { %v2037_v3 = vld.sshfl [vmem:[#allocation1 + $0x30] sm:$0xff pattern:$0x75316420] }
  0x70   : > { %842 = vst [vmem:[#allocation1 + $0x30] ss:$2 sm:$0xff] %v1897_v14 }
  0x71   : > { %844 = vst [vmem:[#allocation1 + $0x31] ss:$2 sm:$0xff] %v1899_v15 }
  0xa8   : > { %v495_v7 = vpop.permute.xlu2 %494 }
  0xa9   : > { %507 = vmatpush.bf16.msra.mxu2 %v495_v7 }
  0xb7   : > { %v381_v51 = vpop.permute.xlu0 %380 }
  0xb8   : > { %v387_v53 = vsel %vm382_vm0, %v381_v51, 0  ;;  %v670_v51 = vpack.c.b16 %v669_v49, %v668_v48 }
  0xb9   : > { %396 = vmatpush.bf16.xpose.msra.mxu0 %v387_v53  ;;  %v2014_v53 = vld.sshfl [vmem:[#allocation1] sm:$0xff pattern:$0x75316420] }
  0xba   : > { %v638_v17 = vpop.permute.xlu2 %637  ;;  %801 = vst [vmem:[#allocation1] ss:$2 sm:$0xff] %v1881_v8 }
  0xbb   : > { %v643_v18 = vsel %vm382_vm0, %v638_v17, 0  ;;  %803 = vst [vmem:[#allocation1 + $0x1] ss:$2 sm:$0xff] %v1883_v9 }
  0xbc   : > { %652 = vmatpush.bf16.xpose.msrb.mxu2 %v643_v18 }
  0xbf   : > { %v414_v60 = vpop.permute.xlu0 %413 }
  0xc0   : > { %1559 = vmatmul.msk.bf16.vlgmr.msra.gmra.mxu0 %vm382_vm0, %v374_v56  ;;  %v419_v62 = vsel %vm382_vm0, %v414_v60, 0 }
  0xc1   : > { %428 = vmatpush.bf16.xpose.msra.mxu1 %v419_v62  ;;  %v2030_v62 = vld.sshfl [vmem:[#allocation1 + $0x20] sm:$0xff pattern:$0x75316420] }
  0xc2   : > { %838 = vst [vmem:[#allocation1 + $0x20] ss:$2 sm:$0xff] %v1891_v12  ;;  %v2041_v4 = vld.sshfl [vmem:[#allocation1] sm:$0xff pattern:$0x75316420] }
  0xc3   : > { %840 = vst [vmem:[#allocation1 + $0x21] ss:$2 sm:$0xff] %v1894_v13 }
  0xc4   : > { %v525_v16 = vpop.permute.xlu1 %524  ;;  %828 = vst [vmem:[#allocation1] ss:$2 sm:$0xff] %v1881_v8 }
  0xc5   : > { %537 = vmatpush.bf16.msra.mxu3 %v525_v16  ;;  %830 = vst [vmem:[#allocation1 + $0x1] ss:$2 sm:$0xff] %v1883_v9 }
  0xc8   : > { %1560 = vmatmul.msk.bf16.vlgmr.msra.gmra.mxu1 %vm382_vm0, %v407_v5  ;;  %v2044_v5 = vld.sshfl [vmem:[#allocation1 + $0x10] sm:$0xff pattern:$0x75316420] }
  0xc9   : > { %832 = vst [vmem:[#allocation1 + $0x10] ss:$2 sm:$0xff] %v1885_v10  ;;  %v825_v48 = vpack.c.bf16 %v2044_v5, %v2044_v5 }
  0xca   : > { %834 = vst [vmem:[#allocation1 + $0x11] ss:$2 sm:$0xff] %v1887_v11  ;;  %v845_v18 = vld.sshfl [vmem:[#allocation1 + $0x20] sm:$0xff pattern:$0x75316420] }
  0xcb   : > { %865 = vst [vmem:[#allocation1 + $0x20] ss:$2 sm:$0xff] %v1891_v12 }
  0xcc   : > { %867 = vst [vmem:[#allocation1 + $0x21] ss:$2 sm:$0xff] %v1894_v13 }
  0xd3   : > { %v2084_v44 = vld.sshfl [vmem:[#allocation1 + $0x20] sm:$0xff pattern:$0x75316420] }
  0xd4   : > { %1068 = vst [vmem:[#allocation1 + $0x20] ss:$2 sm:$0xff] %v1891_v12 }
  0xd5   : > { %1070 = vst [vmem:[#allocation1 + $0x21] ss:$2 sm:$0xff] %v1894_v13 }
 0x13d   : > { %v398_v20 = vpop.f32.mrf.mxu0 }
 0x13e   : > { %v399_v21 = vadd.f32 %v1969_v19, %v398_v20 }
 0x140   : > { %v436_v23 = vsel %vm435_vm1, %v399_v21, -inf }
 0x141   : > { %437 = vmax.xlane.f32.xlu1 %v436_v23  ;;  %v569_v23 = vpack.c.bf16 %v1979_v25, %v1979_v25 }
 0x145   : > { %v400_v28 = vpop.f32.mrf.mxu0  ;;  %v430_v29 = vpop.f32.mrf.mxu1 }
 0x146   : > { %v401_v30 = vadd.f32 %v1986_v27, %v400_v28  ;;  %v431_v31 = vadd.f32 %v430_v29, %v1977_v24  ;;  %v570_v28 = vpack.c.bf16 %v1981_v26, %v1981_v26  ;;  %v846_v29 = vld.sshfl [vmem:[#allocation1 + $0x30] sm:$0xff pattern:$0x75316420] }
 0x147   : > { %869 = vst [vmem:[#allocation1 + $0x30] ss:$2 sm:$0xff] %v1897_v14 }
 0x148   : > { %v442_v33 = vsel %vm435_vm1, %v431_v31, -inf  ;;  %v439_v34 = vsel %vm435_vm1, %v401_v30, -inf  ;;  %871 = vst [vmem:[#allocation1 + $0x31] ss:$2 sm:$0xff] %v1899_v15  ;;  %v662_v32 = vunpack.c.l.b16 %v570_v28 }
 0x149   : > { %443 = vmax.xlane.f32.xlu2 %v442_v33  ;;  %440 = vmax.xlane.f32.xlu1 %v439_v34  ;;  %v836_v33 = vld.sshfl [vmem:[#allocation1 + $0x10] sm:$0xff pattern:$0x75316420] }
 0x14a   : > { %859 = vst [vmem:[#allocation1 + $0x10] ss:$2 sm:$0xff] %v1885_v10 }
 0x14b   : > { %861 = vst [vmem:[#allocation1 + $0x11] ss:$2 sm:$0xff] %v1887_v11 }
 0x14d   : > { %v432_v37 = vpop.f32.mrf.mxu1 }
 0x14e   : > { %v433_v39 = vadd.f32 %v432_v37, %v2000_v35 }
 0x14f   : > { %v2093_v49 = vld.sshfl [vmem:[#allocation1 + $0x30] sm:$0xff pattern:$0x75316420] }
 0x150   : > { %v445_v40 = vsel %vm435_vm1, %v433_v39, -inf  ;;  %1072 = vst [vmem:[#allocation1 + $0x30] ss:$2 sm:$0xff] %v1897_v14 }
 0x151   : > { %446 = vmax.xlane.f32.xlu2 %v445_v40  ;;  %v852_v40 = vpack.c.bf16 %v836_v33, %v836_v33  ;;  %1074 = vst [vmem:[#allocation1 + $0x31] ss:$2 sm:$0xff] %v1899_v15 }
 0x152   : > { %v2079_v41 = vld.sshfl [vmem:[#allocation1 + $0x10] sm:$0xff pattern:$0x75316420] }
 0x153   : > { %1062 = vst [vmem:[#allocation1 + $0x10] ss:$2 sm:$0xff] %v1885_v10  ;;  %v892_v43 = vunpack.c.l.b16 %v852_v40 }
 0x154   : > { %1064 = vst [vmem:[#allocation1 + $0x11] ss:$2 sm:$0xff] %v1887_v11 }
 0x162   : > { %630 = vrot.lane.b32.xlu1 %v629_v47, %s1779_s8  ;;  %v824_v47 = vpack.c.bf16 %v2041_v4, %v2041_v4  ;;  %v827_v4 = vpack.c.bf16 %v2037_v3, %v2037_v3  ;;  %v1076_v3 = vld.sshfl [vmem:[#allocation1 + $0x30] sm:$0xff pattern:$0x75316420] }
 0x163   : > { %v1084_v28 = vpack.c.bf16 %v1076_v3, %v1076_v3  ;;  %1099 = vst [vmem:[#allocation1 + $0x30] ss:$2 sm:$0xff] %v1897_v14 }
 0x164   : > { %1101 = vst [vmem:[#allocation1 + $0x31] ss:$2 sm:$0xff] %v1899_v15 }
 0x169   : > { %671 = vrot.lane.b32.xlu2 %v670_v51, %s1778_s24  ;;  %v853_v51 = vpack.c.bf16 %v845_v18, %v845_v18  ;;  %s1785_s24 = smov 48  }
 0x1b4   : > { %v438_v54 = vpop.xlane.xlu1 %437 }
 0x1b5   : > { %v448_v50 = vsub.f32 %v399_v21, %v438_v54  ;;  %v854_v54 = vpack.c.bf16 %v846_v29, %v846_v29 }
 0x1b7   : > { %v452_v56 = vmul.f32 1.442695, %v448_v50  ;;  %v1066_v50 = vld.sshfl [vmem:[#allocation1 + $0x10] sm:$0xff pattern:$0x75316420] }
 0x1b8   : > { %1089 = vst [vmem:[#allocation1 + $0x10] ss:$2 sm:$0xff] %v1885_v10 }
 0x1b9   : > { %1656 = vpow2.f32 %v452_v56  ;;  %1091 = vst [vmem:[#allocation1 + $0x11] ss:$2 sm:$0xff] %v1887_v11  ;;  %v884_v56 = vunpack.c.l.b16 %v824_v47 }
 0x1bc   : > { %v444_v58 = vpop.xlane.xlu2 %443  ;;  %v441_v59 = vpop.xlane.xlu1 %440 }
 0x1bd   : > { %v450_v60 = vsub.f32 %v431_v31, %v444_v58  ;;  %v449_v61 = vsub.f32 %v401_v30, %v441_v59  ;;  %v835_v30 = vld.sshfl [vmem:[#allocation1] sm:$0xff pattern:$0x75316420]  ;;  %v661_v31 = vunpack.c.l.b16 %v569_v23  ;;  %v885_v58 = vunpack.c.l.b16 %v825_v48 }
 0x1be   : > { %855 = vst [vmem:[#allocation1] ss:$2 sm:$0xff] %v1881_v8  ;;  %v925_v59 = vunpack.c.l.b16 %v853_v51 }
 0x1bf   : > { %v2032_v63 = vpop.eup %1656  ;;  %v456_v0 = vmul.f32 1.442695, %v450_v60  ;;  %v454_v1 = vmul.f32 1.442695, %v449_v61  ;;  %857 = vst [vmem:[#allocation1 + $0x1] ss:$2 sm:$0xff] %v1883_v9  ;;  %v663_v34 = vpack.c.b16 %v662_v32, %v661_v31  ;;  %v926_v60 = vunpack.c.l.b16 %v854_v54 }
 0x1c0   : > { %v460_v2 = vsel %vm435_vm1, %v2032_v63, 0.0  ;;  %v1075_v61 = vld.sshfl [vmem:[#allocation1 + $0x20] sm:$0xff pattern:$0x75316420]  ;;  %v1176_v31 = vunpack.c.l.b16 %v1084_v28  ;;  %v624_v28 = vpack.c.bf16 %v2019_v55, %v2019_v55 }
 0x1c1   : > { %1658 = vpow2.f32 %v456_v0  ;;  %461 = vadd.xlane.f32.xlu0 %v460_v2  ;;  %v886_v0 = vpack.c.b16 %v885_v58, %v884_v56  ;;  %1095 = vst [vmem:[#allocation1 + $0x20] ss:$2 sm:$0xff] %v1891_v12  ;;  %v826_v2 = vpack.c.bf16 %v2030_v62, %v2030_v62  ;;  %v927_v5 = vpack.c.b16 %v926_v60, %v925_v59 }
 0x1c2   : > { %1660 = vpow2.f32 %v454_v1  ;;  %1097 = vst [vmem:[#allocation1 + $0x21] ss:$2 sm:$0xff] %v1894_v13  ;;  %v1083_v23 = vpack.c.bf16 %v1075_v61, %v1075_v61 }
 0x1c3   : > { %v918_v62 = vunpack.c.l.b16 %v826_v2 }
 0x1c4   : > { %v447_v6 = vpop.xlane.xlu2 %446 }
 0x1c5   : > { %v451_v7 = vsub.f32 %v433_v39, %v447_v6  ;;  %v851_v39 = vpack.c.bf16 %v835_v30, %v835_v30  ;;  %v1175_v30 = vunpack.c.l.b16 %v1083_v23  ;;  %v623_v23 = vpack.c.bf16 %v2017_v52, %v2017_v52 }
 0x1c6   : > { %v2074_v37 = vld.sshfl [vmem:[#allocation1] sm:$0xff pattern:$0x75316420] }
 0x1c7   : > { %v2050_v16 = vpop.eup %1658  ;;  %v458_v17 = vmul.f32 1.442695, %v451_v7  ;;  %1058 = vst [vmem:[#allocation1] ss:$2 sm:$0xff] %v1881_v8  ;;  %v891_v42 = vunpack.c.l.b16 %v851_v39 }
 0x1c8   : > { %v2052_v20 = vpop.eup %1660  ;;  %v466_v21 = vsel %vm435_vm1, %v2050_v16, 0.0  ;;  %1060 = vst [vmem:[#allocation1 + $0x1] ss:$2 sm:$0xff] %v1883_v9  ;;  %v1093_v7 = vld.sshfl [vmem:[#allocation1 + $0x10] sm:$0xff pattern:$0x75316420] }
 0x1c9   : > { %1662 = vpow2.f32 %v458_v17  ;;  %467 = vadd.xlane.f32.xlu2 %v466_v21  ;;  %v463_v22 = vsel %vm435_vm1, %v2052_v20, 0.0  ;;  %v893_v46 = vpack.c.b16 %v892_v43, %v891_v42  ;;  %v1109_v17 = vpack.c.bf16 %v1093_v7, %v1093_v7  ;;  %1116 = vst [vmem:[#allocation1 + $0x10] ss:$2 sm:$0xff] %v1885_v10 }
 0x1ca   : > { %464 = vadd.xlane.f32.xlu1 %v463_v22  ;;  %1118 = vst [vmem:[#allocation1 + $0x11] ss:$2 sm:$0xff] %v1887_v11  ;;  %v919_v21 = vunpack.c.l.b16 %v827_v4  ;;  %v1082_v11 = vpack.c.bf16 %v1066_v50, %v1066_v50 }
 0x1cb   : > { %v1149_v22 = vunpack.c.l.b16 %v1109_v17 }
 0x1cc   : > { %v672_v36 = vpop.permute.xlu2 %671  ;;  %v920_v29 = vpack.c.b16 %v919_v21, %v918_v62 }
 0x1cd   : > { %v677_v38 = vsel %vm382_vm0, %v672_v36, 0  ;;  %v1103_v36 = vld.sshfl [vmem:[#allocation1 + $0x30] sm:$0xff pattern:$0x75316420] }
 0x1ce   : > { %686 = vmatpush.bf16.xpose.msrb.mxu3 %v677_v38  ;;  %v1111_v38 = vpack.c.bf16 %v1103_v36, %v1103_v36  ;;  %1126 = vst [vmem:[#allocation1 + $0x30] ss:$2 sm:$0xff] %v1897_v14 }
 0x1cf   : > { %v2069_v25 = vpop.eup %1662  ;;  %v1065_v45 = vld.sshfl [vmem:[#allocation1] sm:$0xff pattern:$0x75316420]  ;;  %1128 = vst [vmem:[#allocation1 + $0x31] ss:$2 sm:$0xff] %v1899_v15 }
 0x1d0   : > { %v469_v26 = vsel %vm435_vm1, %v2069_v25, 0.0  ;;  %1085 = vst [vmem:[#allocation1] ss:$2 sm:$0xff] %v1881_v8  ;;  %v1081_v10 = vpack.c.bf16 %v1065_v45, %v1065_v45 }
 0x1d1   : > { %1087 = vst [vmem:[#allocation1 + $0x1] ss:$2 sm:$0xff] %v1883_v9 }
 0x1d2   : > { %470 = vadd.xlane.f32.xlu1 %v469_v26  ;;  %v1141_v33 = vunpack.c.l.b16 %v1081_v10  ;;  %v1142_v26 = vunpack.c.l.b16 %v1082_v11  ;;  %v779_v10 = vunpack.c.l.b16 %v624_v28 }
 0x1d4   : > { %v1143_v40 = vpack.c.b16 %v1142_v26, %v1141_v33 }
 0x1d5   : > { %664 = vrot.lane.b32.xlu0 %v663_v34, %s1779_s8  ;;  %v1177_v34 = vpack.c.b16 %v1176_v31, %v1175_v30 }
 0x1d8   : > { %v1092_v1 = vld.sshfl [vmem:[#allocation1] sm:$0xff pattern:$0x75316420] }
 0x1d9   : > { %v1108_v6 = vpack.c.bf16 %v1092_v1, %v1092_v1  ;;  %1112 = vst [vmem:[#allocation1] ss:$2 sm:$0xff] %v1881_v8 }
 0x1da   : > { %1114 = vst [vmem:[#allocation1 + $0x1] ss:$2 sm:$0xff] %v1883_v9  ;;  %v1102_v9 = vld.sshfl [vmem:[#allocation1 + $0x20] sm:$0xff pattern:$0x75316420] }
 0x1db   : > { %v1148_v18 = vunpack.c.l.b16 %v1108_v6  ;;  %1122 = vst [vmem:[#allocation1 + $0x20] ss:$2 sm:$0xff] %v1891_v12  ;;  %v1110_v32 = vpack.c.bf16 %v1102_v9, %v1102_v9  ;;  %v1183_v12 = vunpack.c.l.b16 %v1111_v38  ;;  %v622_v9 = vpack.c.bf16 %v2024_v57, %v2024_v57 }
 0x1dc   : > { %1124 = vst [vmem:[#allocation1 + $0x21] ss:$2 sm:$0xff] %v1894_v13  ;;  %v631_v13 = vpop.permute.xlu1 %630 }
 0x1dd   : > { %v1150_v8 = vpack.c.b16 %v1149_v22, %v1148_v18  ;;  %v1182_v39 = vunpack.c.l.b16 %v1110_v32  ;;  %v749_v30 = vunpack.c.l.b16 %v622_v9 }
 0x1df   : > { %1151 = vrot.lane.b32.xlu0 %v1150_v8, %s1782_s21  ;;  %v1184_v42 = vpack.c.b16 %v1183_v12, %v1182_v39  ;;  %v621_v8 = vpack.c.bf16 %v2014_v53, %v2014_v53 }
 0x1e1   : > { %894 = vrot.lane.b32.xlu2 %v893_v46, %s1780_s9  ;;  %v748_v11 = vunpack.c.l.b16 %v621_v8 }
 0x1e3   : > { %v750_v32 = vpack.c.b16 %v749_v30, %v748_v11 }
 0x1e7   : > { %1178 = vrot.lane.b32.xlu0 %v1177_v34, %s1783_s12 }
 0x1e9   : > { %887 = vrot.lane.b32.xlu2 %v886_v0, %s1781_s10 }
 0x1eb   : > { %928 = vrot.lane.b32.xlu1 %v927_v5, %s1780_s9 }
 0x1f1   : > { %1185 = vrot.lane.b32.xlu2 %v1184_v42, %s1782_s21 }
 0x1f3   : > { %921 = vrot.lane.b32.xlu1 %v920_v29, %s1781_s10  ;;  %v778_v29 = vunpack.c.l.b16 %v623_v23 }
 0x1f5   : > { %v780_v31 = vpack.c.b16 %v779_v10, %v778_v29 }
 0x1f7   : > { %781 = vrot.lane.b32.xlu0 %v780_v31, %s1784_s22 }
 0x1fb   : > { %1144 = vrot.lane.b32.xlu1 %v1143_v40, %s1783_s12 }
 0x203   : > { %751 = vrot.lane.b32.xlu1 %v750_v32, %s1784_s22 }
 0x234   : > { %v462_v43 = vpop.xlane.xlu0 %461 }
 0x235   : > { %1664 = vrcp.f32 %v462_v43 }
 0x23b   : > { %v1665_v47 = vpop.eup %1664 }
 0x23c   : > { %v468_v45 = vpop.xlane.xlu2 %467  ;;  %v476_v48 = vmul.f32 %v1665_v47, %v2032_v63 }
 0x23d   : > { %v465_v46 = vpop.xlane.xlu1 %464 }
 0x23e   : > { %1666 = vrcp.f32 %v465_v46  ;;  %v480_v54 = vpack.c.bf16 %v476_v48, %v476_v48 }
 0x23f   : > { %1668 = vrcp.f32 %v468_v45 }
 0x240   : > { %v486_v59 = vunpack.c.l.b16 %v480_v54 }
 0x244   : > { %v1667_v14 = vpop.eup %1666  ;;  %v895_v58 = vpop.permute.xlu2 %894 }
 0x245   : > { %v471_v51 = vpop.xlane.xlu1 %470  ;;  %v477_v15 = vmul.f32 %v1667_v14, %v2052_v20  ;;  %v1669_v50 = vpop.eup %1668  ;;  %v900_v1 = vsel %vm382_vm0, %v895_v58, 0 }
 0x246   : > { %1670 = vrcp.f32 %v471_v51  ;;  %v478_v61 = vmul.f32 %v1669_v50, %v2050_v16 }
 0x247   : > { %v481_v56 = vpack.c.bf16 %v477_v15, %v477_v15  ;;  %v665_v18 = vpop.permute.xlu0 %664 }
 0x248   : > { %v482_v4 = vpack.c.bf16 %v478_v61, %v478_v61 }
 0x249   : > { %v487_v60 = vunpack.c.l.b16 %v481_v56 }
 0x24a   : > { %v516_v5 = vunpack.c.l.b16 %v482_v4 }
 0x24b   : > { %v488_v0 = vpack.c.b16 %v487_v60, %v486_v59 }
 0x24c   : > { %v1671_v2 = vpop.eup %1670  ;;  %v888_v17 = vpop.permute.xlu2 %887 }
 0x24d   : > { %1561 = vmatmul.msk.bf16.vlgmr.msra.gmra.mxu2 %vm435_vm1, %v488_v0  ;;  %v479_v63 = vmul.f32 %v1671_v2, %v2069_v25 }
 0x24e   : > { %909 = vmatpush.bf16.xpose.msra.mxu2 %v900_v1 }
 0x24f   : > { %v483_v20 = vpack.c.bf16 %v479_v63, %v479_v63 }
 0x251   : > { %v517_v6 = vunpack.c.l.b16 %v483_v20  ;;  %v1152_v3 = vpop.permute.xlu0 %1151 }
 0x252   : > { %v1157_v25 = vsel %vm382_vm0, %v1152_v3, 0 }
 0x253   : > { %v518_v7 = vpack.c.b16 %v517_v6, %v516_v5 }
 0x254   : > { %v1186_v21 = vpop.permute.xlu2 %1185 }
 0x255   : > { %1562 = vmatmul.msk.bf16.vlgmr.msra.gmra.mxu3 %vm435_vm1, %v518_v7  ;;  %v1191_v22 = vsel %vm382_vm0, %v1186_v21, 0 }
 0x259   : > { %v1179_v53 = vpop.permute.xlu0 %1178 }
 0x25d   : > { %1563 = vmatmul.msk.bf16.vlgmr.msrb.gmra.mxu2 %vm382_vm0, %v631_v13  ;;  %v929_v16 = vpop.permute.xlu1 %928 }
 0x25e   : > { %v934_v62 = vsel %vm382_vm0, %v929_v16, 0  ;;  %1166 = vmatpush.bf16.xpose.msrb.mxu2 %v1157_v25 }
 0x25f   : > { %943 = vmatpush.bf16.xpose.msra.mxu3 %v934_v62 }
 0x265   : > { %1564 = vmatmul.msk.bf16.vlgmr.msrb.gmra.mxu3 %vm382_vm0, %v665_v18  ;;  %v922_v52 = vpop.permute.xlu1 %921 }
 0x267   : > { %1200 = vmatpush.bf16.xpose.msrb.mxu3 %v1191_v22 }
 0x269   : > { %v782_v5 = vpop.permute.xlu0 %781 }
 0x26a   : > { %794 = vmatpush.bf16.msrb.mxu1 %v782_v5 }
 0x26d   : > { %1567 = vmatmul.msk.bf16.vlgmr.msra.gmra.mxu2 %vm382_vm0, %v888_v17  ;;  %v1145_v55 = vpop.permute.xlu1 %1144 }
 0x275   : > { %1568 = vmatmul.msk.bf16.vlgmr.msra.gmra.mxu3 %vm382_vm0, %v922_v52  ;;  %v752_v54 = vpop.permute.xlu1 %751 }
 0x276   : > { %764 = vmatpush.bf16.msrb.mxu0 %v752_v54 }
 0x27d   : > { %1571 = vmatmul.msk.bf16.vlgmr.msrb.gmra.mxu2 %vm382_vm0, %v1145_v55 }
 0x285   : > { %1572 = vmatmul.msk.bf16.vlgmr.msrb.gmra.mxu3 %vm382_vm0, %v1179_v53 }
 0x2d0   : > { %v2140_v57 = vpop.f32.mrf.mxu2 }
 0x2d8   : > { %v2142_v33 = vpop.f32.mrf.mxu2  ;;  %v2144_v26 = vpop.f32.mrf.mxu3 }
 0x2e0   : > { %v2146_v34 = vpop.f32.mrf.mxu3  ;;  %v654_v36 = vpop.f32.mrf.mxu2 }
 0x2e1   : > { %v655_v38 = vadd.f32 %v1969_v19, %v654_v36 }
 0x2e3   : > { %v693_v39 = vsel %vm435_vm1, %v655_v38, -inf }
 0x2e4   : > { %694 = vmax.xlane.f32.xlu2 %v693_v39 }
 0x2e8   : > { %v656_v12 = vpop.f32.mrf.mxu2  ;;  %v688_v40 = vpop.f32.mrf.mxu3 }
 0x2e9   : > { %v2151_v42 = vadd.f32 %v1986_v27, %v656_v12  ;;  %v689_v13 = vadd.f32 %v688_v40, %v1977_v24 }
 0x2eb   : > { %v696_v43 = vsel %vm435_vm1, %v2151_v42, -inf  ;;  %v699_v45 = vsel %vm435_vm1, %v689_v13, -inf }
 0x2ec   : > { %697 = vmax.xlane.f32.xlu1 %v696_v43  ;;  %700 = vmax.xlane.f32.xlu0 %v699_v45 }
 0x2f0   : > { %v690_v46 = vpop.f32.mrf.mxu3  ;;  %v911_v47 = vpop.f32.mrf.mxu2 }
 0x2f1   : > { %v2158_v48 = vadd.f32 %v690_v46, %v2000_v35  ;;  %v2161_v14 = vadd.f32 %v1969_v19, %v911_v47 }
 0x2f3   : > { %v950_v51 = vsel %vm435_vm1, %v2161_v14, -inf  ;;  %v702_v15 = vsel %vm435_vm1, %v2158_v48, -inf }
 0x2f4   : > { %951 = vmax.xlane.f32.xlu1 %v950_v51  ;;  %703 = vmax.xlane.f32.xlu2 %v702_v15 }
 0x2f8   : > { %v913_v50 = vpop.f32.mrf.mxu2  ;;  %v945_v56 = vpop.f32.mrf.mxu3 }
 0x2f9   : > { %v2168_v58 = vadd.f32 %v1986_v27, %v913_v50  ;;  %v2171_v59 = vadd.f32 %v945_v56, %v1977_v24 }
 0x2fb   : > { %v953_v60 = vsel %vm435_vm1, %v2168_v58, -inf  ;;  %v956_v61 = vsel %vm435_vm1, %v2171_v59, -inf }
 0x2fc   : > { %954 = vmax.xlane.f32.xlu0 %v953_v60  ;;  %957 = vmax.xlane.f32.xlu2 %v956_v61 }
 0x300   : > { %v947_v0 = vpop.f32.mrf.mxu3  ;;  %v1168_v1 = vpop.f32.mrf.mxu2 }
 0x301   : > { %v2178_v2 = vadd.f32 %v947_v0, %v2000_v35  ;;  %v2181_v63 = vadd.f32 %v1969_v19, %v1168_v1 }
 0x303   : > { %v959_v4 = vsel %vm435_vm1, %v2178_v2, -inf  ;;  %v1207_v20 = vsel %vm435_vm1, %v2181_v63, -inf }
 0x304   : > { %960 = vmax.xlane.f32.xlu1 %v959_v4  ;;  %1208 = vmax.xlane.f32.xlu0 %v1207_v20 }
 0x308   : > { %v1170_v6 = vpop.f32.mrf.mxu2  ;;  %v1202_v7 = vpop.f32.mrf.mxu3 }
 0x309   : > { %v2188_v17 = vadd.f32 %v1986_v27, %v1170_v6  ;;  %v2191_v18 = vadd.f32 %v1202_v7, %v1977_v24  ;;  %v878_v24 = vpack.c.bf16 %v2074_v37, %v2074_v37  ;;  %v879_v27 = vpack.c.bf16 %v2079_v41, %v2079_v41 }
 0x30b   : > { %v1213_v19 = vsel %vm435_vm1, %v2191_v18, -inf  ;;  %v1210_v16 = vsel %vm435_vm1, %v2188_v17, -inf  ;;  %v1005_v25 = vunpack.c.l.b16 %v878_v24  ;;  %v1006_v22 = vunpack.c.l.b16 %v879_v27 }
 0x30c   : > { %1214 = vmax.xlane.f32.xlu1 %v1213_v19  ;;  %1211 = vmax.xlane.f32.xlu2 %v1210_v16 }
 0x30d   : > { %v1007_v23 = vpack.c.b16 %v1006_v22, %v1005_v25  ;;  %v1119_v25 = vld.sshfl [vmem:[#allocation1] sm:$0xff pattern:$0x75316420]  ;;  %v1120_v22 = vld.sshfl [vmem:[#allocation1 + $0x10] sm:$0xff pattern:$0x75316420] }
 0x310   : > { %v1204_v62 = vpop.f32.mrf.mxu3 }
 0x311   : > { %v2198_v21 = vadd.f32 %v1204_v62, %v2000_v35 }
 0x313   : > { %v1216_v3 = vsel %vm435_vm1, %v2198_v21, -inf }
 0x314   : > { %1217 = vmax.xlane.f32.xlu0 %v1216_v3 }
 0x325   : > { %1008 = vrot.lane.b32.xlu1 %v1007_v23, %s1785_s24  ;;  %v1135_v23 = vpack.c.bf16 %v1119_v25, %v1119_v25 }
 0x357   : > { %v695_v28 = vpop.xlane.xlu2 %694 }
 0x358   : > { %v705_v8 = vsub.f32 %v655_v38, %v695_v28  ;;  %v1136_v28 = vpack.c.bf16 %v1120_v22, %v1120_v22 }
 0x35a   : > { %v709_v35 = vmul.f32 1.442695, %v705_v8 }
 0x35c   : > { %1672 = vpow2.f32 %v709_v35  ;;  %v1262_v35 = vunpack.c.l.b16 %v1135_v23 }
 0x35f   : > { %v701_v9 = vpop.xlane.xlu0 %700  ;;  %v698_v29 = vpop.xlane.xlu1 %697 }
 0x360   : > { %v707_v10 = vsub.f32 %v689_v13, %v701_v9  ;;  %v706_v11 = vsub.f32 %v2151_v42, %v698_v29  ;;  %v1263_v9 = vunpack.c.l.b16 %v1136_v28  ;;  %v880_v29 = vpack.c.bf16 %v2084_v44, %v2084_v44 }
 0x362   : > { %v2208_v30 = vpop.eup %1672  ;;  %v713_v37 = vmul.f32 1.442695, %v707_v10  ;;  %v711_v31 = vmul.f32 1.442695, %v706_v11  ;;  %v881_v10 = vpack.c.bf16 %v2093_v49, %v2093_v49  ;;  %v1264_v11 = vpack.c.b16 %v1263_v9, %v1262_v35 }
 0x363   : > { %v717_v41 = vsel %vm435_vm1, %v2208_v30, 0.0 }
 0x364   : > { %1674 = vpow2.f32 %v713_v37  ;;  %718 = vadd.xlane.f32.xlu2 %v717_v41  ;;  %v1129_v37 = vld.sshfl [vmem:[#allocation1 + $0x20] sm:$0xff pattern:$0x75316420]  ;;  %v1035_v41 = vunpack.c.l.b16 %v880_v29 }
 0x365   : > { %1676 = vpow2.f32 %v711_v31  ;;  %v1130_v31 = vld.sshfl [vmem:[#allocation1 + $0x30] sm:$0xff pattern:$0x75316420] }
 0x367   : > { %v704_v32 = vpop.xlane.xlu2 %703  ;;  %v952_v52 = vpop.xlane.xlu1 %951 }
 0x368   : > { %v708_v55 = vsub.f32 %v2158_v48, %v704_v32  ;;  %v962_v38 = vsub.f32 %v2161_v14, %v952_v52  ;;  %v1036_v32 = vunpack.c.l.b16 %v881_v10  ;;  %v1137_v52 = vpack.c.bf16 %v1129_v37, %v1129_v37 }
 0x36a   : > { %v2213_v53 = vpop.eup %1674  ;;  %v715_v36 = vmul.f32 1.442695, %v708_v55  ;;  %v966_v42 = vmul.f32 1.442695, %v962_v38  ;;  %v1138_v55 = vpack.c.bf16 %v1130_v31, %v1130_v31  ;;  %v1292_v38 = vunpack.c.l.b16 %v1137_v52 }
 0x36b   : > { %v2216_v39 = vpop.eup %1676  ;;  %v723_v12 = vsel %vm435_vm1, %v2213_v53, 0.0 }
 0x36c   : > { %1678 = vpow2.f32 %v715_v36  ;;  %724 = vadd.xlane.f32.xlu0 %v723_v12  ;;  %v720_v40 = vsel %vm435_vm1, %v2216_v39, 0.0  ;;  %v1037_v36 = vpack.c.b16 %v1036_v32, %v1035_v41  ;;  %v1293_v12 = vunpack.c.l.b16 %v1138_v55 }
 0x36d   : > { %721 = vadd.xlane.f32.xlu1 %v720_v40  ;;  %1680 = vpow2.f32 %v966_v42 }
 0x36e   : > { %v1294_v40 = vpack.c.b16 %v1293_v12, %v1292_v38 }
 0x36f   : > { %v955_v13 = vpop.xlane.xlu0 %954  ;;  %v958_v43 = vpop.xlane.xlu2 %957 }
 0x370   : > { %v964_v46 = vsub.f32 %v2171_v59, %v958_v43  ;;  %v963_v56 = vsub.f32 %v2168_v58, %v955_v13 }
 0x372   : > { %v2222_v45 = vpop.eup %1678  ;;  %v970_v48 = vmul.f32 1.442695, %v964_v46  ;;  %v968_v0 = vmul.f32 1.442695, %v963_v56 }
 0x373   : > { %v726_v47 = vsel %vm435_vm1, %v2222_v45, 0.0  ;;  %v2227_v15 = vpop.eup %1680 }
 0x374   : > { %727 = vadd.xlane.f32.xlu2 %v726_v47  ;;  %1682 = vpow2.f32 %v970_v48  ;;  %v974_v59 = vsel %vm435_vm1, %v2227_v15, 0.0 }
 0x377   : > { %v1209_v14 = vpop.xlane.xlu0 %1208  ;;  %v961_v51 = vpop.xlane.xlu1 %960 }
 0x378   : > { %v1219_v54 = vsub.f32 %v2181_v63, %v1209_v14  ;;  %v965_v50 = vsub.f32 %v2178_v2, %v961_v51 }
 0x37a   : > { %v1223_v60 = vmul.f32 1.442695, %v1219_v54  ;;  %v972_v61 = vmul.f32 1.442695, %v965_v50  ;;  %v2234_v4 = vpop.eup %1682 }
 0x37b   : > { %v980_v6 = vsel %vm435_vm1, %v2234_v4, 0.0 }
 0x37c   : > { %1684 = vpow2.f32 %v1223_v60  ;;  %975 = vadd.xlane.f32.xlu2 %v974_v59 }
 0x37d   : > { %1686 = vpow2.f32 %v972_v61 }
 0x37e   : > { %1688 = vpow2.f32 %v968_v0 }
 0x37f   : > { %v1215_v1 = vpop.xlane.xlu1 %1214  ;;  %v1212_v44 = vpop.xlane.xlu2 %1211 }
 0x380   : > { %v1221_v20 = vsub.f32 %v2191_v18, %v1215_v1  ;;  %v1220_v49 = vsub.f32 %v2188_v17, %v1212_v44 }
 0x382   : > { %v2237_v63 = vpop.eup %1684  ;;  %v1227_v2 = vmul.f32 1.442695, %v1221_v20  ;;  %v1225_v13 = vmul.f32 1.442695, %v1220_v49 }
 0x383   : > { %v2239_v58 = vpop.eup %1686  ;;  %v1231_v5 = vsel %vm435_vm1, %v2237_v63, 0.0 }
 0x384   : > { %1232 = vadd.xlane.f32.xlu1 %v1231_v5  ;;  %981 = vadd.xlane.f32.xlu2 %v980_v6  ;;  %v983_v7 = vsel %vm435_vm1, %v2239_v58, 0.0  ;;  %1690 = vpow2.f32 %v1227_v2  ;;  %v2247_v19 = vpop.eup %1688 }
 0x385   : > { %984 = vadd.xlane.f32.xlu0 %v983_v7  ;;  %v977_v24 = vsel %vm435_vm1, %v2247_v19, 0.0 }
 0x387   : > { %v1218_v18 = vpop.xlane.xlu0 %1217 }
 0x388   : > { %v1222_v16 = vsub.f32 %v2198_v21, %v1218_v18 }
 0x38a   : > { %v1229_v62 = vmul.f32 1.442695, %v1222_v16  ;;  %v2250_v3 = vpop.eup %1690 }
 0x38b   : > { %v1237_v27 = vsel %vm435_vm1, %v2250_v3, 0.0 }
 0x38c   : > { %1692 = vpow2.f32 %v1229_v62  ;;  %978 = vadd.xlane.f32.xlu2 %v977_v24 }
 0x38d   : > { %1238 = vadd.xlane.f32.xlu0 %v1237_v27  ;;  %1694 = vpow2.f32 %v1225_v13 }
 0x392   : > { %v2256_v8 = vpop.eup %1692 }
 0x393   : > { %v1240_v21 = vsel %vm435_vm1, %v2256_v8, 0.0  ;;  %v2266_v43 = vpop.eup %1694 }
 0x394   : > { %v1234_v46 = vsel %vm435_vm1, %v2266_v43, 0.0 }
 0x395   : > { %1241 = vadd.xlane.f32.xlu0 %v1240_v21 }
 0x397   : > { %v1009_v42 = vpop.permute.xlu1 %1008 }
 0x398   : > { %1021 = vmatpush.bf16.msra.mxu0 %v1009_v42 }
 0x39d   : > { %1265 = vrot.lane.b32.xlu1 %v1264_v11, %s1786_s25 }
 0x3a4   : > { %1038 = vrot.lane.b32.xlu2 %v1037_v36, %s1785_s24 }
 0x3a9   : > { %1295 = vrot.lane.b32.xlu0 %v1294_v40, %s1786_s25 }
 0x3cd   : > { %1235 = vadd.xlane.f32.xlu2 %v1234_v46 }
 0x3d7   : > { %v719_v47 = vpop.xlane.xlu2 %718 }
 0x3d8   : > { %1696 = vrcp.f32 %v719_v47 }
 0x3de   : > { %v1697_v51 = vpop.eup %1696 }
 0x3df   : > { %v725_v48 = vpop.xlane.xlu0 %724  ;;  %v733_v54 = vmul.f32 %v1697_v51, %v2208_v30 }
 0x3e0   : > { %v722_v14 = vpop.xlane.xlu1 %721 }
 0x3e1   : > { %1698 = vrcp.f32 %v722_v14  ;;  %v737_v60 = vpack.c.bf16 %v733_v54, %v733_v54 }
 0x3e2   : > { %1700 = vrcp.f32 %v725_v48 }
 0x3e3   : > { %v743_v1 = vunpack.c.l.b16 %v737_v60 }
 0x3e7   : > { %v1699_v50 = vpop.eup %1698  ;;  %v728_v56 = vpop.xlane.xlu2 %727 }
 0x3e8   : > { %v1701_v17 = vpop.eup %1700  ;;  %v734_v61 = vmul.f32 %v1699_v50, %v2216_v39  ;;  %1702 = vrcp.f32 %v728_v56 }
 0x3e9   : > { %v735_v0 = vmul.f32 %v1701_v17, %v2213_v53 }
 0x3ea   : > { %v738_v59 = vpack.c.bf16 %v734_v61, %v734_v61 }
 0x3eb   : > { %v739_v6 = vpack.c.bf16 %v735_v0, %v735_v0 }
 0x3ec   : > { %v744_v20 = vunpack.c.l.b16 %v738_v59 }
 0x3ed   : > { %v773_v16 = vunpack.c.l.b16 %v739_v6 }
 0x3ee   : > { %v1703_v2 = vpop.eup %1702  ;;  %v745_v5 = vpack.c.b16 %v744_v20, %v743_v1 }
 0x3ef   : > { %v736_v7 = vmul.f32 %v1703_v2, %v2222_v45  ;;  %v976_v18 = vpop.xlane.xlu2 %975 }
 0x3f0   : > { %1565 = vmatmul.msk.bf16.vlgmr.msrb.gmra.mxu0 %vm435_vm1, %v745_v5 }
 0x3f1   : > { %v740_v30 = vpack.c.bf16 %v736_v7, %v736_v7 }
 0x3f3   : > { %v774_v62 = vunpack.c.l.b16 %v740_v30 }
 0x3f5   : > { %v775_v24 = vpack.c.b16 %v774_v62, %v773_v16 }
 0x3f7   : > { %1566 = vmatmul.msk.bf16.vlgmr.msrb.gmra.mxu1 %vm435_vm1, %v775_v24  ;;  %v982_v39 = vpop.xlane.xlu2 %981  ;;  %v1233_v41 = vpop.xlane.xlu1 %1232 }
 0x3f8   : > { %1704 = vrcp.f32 %v982_v39  ;;  %v985_v27 = vpop.xlane.xlu0 %984 }
 0x3f9   : > { %1706 = vrcp.f32 %v985_v27 }
 0x3fa   : > { %1708 = vrcp.f32 %v976_v18 }
 0x3fe   : > { %v1705_v53 = vpop.eup %1704 }
 0x3ff   : > { %v1707_v25 = vpop.eup %1706  ;;  %v992_v22 = vmul.f32 %v1705_v53, %v2234_v4  ;;  %v979_v23 = vpop.xlane.xlu2 %978 }
 0x400   : > { %v1709_v45 = vpop.eup %1708  ;;  %v993_v28 = vmul.f32 %v1707_v25, %v2239_v58  ;;  %1710 = vrcp.f32 %v979_v23  ;;  %v1239_v21 = vpop.xlane.xlu0 %1238 }
 0x401   : > { %v996_v35 = vpack.c.bf16 %v992_v22, %v992_v22  ;;  %v990_v29 = vmul.f32 %v1709_v45, %v2227_v15 }
 0x402   : > { %v997_v9 = vpack.c.bf16 %v993_v28, %v993_v28 }
 0x403   : > { %v1030_v10 = vunpack.c.l.b16 %v996_v35  ;;  %v994_v31 = vpack.c.bf16 %v990_v29, %v990_v29 }
 0x404   : > { %v1031_v11 = vunpack.c.l.b16 %v997_v9 }
 0x405   : > { %v1000_v58 = vunpack.c.l.b16 %v994_v31 }
 0x406   : > { %v1711_v37 = vpop.eup %1710  ;;  %v1032_v4 = vpack.c.b16 %v1031_v11, %v1030_v10 }
 0x407   : > { %v991_v32 = vmul.f32 %v1711_v37, %v2247_v19  ;;  %v1039_v52 = vpop.permute.xlu2 %1038 }
 0x408   : > { %v1242_v55 = vpop.xlane.xlu0 %1241  ;;  %1051 = vmatpush.bf16.msra.mxu1 %v1039_v52 }
 0x409   : > { %v995_v36 = vpack.c.bf16 %v991_v32, %v991_v32  ;;  %1712 = vrcp.f32 %v1242_v55 }
 0x40a   : > { %1714 = vrcp.f32 %v1239_v21 }
 0x40b   : > { %v1001_v38 = vunpack.c.l.b16 %v995_v36  ;;  %1570 = vmatmul.msk.bf16.vlgmr.msra.gmra.mxu1 %vm435_vm1, %v1032_v4  ;;  %1716 = vrcp.f32 %v1233_v41 }
 0x40d   : > { %v1002_v12 = vpack.c.b16 %v1001_v38, %v1000_v58 }
 0x40f   : > { %v1713_v15 = vpop.eup %1712  ;;  %1569 = vmatmul.msk.bf16.vlgmr.msra.gmra.mxu0 %vm435_vm1, %v1002_v12  ;;  %v1266_v40 = vpop.permute.xlu1 %1265 }
 0x410   : > { %v1715_v44 = vpop.eup %1714  ;;  %1278 = vmatpush.bf16.msrb.mxu0 %v1266_v40  ;;  %v1250_v19 = vmul.f32 %v1713_v15, %v2256_v8 }
 0x411   : > { %v1249_v42 = vmul.f32 %v1715_v44, %v2250_v3  ;;  %v1717_v54 = vpop.eup %1716 }
 0x412   : > { %v1254_v49 = vpack.c.bf16 %v1250_v19, %v1250_v19  ;;  %v1247_v50 = vmul.f32 %v1717_v54, %v2237_v63 }
 0x413   : > { %v1253_v13 = vpack.c.bf16 %v1249_v42, %v1249_v42 }
 0x414   : > { %v1288_v46 = vunpack.c.l.b16 %v1254_v49  ;;  %v1251_v17 = vpack.c.bf16 %v1247_v50, %v1247_v50 }
 0x415   : > { %v1287_v47 = vunpack.c.l.b16 %v1253_v13 }
 0x416   : > { %v1257_v60 = vunpack.c.l.b16 %v1251_v17 }
 0x417   : > { %v1289_v14 = vpack.c.b16 %v1288_v46, %v1287_v47 }
 0x41b   : > { %v1296_v48 = vpop.permute.xlu0 %1295 }
 0x41c   : > { %1308 = vmatpush.bf16.msrb.mxu1 %v1296_v48 }
 0x41f   : > { %1574 = vmatmul.msk.bf16.vlgmr.msrb.gmra.mxu1 %vm435_vm1, %v1289_v14 }
 0x440   : > { %v1236_v51 = vpop.xlane.xlu2 %1235 }
 0x441   : > { %1718 = vrcp.f32 %v1236_v51 }
 0x447   : > { %v1719_v56 = vpop.eup %1718 }
 0x448   : > { %v1248_v8 = vmul.f32 %v1719_v56, %v2266_v43 }
 0x44a   : > { %v1252_v3 = vpack.c.bf16 %v1248_v8, %v1248_v8 }
 0x44c   : > { %v1258_v61 = vunpack.c.l.b16 %v1252_v3 }
 0x44e   : > { %v1259_v59 = vpack.c.b16 %v1258_v61, %v1257_v60 }
 0x450   : > { %1573 = vmatmul.msk.bf16.vlgmr.msrb.gmra.mxu0 %vm435_vm1, %v1259_v59 }
 0x46d   : > { %v766_v0 = vpop.f32.mrf.mxu0 }
 0x46e   : > { %1319 = vrot.lane.b32.xlu2 %v766_v0, %s1787_s26 }
 0x474   : > { %v796_v1 = vpop.f32.mrf.mxu1 }
 0x475   : > { %v768_v20 = vpop.f32.mrf.mxu0  ;;  %1323 = vrot.lane.b32.xlu0 %v796_v1, %s1787_s26 }
 0x476   : > { %1321 = vrot.lane.b32.xlu1 %v768_v20, %s1787_s26 }
 0x47c   : > { %v798_v2 = vpop.f32.mrf.mxu1 }
 0x47e   : > { %1325 = vrot.lane.b32.xlu1 %v798_v2, %s1787_s26 }
 0x488   : > { %v1053_v63 = vpop.f32.mrf.mxu1 }
 0x48c   : > { %v1023_v5 = vpop.f32.mrf.mxu0 }
 0x48d   : > { %1335 = vrot.lane.b32.xlu0 %v1023_v5, %s1788_s28 }
 0x490   : > { %v1055_v43 = vpop.f32.mrf.mxu1 }
 0x491   : > { %1341 = vrot.lane.b32.xlu2 %v1055_v43, %s1788_s28 }
 0x494   : > { %v1025_v6 = vpop.f32.mrf.mxu0 }
 0x495   : > { %1339 = vrot.lane.b32.xlu0 %v1053_v63, %s1788_s28  ;;  %1337 = vrot.lane.b32.xlu1 %v1025_v6, %s1788_s28 }
 0x49c   : > { %v1310_v7 = vpop.f32.mrf.mxu1 }
 0x49d   : > { %1355 = vrot.lane.b32.xlu2 %v1310_v7, %s1789_s29 }
 0x4a4   : > { %v1312_v30 = vpop.f32.mrf.mxu1 }
 0x4c8   : > { %v1320_v24 = vpop.permute.xlu2 %1319 }
 0x4c9   : > { %v1363_v39 = vsel %vm382_vm0, %v2140_v57, %v1320_v24 }
 0x4cd   : > { %v1280_v18 = vpop.f32.mrf.mxu0 }
 0x4ce   : > { %1351 = vrot.lane.b32.xlu1 %v1280_v18, %s1789_s29 }
 0x4d5   : > { %v1282_v16 = vpop.f32.mrf.mxu0 }
 0x4d6   : > { %1357 = vrot.lane.b32.xlu1 %v1312_v30, %s1789_s29  ;;  %1353 = vrot.lane.b32.xlu0 %v1282_v16, %s1789_s29 }
 0x4e7   : > { %v1324_v62 = vpop.permute.xlu0 %1323 }
 0x4e8   : > { %v1365_v22 = vsel %vm382_vm0, %v2144_v26, %v1324_v62  ;;  %v1322_v57 = vpop.permute.xlu1 %1321 }
 0x4e9   : > { %v1364_v31 = vsel %vm382_vm0, %v2142_v33, %v1322_v57 }
 0x4eb   : > { %v1342_v53 = vpop.permute.xlu2 %1341 }
 0x4f0   : > { %v1326_v26 = vpop.permute.xlu1 %1325 }
 0x4f1   : > { %v1366_v37 = vsel %vm382_vm0, %v2146_v34, %v1326_v26 }
 0x4f2   : > { %v1370_v52 = vsel %vm435_vm1, %v1366_v37, %v1342_v53 }
 0x4f7   : > { %v1356_v45 = vpop.permute.xlu2 %1355 }
 0x4ff   : > { %v1336_v27 = vpop.permute.xlu0 %1335 }
 0x500   : > { %v1367_v25 = vsel %vm435_vm1, %v1363_v39, %v1336_v27 }
 0x507   : > { %v1340_v23 = vpop.permute.xlu0 %1339  ;;  %v1338_v9 = vpop.permute.xlu1 %1337 }
 0x508   : > { %v1369_v28 = vsel %vm435_vm1, %v1365_v22, %v1340_v23  ;;  %v1368_v41 = vsel %vm435_vm1, %v1364_v31, %v1338_v9 }
 0x509   : > { %v1374_v21 = vsel %vm1371_vm2, %v1369_v28, %v1356_v45 }
 0x50a   : > { %v1382_v35 = vrot.slane %v1374_v21, 4  ;;  %1393 = vst.msk [vmem:[%s2296_s30 + $0x10] sm:$0xf] %vm1388_vm3, %v1374_v21 }
 0x50c   : > { %1394 = vst.msk [vmem:[%s2296_s30 + $0x14] sm:$0xf] %vm1388_vm3, %v1382_v35 }
 0x511   : > { %v1432_v40 = vld [vmem:[%s2296_s30 + $0x10] sm:$0xf] (%p1858_p6) }
 0x512   : > { %1433 = vst [vmem:[%s1407_s23 + $0x20] sm:$0xf] (%p1858_p6), %v1432_v40 }
 0x513   : > { %v1434_v44 = vld [vmem:[%s2296_s30 + $0x14] sm:$0xf] (%p1858_p6) }
 0x514   : > { %1435 = vst [vmem:[%s1407_s23 + $0x28] sm:$0xf] (%p1858_p6), %v1434_v44 }
 0x540   : > { %v1352_v29 = vpop.permute.xlu1 %1351 }
 0x541   : > { %v1372_v10 = vsel %vm1371_vm2, %v1367_v25, %v1352_v29 }
 0x542   : > { %v1380_v11 = vrot.slane %v1372_v10, 4  ;;  %1389 = vst.msk [vmem:[%s2296_s30] sm:$0xf] %vm1388_vm3, %v1372_v10 }
 0x544   : > { %1390 = vst.msk [vmem:[%s2296_s30 + $0x4] sm:$0xf] %vm1388_vm3, %v1380_v11 }
 0x548   : > { %v1354_v32 = vpop.permute.xlu0 %1353  ;;  %v1358_v55 = vpop.permute.xlu1 %1357 }
 0x549   : > { %v1373_v4 = vsel %vm1371_vm2, %v1368_v41, %v1354_v32  ;;  %v1375_v36 = vsel %vm1371_vm2, %v1370_v52, %v1358_v55  ;;  %1403 = sbr.rel (!%p1858_p6) target bundleno = 1366 (0x556), region = 77  ;;  %v1424_v33 = vld [vmem:[%s2296_s30] sm:$0xf] (%p1858_p6) }
 0x54a   : > { %v1381_v58 = vrot.slane %v1373_v4, 4  ;;  %1391 = vst.msk [vmem:[%s2296_s30 + $0x8] sm:$0xf] %vm1388_vm3, %v1373_v4  ;;  %v1383_v38 = vrot.slane %v1375_v36, 4 }
 0x54b   : > { %1395 = vst.msk [vmem:[%s2296_s30 + $0x18] sm:$0xf] %vm1388_vm3, %v1375_v36  ;;  %v1426_v34 = vld [vmem:[%s2296_s30 + $0x4] sm:$0xf] (%p1858_p6) }
 0x54c   : > { %1392 = vst.msk [vmem:[%s2296_s30 + $0xc] sm:$0xf] %vm1388_vm3, %v1381_v58 }
 0x54d   : > { %1396 = vst.msk [vmem:[%s2296_s30 + $0x1c] sm:$0xf] %vm1388_vm3, %v1383_v38 }
 0x54e   : > { %1425 = vst [vmem:[%s1407_s23] sm:$0xf] %v1424_v33 }
 0x54f   : > { %1427 = vst [vmem:[%s1407_s23 + $0x8] sm:$0xf] %v1426_v34 }
 0x551   : > { %v1428_v12 = vld [vmem:[%s2296_s30 + $0x8] sm:$0xf] }
 0x552   : > { %1429 = vst [vmem:[%s1407_s23 + $0x10] sm:$0xf] %v1428_v12  ;;  %v1436_v19 = vld [vmem:[%s2296_s30 + $0x18] sm:$0xf] }
 0x553   : > { %v1430_v15 = vld [vmem:[%s2296_s30 + $0xc] sm:$0xf]  ;;  %1437 = vst [vmem:[%s1407_s23 + $0x30] sm:$0xf] %v1436_v19 }
 0x554   : > { %1431 = vst [vmem:[%s1407_s23 + $0x18] sm:$0xf] %v1430_v15  ;;  %v1438_v42 = vld [vmem:[%s2296_s30 + $0x1c] sm:$0xf] }
 0x555   : > { %1439 = vst [vmem:[%s1407_s23 + $0x38] sm:$0xf] %v1438_v42 }
 0x556 PF: > { %s13_s18 = sadd.s32 1, %s1774_s18   ;;  %s2364_s12 = smov %s1754_s13 }
 0x557   : > { %p10_p13 = scmp.ge.s32.totalorder %s13_s18, 6   ;;  %s2365_s13 = smov %s1866_s27 }
 0x558   : > { %s2366_s14 = smov %s1766_s16  ;;  %s2367_s15 = smov %s1770_s17 }
 0x559   : > { %s2368_s16 = smov %s2371_s19  ;;  %s2369_s17 = smov %s2375_s20 }
 0x55a   :  { %12 = sbr.rel (!%p10_p13) target bundleno = 4 (0x4), region = 233 }

</bundles_post_ra>
